<compile_context>
chip_gen: v5e
topology: v5e:2x2
jax: 0.10.0
libtpu: 0.0.40
codegen_flags: <defaults>
</compile_context>

<pallas_src>
import functools

import jax
import jax.numpy as jnp
from jax.experimental import pallas as pl
from jax.experimental.pallas import tpu as pltpu


TCN_CHANNELS = [64, 96, 128, 160]
DILATIONS = [1, 2, 4, 8]          # 2**i for the 4 TCN levels
BN_EPS = 1e-5
HEAD_ARGS = 8                     # wa1, ba1, wa2, ba2, wc1, bc1, wc2, bc2


# ---------------------------------------------------------------------------
# Static per-block structure (depends only on T and the dilation)
# ---------------------------------------------------------------------------
def _make_block_meta(T, dilations=tuple(DILATIONS)):
    """Which conv taps / residual paths are alive for sequence length T.

    Conv tap k (k=0,1,2) reads the input shifted by (2-k)*dilation; the residual reads the
    input shifted by 2*padding = 4*dilation (PyTorch pads the already-padded x again and
    truncates to T).  Any shift >= T reads only padding zeros -> skipped statically.
    """
    meta = []
    for d in dilations:
        taps = ((0, 2 * d), (1, d), (2, 0))                   # (tap index, time shift)
        active = tuple((k, s) for k, s in taps if s < T)
        meta.append(dict(
            tap_idx=tuple(k for k, _ in active),
            conv_shifts=tuple(s for _, s in active),
            res_shift=4 * d,
            res_active=(4 * d) < T,
        ))
    return tuple(meta)


# ---------------------------------------------------------------------------
# Kernel helpers
# ---------------------------------------------------------------------------
def _shift_rows(h, shift):
    """Causal time shift: out[t] = h[t - shift] for t >= shift else 0  (static shift < T).

    XLU sublane roll + VPU mask — no MXU work, no (T, T) shift matrices.
    """
    if shift == 0:
        return h
    rolled = pltpu.roll(h, shift, axis=0)                      # rolled[t] = h[(t - shift) % T]
    t_idx = jax.lax.broadcasted_iota(jnp.int32, (h.shape[0], 1), 0)
    return jnp.where(t_idx >= shift, rolled, 0.0)              # mask wrapped rows


def _causal_conv_bn_relu(h, shifts, w_refs, b_ref):
    """Causal dilated Conv1d(k=3) + folded (conv-bias + BatchNorm) affine + ReLU.

    h:       (T, Cin) f32 activation
    shifts:  static tuple of live tap shifts (dead taps already dropped)
    w_refs:  one (Cin, Cout) bf16 ref per live tap, BN scale pre-folded in
    b_ref:   (1, Cout) f32 folded shift = conv_bias*scale + beta - mean*scale
    """
    acc = None
    for s, w_ref in zip(shifts, w_refs):
        xs = _shift_rows(h, s).astype(jnp.bfloat16)
        part = jnp.dot(xs, w_ref[...], preferred_element_type=jnp.float32)
        acc = part if acc is None else acc + part
    return jnp.maximum(acc + b_ref[...], 0.0)


# ---------------------------------------------------------------------------
# Fused kernel: one grid step == one batch element (whole forward pass)
# ---------------------------------------------------------------------------
def _fused_forward_kernel(*refs, block_meta):
    """refs = [x (T, C0), per-block weights..., 8 head params, out (1, num_classes)]."""
    out_ref = refs[-1]
    h = refs[0][...]                                           # (T, C0) f32, stays in vregs
    idx = 1

    # ---- TCN: 4 TemporalBlocks, fully fused --------------------------------
    for meta in block_meta:
        n = len(meta["conv_shifts"])
        w1_refs = refs[idx:idx + n]; idx += n
        b1_ref = refs[idx]; idx += 1
        w2_refs = refs[idx:idx + n]; idx += n
        b2_ref = refs[idx]; idx += 1
        if meta["res_active"]:
            wd_ref = refs[idx]; idx += 1
        bd_ref = refs[idx]; idx += 1

        h_in = h
        out1 = _causal_conv_bn_relu(h_in, meta["conv_shifts"], w1_refs, b1_ref)
        out2 = _causal_conv_bn_relu(out1, meta["conv_shifts"], w2_refs, b2_ref)

        # Residual: 1x1 downsample of the doubly left-padded input, truncated to T.
        # When 2*padding >= T the residual degenerates to a learned bias (as in torch).
        if meta["res_active"]:
            x_ds = _shift_rows(h_in, meta["res_shift"]).astype(jnp.bfloat16)
            res = jnp.dot(x_ds, wd_ref[...],
                          preferred_element_type=jnp.float32) + bd_ref[...]
        else:
            res = bd_ref[...]
        h = jnp.maximum(out2 + res, 0.0)                       # (T, Cout) f32

    # ---- Attention pooling over time + classifier MLP ----------------------
    (wa1_ref, ba1_ref, wa2_ref, ba2_ref,
     wc1_ref, bc1_ref, wc2_ref, bc2_ref) = refs[idx:idx + HEAD_ARGS]

    a = jnp.tanh(jnp.dot(h.astype(jnp.bfloat16), wa1_ref[...],
                         preferred_element_type=jnp.float32) + ba1_ref[...])    # (T, 64)
    s = jnp.sum(a * wa2_ref[...], axis=-1, keepdims=True) + ba2_ref[...]        # (T, 1)

    m = jnp.max(s, axis=0, keepdims=True)                      # softmax over time
    e = jnp.exp(s - m)
    attn = e / jnp.sum(e, axis=0, keepdims=True)               # (T, 1)
    ctx = jnp.sum(attn * h, axis=0, keepdims=True)             # (1, C)

    hc = jnp.maximum(jnp.dot(ctx.astype(jnp.bfloat16), wc1_ref[...],
                             preferred_element_type=jnp.float32) + bc1_ref[...], 0.0)
    out_ref[...] = (jnp.dot(hc.astype(jnp.bfloat16), wc2_ref[...],
                            preferred_element_type=jnp.float32) + bc2_ref[...])  # (1, NC)


# ---------------------------------------------------------------------------
# Wrapper: batch-parallel grid, weights as constant-index (VMEM-resident) blocks
# ---------------------------------------------------------------------------
def forward(x, prep):
    """x: (B, T, input_size) — same input convention as the PyTorch module."""
    B, T, Cin = x.shape
    num_classes = prep["bc2"].shape[1]
    block_meta = _make_block_meta(T)

    def const_spec(arr):                         # full-array block, never re-fetched
        nd = arr.ndim
        return pl.BlockSpec(arr.shape, lambda b, _nd=nd: (0,) * _nd)

    args = [x]
    for blk, meta in zip(prep["blocks"], block_meta):
        for k in meta["tap_idx"]:
            args.append(blk["w1_taps"][k])
        args.append(blk["b1"])
        for k in meta["tap_idx"]:
            args.append(blk["w2_taps"][k])
        args.append(blk["b2"])
        if meta["res_active"]:
            args.append(blk["wd"])
        args.append(blk["bd"])
    args += [prep["wa1"], prep["ba1"], prep["wa2"], prep["ba2"],
             prep["wc1"], prep["bc1"], prep["wc2"], prep["bc2"]]

    in_specs = [pl.BlockSpec((None, T, Cin), lambda b: (b, 0, 0))]       # per-sample slab
    in_specs += [const_spec(a) for a in args[1:]]

    out3 = pl.pallas_call(
        functools.partial(_fused_forward_kernel, block_meta=block_meta),
        out_shape=jax.ShapeDtypeStruct((B, 1, num_classes), jnp.float32),
        grid=(B,),
        in_specs=in_specs,
        out_specs=pl.BlockSpec((None, 1, num_classes), lambda b: (b, 0, 0)),
        compiler_params=pltpu.CompilerParams(dimension_semantics=("parallel",)),
    )(*args)
    return out3.reshape(B, num_classes)


# ---------------------------------------------------------------------------
# Host-side parameter prep: fold conv-bias + BN into (scaled weights, shift), cast to bf16
# ---------------------------------------------------------------------------
def prepare_params(params):
    prep = {"blocks": []}
    for blk in params["blocks"]:
        scale1 = blk["gamma1"] / jnp.sqrt(blk["var1"] + BN_EPS)          # (1, Cout)
        shift1 = blk["b1"] * scale1 + blk["beta1"] - blk["mean1"] * scale1
        scale2 = blk["gamma2"] / jnp.sqrt(blk["var2"] + BN_EPS)
        shift2 = blk["b2"] * scale2 + blk["beta2"] - blk["mean2"] * scale2
        prep["blocks"].append(dict(
            w1_taps=[(blk["w1"][k] * scale1).astype(jnp.bfloat16) for k in range(3)],
            b1=shift1,
            w2_taps=[(blk["w2"][k] * scale2).astype(jnp.bfloat16) for k in range(3)],
            b2=shift2,
            wd=blk["wd"].astype(jnp.bfloat16),
            bd=blk["bd"],
        ))
    prep["wa1"] = params["wa1"].astype(jnp.bfloat16); prep["ba1"] = params["ba1"]
    prep["wa2"] = params["wa2"];                      prep["ba2"] = params["ba2"]
    prep["wc1"] = params["wc1"].astype(jnp.bfloat16); prep["bc1"] = params["bc1"]
    prep["wc2"] = params["wc2"].astype(jnp.bfloat16); prep["bc2"] = params["bc2"]
    return prep


# ---------------------------------------------------------------------------
# Deterministic synthetic parameters (raw, torch-module-shaped)
# ---------------------------------------------------------------------------
def init_params(key, input_size, num_classes):
    keys = iter(jax.random.split(key, 128))

    def nrm(shape, s=0.1):
        return s * jax.random.normal(next(keys), shape, jnp.float32)

    params = {"blocks": []}
    cin = input_size
    for cout in TCN_CHANNELS:
        # NOTE: assumes cin != cout so the 1x1 downsample is always present
        # (true for tcn_channels=[64,96,128,160] with input_size != 64).
        params["blocks"].append(dict(
            w1=nrm((3, cin, cout)), b1=nrm((1, cout)),
            gamma1=1.0 + nrm((1, cout)), beta1=nrm((1, cout)),
            mean1=nrm((1, cout)), var1=jnp.abs(nrm((1, cout))) + 0.5,
            w2=nrm((3, cout, cout)), b2=nrm((1, cout)),
            gamma2=1.0 + nrm((1, cout)), beta2=nrm((1, cout)),
            mean2=nrm((1, cout)), var2=jnp.abs(nrm((1, cout))) + 0.5,
            wd=nrm((cin, cout)), bd=nrm((1, cout)),
        ))
        cin = cout

    c_last = TCN_CHANNELS[-1]
    # nn.Linear(in, out) weights stored as (in, out) so y = x @ W + b.
    params["wa1"] = nrm((c_last, 64));        params["ba1"] = nrm((1, 64))
    params["wa2"] = nrm((1, 64));             params["ba2"] = nrm((1, 1))
    params["wc1"] = nrm((c_last, 128));       params["bc1"] = nrm((1, 128))
    params["wc2"] = nrm((128, num_classes));  params["bc2"] = nrm((1, num_classes))
    return params


if __name__ == "__main__":
    B, T, INPUT_SIZE, NUM_CLASSES = 2, 16, 12, 5
    key = jax.random.PRNGKey(0)
    kx, kp = jax.random.split(key)
    x = jax.random.normal(kx, (B, T, INPUT_SIZE), jnp.float32)

    raw = init_params(kp, INPUT_SIZE, NUM_CLASSES)
    prep = prepare_params(raw)            # host-side BN fold + bf16 cast, done once

    fwd = jax.jit(forward)
    out = jax.block_until_ready(fwd(x, prep))
    assert out.shape == (B, NUM_CLASSES) and out.dtype == jnp.float32
    assert bool(jnp.all(jnp.isfinite(out)))
    print("KERNEL_OK")
</pallas_src>

<mosaic_0001>
module attributes {stable_mosaic.version = 11 : i64} {
  func.func @_fused_forward_kernel(%arg0: i32, %arg1: memref<1x16x12xf32, #tpu.memory_space<vmem>>, %arg2: memref<12x64xbf16, #tpu.memory_space<vmem>>, %arg3: memref<12x64xbf16, #tpu.memory_space<vmem>>, %arg4: memref<12x64xbf16, #tpu.memory_space<vmem>>, %arg5: memref<1x64xf32, #tpu.memory_space<vmem>>, %arg6: memref<64x64xbf16, #tpu.memory_space<vmem>>, %arg7: memref<64x64xbf16, #tpu.memory_space<vmem>>, %arg8: memref<64x64xbf16, #tpu.memory_space<vmem>>, %arg9: memref<1x64xf32, #tpu.memory_space<vmem>>, %arg10: memref<12x64xbf16, #tpu.memory_space<vmem>>, %arg11: memref<1x64xf32, #tpu.memory_space<vmem>>, %arg12: memref<64x96xbf16, #tpu.memory_space<vmem>>, %arg13: memref<64x96xbf16, #tpu.memory_space<vmem>>, %arg14: memref<64x96xbf16, #tpu.memory_space<vmem>>, %arg15: memref<1x96xf32, #tpu.memory_space<vmem>>, %arg16: memref<96x96xbf16, #tpu.memory_space<vmem>>, %arg17: memref<96x96xbf16, #tpu.memory_space<vmem>>, %arg18: memref<96x96xbf16, #tpu.memory_space<vmem>>, %arg19: memref<1x96xf32, #tpu.memory_space<vmem>>, %arg20: memref<64x96xbf16, #tpu.memory_space<vmem>>, %arg21: memref<1x96xf32, #tpu.memory_space<vmem>>, %arg22: memref<96x128xbf16, #tpu.memory_space<vmem>>, %arg23: memref<96x128xbf16, #tpu.memory_space<vmem>>, %arg24: memref<96x128xbf16, #tpu.memory_space<vmem>>, %arg25: memref<1x128xf32, #tpu.memory_space<vmem>>, %arg26: memref<128x128xbf16, #tpu.memory_space<vmem>>, %arg27: memref<128x128xbf16, #tpu.memory_space<vmem>>, %arg28: memref<128x128xbf16, #tpu.memory_space<vmem>>, %arg29: memref<1x128xf32, #tpu.memory_space<vmem>>, %arg30: memref<1x128xf32, #tpu.memory_space<vmem>>, %arg31: memref<128x160xbf16, #tpu.memory_space<vmem>>, %arg32: memref<128x160xbf16, #tpu.memory_space<vmem>>, %arg33: memref<1x160xf32, #tpu.memory_space<vmem>>, %arg34: memref<160x160xbf16, #tpu.memory_space<vmem>>, %arg35: memref<160x160xbf16, #tpu.memory_space<vmem>>, %arg36: memref<1x160xf32, #tpu.memory_space<vmem>>, %arg37: memref<1x160xf32, #tpu.memory_space<vmem>>, %arg38: memref<160x64xbf16, #tpu.memory_space<vmem>>, %arg39: memref<1x64xf32, #tpu.memory_space<vmem>>, %arg40: memref<1x64xf32, #tpu.memory_space<vmem>>, %arg41: memref<1x1xf32, #tpu.memory_space<vmem>>, %arg42: memref<160x128xbf16, #tpu.memory_space<vmem>>, %arg43: memref<1x128xf32, #tpu.memory_space<vmem>>, %arg44: memref<128x5xbf16, #tpu.memory_space<vmem>>, %arg45: memref<1x5xf32, #tpu.memory_space<vmem>>, %arg46: memref<1x1x5xf32, #tpu.memory_space<vmem>>) attributes {dimension_semantics = [#tpu.dimension_semantics<parallel>], iteration_bounds = array<i64: 2>, scalar_prefetch = 0 : i64, scratch_operands = 0 : i64, tpu.core_type = #tpu.core_type<tc>, window_params = [{transform_indices = @transform_0, window_bounds = array<i64: 1, 16, 12>}, {pipeline_mode = #tpu.pipeline_mode<synchronous>, transform_indices = @transform_1, window_bounds = array<i64: 12, 64>}, {pipeline_mode = #tpu.pipeline_mode<synchronous>, transform_indices = @transform_2, window_bounds = array<i64: 12, 64>}, {pipeline_mode = #tpu.pipeline_mode<synchronous>, transform_indices = @transform_3, window_bounds = array<i64: 12, 64>}, {pipeline_mode = #tpu.pipeline_mode<synchronous>, transform_indices = @transform_4, window_bounds = array<i64: 1, 64>}, {pipeline_mode = #tpu.pipeline_mode<synchronous>, transform_indices = @transform_5, window_bounds = array<i64: 64, 64>}, {pipeline_mode = #tpu.pipeline_mode<synchronous>, transform_indices = @transform_6, window_bounds = array<i64: 64, 64>}, {pipeline_mode = #tpu.pipeline_mode<synchronous>, transform_indices = @transform_7, window_bounds = array<i64: 64, 64>}, {pipeline_mode = #tpu.pipeline_mode<synchronous>, transform_indices = @transform_8, window_bounds = array<i64: 1, 64>}, {pipeline_mode = #tpu.pipeline_mode<synchronous>, transform_indices = @transform_9, window_bounds = array<i64: 12, 64>}, {pipeline_mode = #tpu.pipeline_mode<synchronous>, transform_indices = @transform_10, window_bounds = array<i64: 1, 64>}, {pipeline_mode = #tpu.pipeline_mode<synchronous>, transform_indices = @transform_11, window_bounds = array<i64: 64, 96>}, {pipeline_mode = #tpu.pipeline_mode<synchronous>, transform_indices = @transform_12, window_bounds = array<i64: 64, 96>}, {pipeline_mode = #tpu.pipeline_mode<synchronous>, transform_indices = @transform_13, window_bounds = array<i64: 64, 96>}, {pipeline_mode = #tpu.pipeline_mode<synchronous>, transform_indices = @transform_14, window_bounds = array<i64: 1, 96>}, {pipeline_mode = #tpu.pipeline_mode<synchronous>, transform_indices = @transform_15, window_bounds = array<i64: 96, 96>}, {pipeline_mode = #tpu.pipeline_mode<synchronous>, transform_indices = @transform_16, window_bounds = array<i64: 96, 96>}, {pipeline_mode = #tpu.pipeline_mode<synchronous>, transform_indices = @transform_17, window_bounds = array<i64: 96, 96>}, {pipeline_mode = #tpu.pipeline_mode<synchronous>, transform_indices = @transform_18, window_bounds = array<i64: 1, 96>}, {pipeline_mode = #tpu.pipeline_mode<synchronous>, transform_indices = @transform_19, window_bounds = array<i64: 64, 96>}, {pipeline_mode = #tpu.pipeline_mode<synchronous>, transform_indices = @transform_20, window_bounds = array<i64: 1, 96>}, {pipeline_mode = #tpu.pipeline_mode<synchronous>, transform_indices = @transform_21, window_bounds = array<i64: 96, 128>}, {pipeline_mode = #tpu.pipeline_mode<synchronous>, transform_indices = @transform_22, window_bounds = array<i64: 96, 128>}, {pipeline_mode = #tpu.pipeline_mode<synchronous>, transform_indices = @transform_23, window_bounds = array<i64: 96, 128>}, {pipeline_mode = #tpu.pipeline_mode<synchronous>, transform_indices = @transform_24, window_bounds = array<i64: 1, 128>}, {pipeline_mode = #tpu.pipeline_mode<synchronous>, transform_indices = @transform_25, window_bounds = array<i64: 128, 128>}, {pipeline_mode = #tpu.pipeline_mode<synchronous>, transform_indices = @transform_26, window_bounds = array<i64: 128, 128>}, {pipeline_mode = #tpu.pipeline_mode<synchronous>, transform_indices = @transform_27, window_bounds = array<i64: 128, 128>}, {pipeline_mode = #tpu.pipeline_mode<synchronous>, transform_indices = @transform_28, window_bounds = array<i64: 1, 128>}, {pipeline_mode = #tpu.pipeline_mode<synchronous>, transform_indices = @transform_29, window_bounds = array<i64: 1, 128>}, {pipeline_mode = #tpu.pipeline_mode<synchronous>, transform_indices = @transform_30, window_bounds = array<i64: 128, 160>}, {pipeline_mode = #tpu.pipeline_mode<synchronous>, transform_indices = @transform_31, window_bounds = array<i64: 128, 160>}, {pipeline_mode = #tpu.pipeline_mode<synchronous>, transform_indices = @transform_32, window_bounds = array<i64: 1, 160>}, {pipeline_mode = #tpu.pipeline_mode<synchronous>, transform_indices = @transform_33, window_bounds = array<i64: 160, 160>}, {pipeline_mode = #tpu.pipeline_mode<synchronous>, transform_indices = @transform_34, window_bounds = array<i64: 160, 160>}, {pipeline_mode = #tpu.pipeline_mode<synchronous>, transform_indices = @transform_35, window_bounds = array<i64: 1, 160>}, {pipeline_mode = #tpu.pipeline_mode<synchronous>, transform_indices = @transform_36, window_bounds = array<i64: 1, 160>}, {pipeline_mode = #tpu.pipeline_mode<synchronous>, transform_indices = @transform_37, window_bounds = array<i64: 160, 64>}, {pipeline_mode = #tpu.pipeline_mode<synchronous>, transform_indices = @transform_38, window_bounds = array<i64: 1, 64>}, {pipeline_mode = #tpu.pipeline_mode<synchronous>, transform_indices = @transform_39, window_bounds = array<i64: 1, 64>}, {pipeline_mode = #tpu.pipeline_mode<synchronous>, transform_indices = @transform_40, window_bounds = array<i64: 1, 1>}, {pipeline_mode = #tpu.pipeline_mode<synchronous>, transform_indices = @transform_41, window_bounds = array<i64: 160, 128>}, {pipeline_mode = #tpu.pipeline_mode<synchronous>, transform_indices = @transform_42, window_bounds = array<i64: 1, 128>}, {pipeline_mode = #tpu.pipeline_mode<synchronous>, transform_indices = @transform_43, window_bounds = array<i64: 128, 5>}, {pipeline_mode = #tpu.pipeline_mode<synchronous>, transform_indices = @transform_44, window_bounds = array<i64: 1, 5>}, {transform_indices = @transform_45, window_bounds = array<i64: 1, 1, 5>}]} {
    %c0 = arith.constant 0 : index
    %c0_0 = arith.constant 0 : index
    %c0_1 = arith.constant 0 : index
    %0 = vector.load %arg1[%c0, %c0_0, %c0_1] : memref<1x16x12xf32, #tpu.memory_space<vmem>>, vector<1x16x12xf32>
    %1 = vector.shape_cast %0 : vector<1x16x12xf32> to vector<16x12xf32>
    %c2_i32 = arith.constant 2 : i32
    %2 = tpu.dynamic_rotate %1 by %c2_i32 dim 0 : vector<16x12xf32>, i32 -> vector<16x12xf32>
    %3 = tpu.iota {dimensions = array<i32: 0>} : vector<16x1xi32>
    %c2_i32_2 = arith.constant 2 : i32
    %4 = vector.broadcast %c2_i32_2 : i32 to vector<16x1xi32>
    %5 = arith.cmpi sge, %3, %4 : vector<16x1xi32>
    %cst = arith.constant 0.000000e+00 : f32
    %6 = vector.shape_cast %5 : vector<16x1xi1> to vector<16x1xi1>
    %7 = vector.broadcast %6 : vector<16x1xi1> to vector<16x12xi1>
    %8 = vector.broadcast %cst : f32 to vector<16x12xf32>
    %9 = arith.select %7, %2, %8 : vector<16x12xi1>, vector<16x12xf32>
    %10 = arith.truncf %9 : vector<16x12xf32> to vector<16x12xbf16>
    %c0_3 = arith.constant 0 : index
    %c0_4 = arith.constant 0 : index
    %11 = vector.load %arg2[%c0_3, %c0_4] : memref<12x64xbf16, #tpu.memory_space<vmem>>, vector<12x64xbf16>
    %cst_5 = arith.constant dense<0.000000e+00> : vector<16x64xf32>
    %12 = tpu.matmul %10, %11, %cst_5 {dimension_numbers = #tpu.dot_dimension_numbers<[1], [0], [0], [1], [0, 0, 1, 1], [], []>} : vector<16x12xbf16>, vector<12x64xbf16>, vector<16x64xf32> -> vector<16x64xf32>
    %c1_i32 = arith.constant 1 : i32
    %13 = tpu.dynamic_rotate %1 by %c1_i32 dim 0 : vector<16x12xf32>, i32 -> vector<16x12xf32>
    %14 = tpu.iota {dimensions = array<i32: 0>} : vector<16x1xi32>
    %c1_i32_6 = arith.constant 1 : i32
    %15 = vector.broadcast %c1_i32_6 : i32 to vector<16x1xi32>
    %16 = arith.cmpi sge, %14, %15 : vector<16x1xi32>
    %cst_7 = arith.constant 0.000000e+00 : f32
    %17 = vector.shape_cast %16 : vector<16x1xi1> to vector<16x1xi1>
    %18 = vector.broadcast %17 : vector<16x1xi1> to vector<16x12xi1>
    %19 = vector.broadcast %cst_7 : f32 to vector<16x12xf32>
    %20 = arith.select %18, %13, %19 : vector<16x12xi1>, vector<16x12xf32>
    %21 = arith.truncf %20 : vector<16x12xf32> to vector<16x12xbf16>
    %c0_8 = arith.constant 0 : index
    %c0_9 = arith.constant 0 : index
    %22 = vector.load %arg3[%c0_8, %c0_9] : memref<12x64xbf16, #tpu.memory_space<vmem>>, vector<12x64xbf16>
    %cst_10 = arith.constant dense<0.000000e+00> : vector<16x64xf32>
    %23 = tpu.matmul %21, %22, %cst_10 {dimension_numbers = #tpu.dot_dimension_numbers<[1], [0], [0], [1], [0, 0, 1, 1], [], []>} : vector<16x12xbf16>, vector<12x64xbf16>, vector<16x64xf32> -> vector<16x64xf32>
    %24 = arith.addf %12, %23 : vector<16x64xf32>
    %25 = arith.truncf %1 : vector<16x12xf32> to vector<16x12xbf16>
    %c0_11 = arith.constant 0 : index
    %c0_12 = arith.constant 0 : index
    %26 = vector.load %arg4[%c0_11, %c0_12] : memref<12x64xbf16, #tpu.memory_space<vmem>>, vector<12x64xbf16>
    %cst_13 = arith.constant dense<0.000000e+00> : vector<16x64xf32>
    %27 = tpu.matmul %25, %26, %cst_13 {dimension_numbers = #tpu.dot_dimension_numbers<[1], [0], [0], [1], [0, 0, 1, 1], [], []>} : vector<16x12xbf16>, vector<12x64xbf16>, vector<16x64xf32> -> vector<16x64xf32>
    %28 = arith.addf %24, %27 : vector<16x64xf32>
    %c0_14 = arith.constant 0 : index
    %c0_15 = arith.constant 0 : index
    %29 = vector.load %arg5[%c0_14, %c0_15] : memref<1x64xf32, #tpu.memory_space<vmem>>, vector<1x64xf32>
    %30 = vector.broadcast %29 : vector<1x64xf32> to vector<16x64xf32>
    %31 = arith.addf %28, %30 : vector<16x64xf32>
    %cst_16 = arith.constant 0.000000e+00 : f32
    %32 = vector.broadcast %cst_16 : f32 to vector<16x64xf32>
    %33 = arith.maximumf %31, %32 : vector<16x64xf32>
    %c2_i32_17 = arith.constant 2 : i32
    %34 = tpu.dynamic_rotate %33 by %c2_i32_17 dim 0 : vector<16x64xf32>, i32 -> vector<16x64xf32>
    %35 = tpu.iota {dimensions = array<i32: 0>} : vector<16x1xi32>
    %c2_i32_18 = arith.constant 2 : i32
    %36 = vector.broadcast %c2_i32_18 : i32 to vector<16x1xi32>
    %37 = arith.cmpi sge, %35, %36 : vector<16x1xi32>
    %cst_19 = arith.constant 0.000000e+00 : f32
    %38 = vector.shape_cast %37 : vector<16x1xi1> to vector<16x1xi1>
    %39 = vector.broadcast %38 : vector<16x1xi1> to vector<16x64xi1>
    %40 = vector.broadcast %cst_19 : f32 to vector<16x64xf32>
    %41 = arith.select %39, %34, %40 : vector<16x64xi1>, vector<16x64xf32>
    %42 = arith.truncf %41 : vector<16x64xf32> to vector<16x64xbf16>
    %c0_20 = arith.constant 0 : index
    %c0_21 = arith.constant 0 : index
    %43 = vector.load %arg6[%c0_20, %c0_21] : memref<64x64xbf16, #tpu.memory_space<vmem>>, vector<64x64xbf16>
    %cst_22 = arith.constant dense<0.000000e+00> : vector<16x64xf32>
    %44 = tpu.matmul %42, %43, %cst_22 {dimension_numbers = #tpu.dot_dimension_numbers<[1], [0], [0], [1], [0, 0, 1, 1], [], []>} : vector<16x64xbf16>, vector<64x64xbf16>, vector<16x64xf32> -> vector<16x64xf32>
    %c1_i32_23 = arith.constant 1 : i32
    %45 = tpu.dynamic_rotate %33 by %c1_i32_23 dim 0 : vector<16x64xf32>, i32 -> vector<16x64xf32>
    %46 = tpu.iota {dimensions = array<i32: 0>} : vector<16x1xi32>
    %c1_i32_24 = arith.constant 1 : i32
    %47 = vector.broadcast %c1_i32_24 : i32 to vector<16x1xi32>
    %48 = arith.cmpi sge, %46, %47 : vector<16x1xi32>
    %cst_25 = arith.constant 0.000000e+00 : f32
    %49 = vector.shape_cast %48 : vector<16x1xi1> to vector<16x1xi1>
    %50 = vector.broadcast %49 : vector<16x1xi1> to vector<16x64xi1>
    %51 = vector.broadcast %cst_25 : f32 to vector<16x64xf32>
    %52 = arith.select %50, %45, %51 : vector<16x64xi1>, vector<16x64xf32>
    %53 = arith.truncf %52 : vector<16x64xf32> to vector<16x64xbf16>
    %c0_26 = arith.constant 0 : index
    %c0_27 = arith.constant 0 : index
    %54 = vector.load %arg7[%c0_26, %c0_27] : memref<64x64xbf16, #tpu.memory_space<vmem>>, vector<64x64xbf16>
    %cst_28 = arith.constant dense<0.000000e+00> : vector<16x64xf32>
    %55 = tpu.matmul %53, %54, %cst_28 {dimension_numbers = #tpu.dot_dimension_numbers<[1], [0], [0], [1], [0, 0, 1, 1], [], []>} : vector<16x64xbf16>, vector<64x64xbf16>, vector<16x64xf32> -> vector<16x64xf32>
    %56 = arith.addf %44, %55 : vector<16x64xf32>
    %57 = arith.truncf %33 : vector<16x64xf32> to vector<16x64xbf16>
    %c0_29 = arith.constant 0 : index
    %c0_30 = arith.constant 0 : index
    %58 = vector.load %arg8[%c0_29, %c0_30] : memref<64x64xbf16, #tpu.memory_space<vmem>>, vector<64x64xbf16>
    %cst_31 = arith.constant dense<0.000000e+00> : vector<16x64xf32>
    %59 = tpu.matmul %57, %58, %cst_31 {dimension_numbers = #tpu.dot_dimension_numbers<[1], [0], [0], [1], [0, 0, 1, 1], [], []>} : vector<16x64xbf16>, vector<64x64xbf16>, vector<16x64xf32> -> vector<16x64xf32>
    %60 = arith.addf %56, %59 : vector<16x64xf32>
    %c0_32 = arith.constant 0 : index
    %c0_33 = arith.constant 0 : index
    %61 = vector.load %arg9[%c0_32, %c0_33] : memref<1x64xf32, #tpu.memory_space<vmem>>, vector<1x64xf32>
    %62 = vector.broadcast %61 : vector<1x64xf32> to vector<16x64xf32>
    %63 = arith.addf %60, %62 : vector<16x64xf32>
    %cst_34 = arith.constant 0.000000e+00 : f32
    %64 = vector.broadcast %cst_34 : f32 to vector<16x64xf32>
    %65 = arith.maximumf %63, %64 : vector<16x64xf32>
    %c4_i32 = arith.constant 4 : i32
    %66 = tpu.dynamic_rotate %1 by %c4_i32 dim 0 : vector<16x12xf32>, i32 -> vector<16x12xf32>
    %67 = tpu.iota {dimensions = array<i32: 0>} : vector<16x1xi32>
    %c4_i32_35 = arith.constant 4 : i32
    %68 = vector.broadcast %c4_i32_35 : i32 to vector<16x1xi32>
    %69 = arith.cmpi sge, %67, %68 : vector<16x1xi32>
    %cst_36 = arith.constant 0.000000e+00 : f32
    %70 = vector.shape_cast %69 : vector<16x1xi1> to vector<16x1xi1>
    %71 = vector.broadcast %70 : vector<16x1xi1> to vector<16x12xi1>
    %72 = vector.broadcast %cst_36 : f32 to vector<16x12xf32>
    %73 = arith.select %71, %66, %72 : vector<16x12xi1>, vector<16x12xf32>
    %74 = arith.truncf %73 : vector<16x12xf32> to vector<16x12xbf16>
    %c0_37 = arith.constant 0 : index
    %c0_38 = arith.constant 0 : index
    %75 = vector.load %arg10[%c0_37, %c0_38] : memref<12x64xbf16, #tpu.memory_space<vmem>>, vector<12x64xbf16>
    %cst_39 = arith.constant dense<0.000000e+00> : vector<16x64xf32>
    %76 = tpu.matmul %74, %75, %cst_39 {dimension_numbers = #tpu.dot_dimension_numbers<[1], [0], [0], [1], [0, 0, 1, 1], [], []>} : vector<16x12xbf16>, vector<12x64xbf16>, vector<16x64xf32> -> vector<16x64xf32>
    %c0_40 = arith.constant 0 : index
    %c0_41 = arith.constant 0 : index
    %77 = vector.load %arg11[%c0_40, %c0_41] : memref<1x64xf32, #tpu.memory_space<vmem>>, vector<1x64xf32>
    %78 = vector.broadcast %77 : vector<1x64xf32> to vector<16x64xf32>
    %79 = arith.addf %76, %78 : vector<16x64xf32>
    %80 = arith.addf %65, %79 : vector<16x64xf32>
    %cst_42 = arith.constant 0.000000e+00 : f32
    %81 = vector.broadcast %cst_42 : f32 to vector<16x64xf32>
    %82 = arith.maximumf %80, %81 : vector<16x64xf32>
    %c4_i32_43 = arith.constant 4 : i32
    %83 = tpu.dynamic_rotate %82 by %c4_i32_43 dim 0 : vector<16x64xf32>, i32 -> vector<16x64xf32>
    %84 = tpu.iota {dimensions = array<i32: 0>} : vector<16x1xi32>
    %c4_i32_44 = arith.constant 4 : i32
    %85 = vector.broadcast %c4_i32_44 : i32 to vector<16x1xi32>
    %86 = arith.cmpi sge, %84, %85 : vector<16x1xi32>
    %cst_45 = arith.constant 0.000000e+00 : f32
    %87 = vector.shape_cast %86 : vector<16x1xi1> to vector<16x1xi1>
    %88 = vector.broadcast %87 : vector<16x1xi1> to vector<16x64xi1>
    %89 = vector.broadcast %cst_45 : f32 to vector<16x64xf32>
    %90 = arith.select %88, %83, %89 : vector<16x64xi1>, vector<16x64xf32>
    %91 = arith.truncf %90 : vector<16x64xf32> to vector<16x64xbf16>
    %c0_46 = arith.constant 0 : index
    %c0_47 = arith.constant 0 : index
    %92 = vector.load %arg12[%c0_46, %c0_47] : memref<64x96xbf16, #tpu.memory_space<vmem>>, vector<64x96xbf16>
    %cst_48 = arith.constant dense<0.000000e+00> : vector<16x96xf32>
    %93 = tpu.matmul %91, %92, %cst_48 {dimension_numbers = #tpu.dot_dimension_numbers<[1], [0], [0], [1], [0, 0, 1, 1], [], []>} : vector<16x64xbf16>, vector<64x96xbf16>, vector<16x96xf32> -> vector<16x96xf32>
    %c2_i32_49 = arith.constant 2 : i32
    %94 = tpu.dynamic_rotate %82 by %c2_i32_49 dim 0 : vector<16x64xf32>, i32 -> vector<16x64xf32>
    %95 = tpu.iota {dimensions = array<i32: 0>} : vector<16x1xi32>
    %c2_i32_50 = arith.constant 2 : i32
    %96 = vector.broadcast %c2_i32_50 : i32 to vector<16x1xi32>
    %97 = arith.cmpi sge, %95, %96 : vector<16x1xi32>
    %cst_51 = arith.constant 0.000000e+00 : f32
    %98 = vector.shape_cast %97 : vector<16x1xi1> to vector<16x1xi1>
    %99 = vector.broadcast %98 : vector<16x1xi1> to vector<16x64xi1>
    %100 = vector.broadcast %cst_51 : f32 to vector<16x64xf32>
    %101 = arith.select %99, %94, %100 : vector<16x64xi1>, vector<16x64xf32>
    %102 = arith.truncf %101 : vector<16x64xf32> to vector<16x64xbf16>
    %c0_52 = arith.constant 0 : index
    %c0_53 = arith.constant 0 : index
    %103 = vector.load %arg13[%c0_52, %c0_53] : memref<64x96xbf16, #tpu.memory_space<vmem>>, vector<64x96xbf16>
    %cst_54 = arith.constant dense<0.000000e+00> : vector<16x96xf32>
    %104 = tpu.matmul %102, %103, %cst_54 {dimension_numbers = #tpu.dot_dimension_numbers<[1], [0], [0], [1], [0, 0, 1, 1], [], []>} : vector<16x64xbf16>, vector<64x96xbf16>, vector<16x96xf32> -> vector<16x96xf32>
    %105 = arith.addf %93, %104 : vector<16x96xf32>
    %106 = arith.truncf %82 : vector<16x64xf32> to vector<16x64xbf16>
    %c0_55 = arith.constant 0 : index
    %c0_56 = arith.constant 0 : index
    %107 = vector.load %arg14[%c0_55, %c0_56] : memref<64x96xbf16, #tpu.memory_space<vmem>>, vector<64x96xbf16>
    %cst_57 = arith.constant dense<0.000000e+00> : vector<16x96xf32>
    %108 = tpu.matmul %106, %107, %cst_57 {dimension_numbers = #tpu.dot_dimension_numbers<[1], [0], [0], [1], [0, 0, 1, 1], [], []>} : vector<16x64xbf16>, vector<64x96xbf16>, vector<16x96xf32> -> vector<16x96xf32>
    %109 = arith.addf %105, %108 : vector<16x96xf32>
    %c0_58 = arith.constant 0 : index
    %c0_59 = arith.constant 0 : index
    %110 = vector.load %arg15[%c0_58, %c0_59] : memref<1x96xf32, #tpu.memory_space<vmem>>, vector<1x96xf32>
    %111 = vector.broadcast %110 : vector<1x96xf32> to vector<16x96xf32>
    %112 = arith.addf %109, %111 : vector<16x96xf32>
    %cst_60 = arith.constant 0.000000e+00 : f32
    %113 = vector.broadcast %cst_60 : f32 to vector<16x96xf32>
    %114 = arith.maximumf %112, %113 : vector<16x96xf32>
    %c4_i32_61 = arith.constant 4 : i32
    %115 = tpu.dynamic_rotate %114 by %c4_i32_61 dim 0 : vector<16x96xf32>, i32 -> vector<16x96xf32>
    %116 = tpu.iota {dimensions = array<i32: 0>} : vector<16x1xi32>
    %c4_i32_62 = arith.constant 4 : i32
    %117 = vector.broadcast %c4_i32_62 : i32 to vector<16x1xi32>
    %118 = arith.cmpi sge, %116, %117 : vector<16x1xi32>
    %cst_63 = arith.constant 0.000000e+00 : f32
    %119 = vector.shape_cast %118 : vector<16x1xi1> to vector<16x1xi1>
    %120 = vector.broadcast %119 : vector<16x1xi1> to vector<16x96xi1>
    %121 = vector.broadcast %cst_63 : f32 to vector<16x96xf32>
    %122 = arith.select %120, %115, %121 : vector<16x96xi1>, vector<16x96xf32>
    %123 = arith.truncf %122 : vector<16x96xf32> to vector<16x96xbf16>
    %c0_64 = arith.constant 0 : index
    %c0_65 = arith.constant 0 : index
    %124 = vector.load %arg16[%c0_64, %c0_65] : memref<96x96xbf16, #tpu.memory_space<vmem>>, vector<96x96xbf16>
    %cst_66 = arith.constant dense<0.000000e+00> : vector<16x96xf32>
    %125 = tpu.matmul %123, %124, %cst_66 {dimension_numbers = #tpu.dot_dimension_numbers<[1], [0], [0], [1], [0, 0, 1, 1], [], []>} : vector<16x96xbf16>, vector<96x96xbf16>, vector<16x96xf32> -> vector<16x96xf32>
    %c2_i32_67 = arith.constant 2 : i32
    %126 = tpu.dynamic_rotate %114 by %c2_i32_67 dim 0 : vector<16x96xf32>, i32 -> vector<16x96xf32>
    %127 = tpu.iota {dimensions = array<i32: 0>} : vector<16x1xi32>
    %c2_i32_68 = arith.constant 2 : i32
    %128 = vector.broadcast %c2_i32_68 : i32 to vector<16x1xi32>
    %129 = arith.cmpi sge, %127, %128 : vector<16x1xi32>
    %cst_69 = arith.constant 0.000000e+00 : f32
    %130 = vector.shape_cast %129 : vector<16x1xi1> to vector<16x1xi1>
    %131 = vector.broadcast %130 : vector<16x1xi1> to vector<16x96xi1>
    %132 = vector.broadcast %cst_69 : f32 to vector<16x96xf32>
    %133 = arith.select %131, %126, %132 : vector<16x96xi1>, vector<16x96xf32>
    %134 = arith.truncf %133 : vector<16x96xf32> to vector<16x96xbf16>
    %c0_70 = arith.constant 0 : index
    %c0_71 = arith.constant 0 : index
    %135 = vector.load %arg17[%c0_70, %c0_71] : memref<96x96xbf16, #tpu.memory_space<vmem>>, vector<96x96xbf16>
    %cst_72 = arith.constant dense<0.000000e+00> : vector<16x96xf32>
    %136 = tpu.matmul %134, %135, %cst_72 {dimension_numbers = #tpu.dot_dimension_numbers<[1], [0], [0], [1], [0, 0, 1, 1], [], []>} : vector<16x96xbf16>, vector<96x96xbf16>, vector<16x96xf32> -> vector<16x96xf32>
    %137 = arith.addf %125, %136 : vector<16x96xf32>
    %138 = arith.truncf %114 : vector<16x96xf32> to vector<16x96xbf16>
    %c0_73 = arith.constant 0 : index
    %c0_74 = arith.constant 0 : index
    %139 = vector.load %arg18[%c0_73, %c0_74] : memref<96x96xbf16, #tpu.memory_space<vmem>>, vector<96x96xbf16>
    %cst_75 = arith.constant dense<0.000000e+00> : vector<16x96xf32>
    %140 = tpu.matmul %138, %139, %cst_75 {dimension_numbers = #tpu.dot_dimension_numbers<[1], [0], [0], [1], [0, 0, 1, 1], [], []>} : vector<16x96xbf16>, vector<96x96xbf16>, vector<16x96xf32> -> vector<16x96xf32>
    %141 = arith.addf %137, %140 : vector<16x96xf32>
    %c0_76 = arith.constant 0 : index
    %c0_77 = arith.constant 0 : index
    %142 = vector.load %arg19[%c0_76, %c0_77] : memref<1x96xf32, #tpu.memory_space<vmem>>, vector<1x96xf32>
    %143 = vector.broadcast %142 : vector<1x96xf32> to vector<16x96xf32>
    %144 = arith.addf %141, %143 : vector<16x96xf32>
    %cst_78 = arith.constant 0.000000e+00 : f32
    %145 = vector.broadcast %cst_78 : f32 to vector<16x96xf32>
    %146 = arith.maximumf %144, %145 : vector<16x96xf32>
    %c8_i32 = arith.constant 8 : i32
    %147 = tpu.dynamic_rotate %82 by %c8_i32 dim 0 : vector<16x64xf32>, i32 -> vector<16x64xf32>
    %148 = tpu.iota {dimensions = array<i32: 0>} : vector<16x1xi32>
    %c8_i32_79 = arith.constant 8 : i32
    %149 = vector.broadcast %c8_i32_79 : i32 to vector<16x1xi32>
    %150 = arith.cmpi sge, %148, %149 : vector<16x1xi32>
    %cst_80 = arith.constant 0.000000e+00 : f32
    %151 = vector.shape_cast %150 : vector<16x1xi1> to vector<16x1xi1>
    %152 = vector.broadcast %151 : vector<16x1xi1> to vector<16x64xi1>
    %153 = vector.broadcast %cst_80 : f32 to vector<16x64xf32>
    %154 = arith.select %152, %147, %153 : vector<16x64xi1>, vector<16x64xf32>
    %155 = arith.truncf %154 : vector<16x64xf32> to vector<16x64xbf16>
    %c0_81 = arith.constant 0 : index
    %c0_82 = arith.constant 0 : index
    %156 = vector.load %arg20[%c0_81, %c0_82] : memref<64x96xbf16, #tpu.memory_space<vmem>>, vector<64x96xbf16>
    %cst_83 = arith.constant dense<0.000000e+00> : vector<16x96xf32>
    %157 = tpu.matmul %155, %156, %cst_83 {dimension_numbers = #tpu.dot_dimension_numbers<[1], [0], [0], [1], [0, 0, 1, 1], [], []>} : vector<16x64xbf16>, vector<64x96xbf16>, vector<16x96xf32> -> vector<16x96xf32>
    %c0_84 = arith.constant 0 : index
    %c0_85 = arith.constant 0 : index
    %158 = vector.load %arg21[%c0_84, %c0_85] : memref<1x96xf32, #tpu.memory_space<vmem>>, vector<1x96xf32>
    %159 = vector.broadcast %158 : vector<1x96xf32> to vector<16x96xf32>
    %160 = arith.addf %157, %159 : vector<16x96xf32>
    %161 = arith.addf %146, %160 : vector<16x96xf32>
    %cst_86 = arith.constant 0.000000e+00 : f32
    %162 = vector.broadcast %cst_86 : f32 to vector<16x96xf32>
    %163 = arith.maximumf %161, %162 : vector<16x96xf32>
    %c8_i32_87 = arith.constant 8 : i32
    %164 = tpu.dynamic_rotate %163 by %c8_i32_87 dim 0 : vector<16x96xf32>, i32 -> vector<16x96xf32>
    %165 = tpu.iota {dimensions = array<i32: 0>} : vector<16x1xi32>
    %c8_i32_88 = arith.constant 8 : i32
    %166 = vector.broadcast %c8_i32_88 : i32 to vector<16x1xi32>
    %167 = arith.cmpi sge, %165, %166 : vector<16x1xi32>
    %cst_89 = arith.constant 0.000000e+00 : f32
    %168 = vector.shape_cast %167 : vector<16x1xi1> to vector<16x1xi1>
    %169 = vector.broadcast %168 : vector<16x1xi1> to vector<16x96xi1>
    %170 = vector.broadcast %cst_89 : f32 to vector<16x96xf32>
    %171 = arith.select %169, %164, %170 : vector<16x96xi1>, vector<16x96xf32>
    %172 = arith.truncf %171 : vector<16x96xf32> to vector<16x96xbf16>
    %c0_90 = arith.constant 0 : index
    %c0_91 = arith.constant 0 : index
    %173 = vector.load %arg22[%c0_90, %c0_91] : memref<96x128xbf16, #tpu.memory_space<vmem>>, vector<96x128xbf16>
    %cst_92 = arith.constant dense<0.000000e+00> : vector<16x128xf32>
    %174 = tpu.matmul %172, %173, %cst_92 {dimension_numbers = #tpu.dot_dimension_numbers<[1], [0], [0], [1], [0, 0, 1, 1], [], []>} : vector<16x96xbf16>, vector<96x128xbf16>, vector<16x128xf32> -> vector<16x128xf32>
    %c4_i32_93 = arith.constant 4 : i32
    %175 = tpu.dynamic_rotate %163 by %c4_i32_93 dim 0 : vector<16x96xf32>, i32 -> vector<16x96xf32>
    %176 = tpu.iota {dimensions = array<i32: 0>} : vector<16x1xi32>
    %c4_i32_94 = arith.constant 4 : i32
    %177 = vector.broadcast %c4_i32_94 : i32 to vector<16x1xi32>
    %178 = arith.cmpi sge, %176, %177 : vector<16x1xi32>
    %cst_95 = arith.constant 0.000000e+00 : f32
    %179 = vector.shape_cast %178 : vector<16x1xi1> to vector<16x1xi1>
    %180 = vector.broadcast %179 : vector<16x1xi1> to vector<16x96xi1>
    %181 = vector.broadcast %cst_95 : f32 to vector<16x96xf32>
    %182 = arith.select %180, %175, %181 : vector<16x96xi1>, vector<16x96xf32>
    %183 = arith.truncf %182 : vector<16x96xf32> to vector<16x96xbf16>
    %c0_96 = arith.constant 0 : index
    %c0_97 = arith.constant 0 : index
    %184 = vector.load %arg23[%c0_96, %c0_97] : memref<96x128xbf16, #tpu.memory_space<vmem>>, vector<96x128xbf16>
    %cst_98 = arith.constant dense<0.000000e+00> : vector<16x128xf32>
    %185 = tpu.matmul %183, %184, %cst_98 {dimension_numbers = #tpu.dot_dimension_numbers<[1], [0], [0], [1], [0, 0, 1, 1], [], []>} : vector<16x96xbf16>, vector<96x128xbf16>, vector<16x128xf32> -> vector<16x128xf32>
    %186 = arith.addf %174, %185 : vector<16x128xf32>
    %187 = arith.truncf %163 : vector<16x96xf32> to vector<16x96xbf16>
    %c0_99 = arith.constant 0 : index
    %c0_100 = arith.constant 0 : index
    %188 = vector.load %arg24[%c0_99, %c0_100] : memref<96x128xbf16, #tpu.memory_space<vmem>>, vector<96x128xbf16>
    %cst_101 = arith.constant dense<0.000000e+00> : vector<16x128xf32>
    %189 = tpu.matmul %187, %188, %cst_101 {dimension_numbers = #tpu.dot_dimension_numbers<[1], [0], [0], [1], [0, 0, 1, 1], [], []>} : vector<16x96xbf16>, vector<96x128xbf16>, vector<16x128xf32> -> vector<16x128xf32>
    %190 = arith.addf %186, %189 : vector<16x128xf32>
    %c0_102 = arith.constant 0 : index
    %c0_103 = arith.constant 0 : index
    %191 = vector.load %arg25[%c0_102, %c0_103] : memref<1x128xf32, #tpu.memory_space<vmem>>, vector<1x128xf32>
    %192 = vector.broadcast %191 : vector<1x128xf32> to vector<16x128xf32>
    %193 = arith.addf %190, %192 : vector<16x128xf32>
    %cst_104 = arith.constant 0.000000e+00 : f32
    %194 = vector.broadcast %cst_104 : f32 to vector<16x128xf32>
    %195 = arith.maximumf %193, %194 : vector<16x128xf32>
    %c8_i32_105 = arith.constant 8 : i32
    %196 = tpu.dynamic_rotate %195 by %c8_i32_105 dim 0 : vector<16x128xf32>, i32 -> vector<16x128xf32>
    %197 = tpu.iota {dimensions = array<i32: 0>} : vector<16x1xi32>
    %c8_i32_106 = arith.constant 8 : i32
    %198 = vector.broadcast %c8_i32_106 : i32 to vector<16x1xi32>
    %199 = arith.cmpi sge, %197, %198 : vector<16x1xi32>
    %cst_107 = arith.constant 0.000000e+00 : f32
    %200 = vector.shape_cast %199 : vector<16x1xi1> to vector<16x1xi1>
    %201 = vector.broadcast %200 : vector<16x1xi1> to vector<16x128xi1>
    %202 = vector.broadcast %cst_107 : f32 to vector<16x128xf32>
    %203 = arith.select %201, %196, %202 : vector<16x128xi1>, vector<16x128xf32>
    %204 = arith.truncf %203 : vector<16x128xf32> to vector<16x128xbf16>
    %c0_108 = arith.constant 0 : index
    %c0_109 = arith.constant 0 : index
    %205 = vector.load %arg26[%c0_108, %c0_109] : memref<128x128xbf16, #tpu.memory_space<vmem>>, vector<128x128xbf16>
    %cst_110 = arith.constant dense<0.000000e+00> : vector<16x128xf32>
    %206 = tpu.matmul %204, %205, %cst_110 {dimension_numbers = #tpu.dot_dimension_numbers<[1], [0], [0], [1], [0, 0, 1, 1], [], []>} : vector<16x128xbf16>, vector<128x128xbf16>, vector<16x128xf32> -> vector<16x128xf32>
    %c4_i32_111 = arith.constant 4 : i32
    %207 = tpu.dynamic_rotate %195 by %c4_i32_111 dim 0 : vector<16x128xf32>, i32 -> vector<16x128xf32>
    %208 = tpu.iota {dimensions = array<i32: 0>} : vector<16x1xi32>
    %c4_i32_112 = arith.constant 4 : i32
    %209 = vector.broadcast %c4_i32_112 : i32 to vector<16x1xi32>
    %210 = arith.cmpi sge, %208, %209 : vector<16x1xi32>
    %cst_113 = arith.constant 0.000000e+00 : f32
    %211 = vector.shape_cast %210 : vector<16x1xi1> to vector<16x1xi1>
    %212 = vector.broadcast %211 : vector<16x1xi1> to vector<16x128xi1>
    %213 = vector.broadcast %cst_113 : f32 to vector<16x128xf32>
    %214 = arith.select %212, %207, %213 : vector<16x128xi1>, vector<16x128xf32>
    %215 = arith.truncf %214 : vector<16x128xf32> to vector<16x128xbf16>
    %c0_114 = arith.constant 0 : index
    %c0_115 = arith.constant 0 : index
    %216 = vector.load %arg27[%c0_114, %c0_115] : memref<128x128xbf16, #tpu.memory_space<vmem>>, vector<128x128xbf16>
    %cst_116 = arith.constant dense<0.000000e+00> : vector<16x128xf32>
    %217 = tpu.matmul %215, %216, %cst_116 {dimension_numbers = #tpu.dot_dimension_numbers<[1], [0], [0], [1], [0, 0, 1, 1], [], []>} : vector<16x128xbf16>, vector<128x128xbf16>, vector<16x128xf32> -> vector<16x128xf32>
    %218 = arith.addf %206, %217 : vector<16x128xf32>
    %219 = arith.truncf %195 : vector<16x128xf32> to vector<16x128xbf16>
    %c0_117 = arith.constant 0 : index
    %c0_118 = arith.constant 0 : index
    %220 = vector.load %arg28[%c0_117, %c0_118] : memref<128x128xbf16, #tpu.memory_space<vmem>>, vector<128x128xbf16>
    %cst_119 = arith.constant dense<0.000000e+00> : vector<16x128xf32>
    %221 = tpu.matmul %219, %220, %cst_119 {dimension_numbers = #tpu.dot_dimension_numbers<[1], [0], [0], [1], [0, 0, 1, 1], [], []>} : vector<16x128xbf16>, vector<128x128xbf16>, vector<16x128xf32> -> vector<16x128xf32>
    %222 = arith.addf %218, %221 : vector<16x128xf32>
    %c0_120 = arith.constant 0 : index
    %c0_121 = arith.constant 0 : index
    %223 = vector.load %arg29[%c0_120, %c0_121] : memref<1x128xf32, #tpu.memory_space<vmem>>, vector<1x128xf32>
    %224 = vector.broadcast %223 : vector<1x128xf32> to vector<16x128xf32>
    %225 = arith.addf %222, %224 : vector<16x128xf32>
    %cst_122 = arith.constant 0.000000e+00 : f32
    %226 = vector.broadcast %cst_122 : f32 to vector<16x128xf32>
    %227 = arith.maximumf %225, %226 : vector<16x128xf32>
    %c0_123 = arith.constant 0 : index
    %c0_124 = arith.constant 0 : index
    %228 = vector.load %arg30[%c0_123, %c0_124] : memref<1x128xf32, #tpu.memory_space<vmem>>, vector<1x128xf32>
    %229 = vector.broadcast %228 : vector<1x128xf32> to vector<16x128xf32>
    %230 = arith.addf %227, %229 : vector<16x128xf32>
    %cst_125 = arith.constant 0.000000e+00 : f32
    %231 = vector.broadcast %cst_125 : f32 to vector<16x128xf32>
    %232 = arith.maximumf %230, %231 : vector<16x128xf32>
    %c8_i32_126 = arith.constant 8 : i32
    %233 = tpu.dynamic_rotate %232 by %c8_i32_126 dim 0 : vector<16x128xf32>, i32 -> vector<16x128xf32>
    %234 = tpu.iota {dimensions = array<i32: 0>} : vector<16x1xi32>
    %c8_i32_127 = arith.constant 8 : i32
    %235 = vector.broadcast %c8_i32_127 : i32 to vector<16x1xi32>
    %236 = arith.cmpi sge, %234, %235 : vector<16x1xi32>
    %cst_128 = arith.constant 0.000000e+00 : f32
    %237 = vector.shape_cast %236 : vector<16x1xi1> to vector<16x1xi1>
    %238 = vector.broadcast %237 : vector<16x1xi1> to vector<16x128xi1>
    %239 = vector.broadcast %cst_128 : f32 to vector<16x128xf32>
    %240 = arith.select %238, %233, %239 : vector<16x128xi1>, vector<16x128xf32>
    %241 = arith.truncf %240 : vector<16x128xf32> to vector<16x128xbf16>
    %c0_129 = arith.constant 0 : index
    %c0_130 = arith.constant 0 : index
    %242 = vector.load %arg31[%c0_129, %c0_130] : memref<128x160xbf16, #tpu.memory_space<vmem>>, vector<128x160xbf16>
    %cst_131 = arith.constant dense<0.000000e+00> : vector<16x160xf32>
    %243 = tpu.matmul %241, %242, %cst_131 {dimension_numbers = #tpu.dot_dimension_numbers<[1], [0], [0], [1], [0, 0, 1, 1], [], []>} : vector<16x128xbf16>, vector<128x160xbf16>, vector<16x160xf32> -> vector<16x160xf32>
    %244 = arith.truncf %232 : vector<16x128xf32> to vector<16x128xbf16>
    %c0_132 = arith.constant 0 : index
    %c0_133 = arith.constant 0 : index
    %245 = vector.load %arg32[%c0_132, %c0_133] : memref<128x160xbf16, #tpu.memory_space<vmem>>, vector<128x160xbf16>
    %cst_134 = arith.constant dense<0.000000e+00> : vector<16x160xf32>
    %246 = tpu.matmul %244, %245, %cst_134 {dimension_numbers = #tpu.dot_dimension_numbers<[1], [0], [0], [1], [0, 0, 1, 1], [], []>} : vector<16x128xbf16>, vector<128x160xbf16>, vector<16x160xf32> -> vector<16x160xf32>
    %247 = arith.addf %243, %246 : vector<16x160xf32>
    %c0_135 = arith.constant 0 : index
    %c0_136 = arith.constant 0 : index
    %248 = vector.load %arg33[%c0_135, %c0_136] : memref<1x160xf32, #tpu.memory_space<vmem>>, vector<1x160xf32>
    %249 = vector.broadcast %248 : vector<1x160xf32> to vector<16x160xf32>
    %250 = arith.addf %247, %249 : vector<16x160xf32>
    %cst_137 = arith.constant 0.000000e+00 : f32
    %251 = vector.broadcast %cst_137 : f32 to vector<16x160xf32>
    %252 = arith.maximumf %250, %251 : vector<16x160xf32>
    %c8_i32_138 = arith.constant 8 : i32
    %253 = tpu.dynamic_rotate %252 by %c8_i32_138 dim 0 : vector<16x160xf32>, i32 -> vector<16x160xf32>
    %254 = tpu.iota {dimensions = array<i32: 0>} : vector<16x1xi32>
    %c8_i32_139 = arith.constant 8 : i32
    %255 = vector.broadcast %c8_i32_139 : i32 to vector<16x1xi32>
    %256 = arith.cmpi sge, %254, %255 : vector<16x1xi32>
    %cst_140 = arith.constant 0.000000e+00 : f32
    %257 = vector.shape_cast %256 : vector<16x1xi1> to vector<16x1xi1>
    %258 = vector.broadcast %257 : vector<16x1xi1> to vector<16x160xi1>
    %259 = vector.broadcast %cst_140 : f32 to vector<16x160xf32>
    %260 = arith.select %258, %253, %259 : vector<16x160xi1>, vector<16x160xf32>
    %261 = arith.truncf %260 : vector<16x160xf32> to vector<16x160xbf16>
    %c0_141 = arith.constant 0 : index
    %c0_142 = arith.constant 0 : index
    %262 = vector.load %arg34[%c0_141, %c0_142] : memref<160x160xbf16, #tpu.memory_space<vmem>>, vector<160x160xbf16>
    %cst_143 = arith.constant dense<0.000000e+00> : vector<16x160xf32>
    %263 = tpu.matmul %261, %262, %cst_143 {dimension_numbers = #tpu.dot_dimension_numbers<[1], [0], [0], [1], [0, 0, 1, 1], [], []>} : vector<16x160xbf16>, vector<160x160xbf16>, vector<16x160xf32> -> vector<16x160xf32>
    %264 = arith.truncf %252 : vector<16x160xf32> to vector<16x160xbf16>
    %c0_144 = arith.constant 0 : index
    %c0_145 = arith.constant 0 : index
    %265 = vector.load %arg35[%c0_144, %c0_145] : memref<160x160xbf16, #tpu.memory_space<vmem>>, vector<160x160xbf16>
    %cst_146 = arith.constant dense<0.000000e+00> : vector<16x160xf32>
    %266 = tpu.matmul %264, %265, %cst_146 {dimension_numbers = #tpu.dot_dimension_numbers<[1], [0], [0], [1], [0, 0, 1, 1], [], []>} : vector<16x160xbf16>, vector<160x160xbf16>, vector<16x160xf32> -> vector<16x160xf32>
    %267 = arith.addf %263, %266 : vector<16x160xf32>
    %c0_147 = arith.constant 0 : index
    %c0_148 = arith.constant 0 : index
    %268 = vector.load %arg36[%c0_147, %c0_148] : memref<1x160xf32, #tpu.memory_space<vmem>>, vector<1x160xf32>
    %269 = vector.broadcast %268 : vector<1x160xf32> to vector<16x160xf32>
    %270 = arith.addf %267, %269 : vector<16x160xf32>
    %cst_149 = arith.constant 0.000000e+00 : f32
    %271 = vector.broadcast %cst_149 : f32 to vector<16x160xf32>
    %272 = arith.maximumf %270, %271 : vector<16x160xf32>
    %c0_150 = arith.constant 0 : index
    %c0_151 = arith.constant 0 : index
    %273 = vector.load %arg37[%c0_150, %c0_151] : memref<1x160xf32, #tpu.memory_space<vmem>>, vector<1x160xf32>
    %274 = vector.broadcast %273 : vector<1x160xf32> to vector<16x160xf32>
    %275 = arith.addf %272, %274 : vector<16x160xf32>
    %cst_152 = arith.constant 0.000000e+00 : f32
    %276 = vector.broadcast %cst_152 : f32 to vector<16x160xf32>
    %277 = arith.maximumf %275, %276 : vector<16x160xf32>
    %278 = arith.truncf %277 : vector<16x160xf32> to vector<16x160xbf16>
    %c0_153 = arith.constant 0 : index
    %c0_154 = arith.constant 0 : index
    %279 = vector.load %arg38[%c0_153, %c0_154] : memref<160x64xbf16, #tpu.memory_space<vmem>>, vector<160x64xbf16>
    %cst_155 = arith.constant dense<0.000000e+00> : vector<16x64xf32>
    %280 = tpu.matmul %278, %279, %cst_155 {dimension_numbers = #tpu.dot_dimension_numbers<[1], [0], [0], [1], [0, 0, 1, 1], [], []>} : vector<16x160xbf16>, vector<160x64xbf16>, vector<16x64xf32> -> vector<16x64xf32>
    %c0_156 = arith.constant 0 : index
    %c0_157 = arith.constant 0 : index
    %281 = vector.load %arg39[%c0_156, %c0_157] : memref<1x64xf32, #tpu.memory_space<vmem>>, vector<1x64xf32>
    %282 = vector.broadcast %281 : vector<1x64xf32> to vector<16x64xf32>
    %283 = arith.addf %280, %282 : vector<16x64xf32>
    %284 = math.tanh %283 : vector<16x64xf32>
    %c0_158 = arith.constant 0 : index
    %c0_159 = arith.constant 0 : index
    %285 = vector.load %arg40[%c0_158, %c0_159] : memref<1x64xf32, #tpu.memory_space<vmem>>, vector<1x64xf32>
    %286 = vector.broadcast %285 : vector<1x64xf32> to vector<16x64xf32>
    %287 = arith.mulf %284, %286 : vector<16x64xf32>
    %cst_160 = arith.constant dense<0.000000e+00> : vector<16xf32>
    %288 = vector.multi_reduction <add>, %287, %cst_160 [1] : vector<16x64xf32> to vector<16xf32>
    %289 = vector.shape_cast %288 : vector<16xf32> to vector<16x1xf32>
    %c0_161 = arith.constant 0 : index
    %c0_162 = arith.constant 0 : index
    %290 = vector.load %arg41[%c0_161, %c0_162] : memref<1x1xf32, #tpu.memory_space<vmem>>, vector<1x1xf32>
    %291 = vector.broadcast %290 : vector<1x1xf32> to vector<16x1xf32>
    %292 = arith.addf %289, %291 : vector<16x1xf32>
    %cst_163 = arith.constant dense<0xFF800000> : vector<1xf32>
    %293 = vector.multi_reduction <maximumf>, %292, %cst_163 [0] : vector<16x1xf32> to vector<1xf32>
    %294 = vector.shape_cast %293 : vector<1xf32> to vector<1x1xf32>
    %295 = vector.broadcast %294 : vector<1x1xf32> to vector<16x1xf32>
    %296 = arith.subf %292, %295 : vector<16x1xf32>
    %297 = math.exp %296 : vector<16x1xf32>
    %cst_164 = arith.constant dense<0.000000e+00> : vector<1xf32>
    %298 = vector.multi_reduction <add>, %297, %cst_164 [0] : vector<16x1xf32> to vector<1xf32>
    %299 = vector.shape_cast %298 : vector<1xf32> to vector<1x1xf32>
    %300 = vector.broadcast %299 : vector<1x1xf32> to vector<16x1xf32>
    %301 = arith.divf %297, %300 : vector<16x1xf32>
    %302 = vector.broadcast %301 : vector<16x1xf32> to vector<16x160xf32>
    %303 = arith.mulf %302, %277 : vector<16x160xf32>
    %cst_165 = arith.constant dense<0.000000e+00> : vector<160xf32>
    %304 = vector.multi_reduction <add>, %303, %cst_165 [0] : vector<16x160xf32> to vector<160xf32>
    %305 = vector.shape_cast %304 : vector<160xf32> to vector<1x160xf32>
    %306 = arith.truncf %305 : vector<1x160xf32> to vector<1x160xbf16>
    %c0_166 = arith.constant 0 : index
    %c0_167 = arith.constant 0 : index
    %307 = vector.load %arg42[%c0_166, %c0_167] : memref<160x128xbf16, #tpu.memory_space<vmem>>, vector<160x128xbf16>
    %cst_168 = arith.constant dense<0.000000e+00> : vector<1x128xf32>
    %308 = tpu.matmul %306, %307, %cst_168 {dimension_numbers = #tpu.dot_dimension_numbers<[1], [0], [0], [1], [0, 0, 1, 1], [], []>} : vector<1x160xbf16>, vector<160x128xbf16>, vector<1x128xf32> -> vector<1x128xf32>
    %c0_169 = arith.constant 0 : index
    %c0_170 = arith.constant 0 : index
    %309 = vector.load %arg43[%c0_169, %c0_170] : memref<1x128xf32, #tpu.memory_space<vmem>>, vector<1x128xf32>
    %310 = arith.addf %308, %309 : vector<1x128xf32>
    %cst_171 = arith.constant 0.000000e+00 : f32
    %311 = vector.broadcast %cst_171 : f32 to vector<1x128xf32>
    %312 = arith.maximumf %310, %311 : vector<1x128xf32>
    %313 = arith.truncf %312 : vector<1x128xf32> to vector<1x128xbf16>
    %c0_172 = arith.constant 0 : index
    %c0_173 = arith.constant 0 : index
    %314 = vector.load %arg44[%c0_172, %c0_173] : memref<128x5xbf16, #tpu.memory_space<vmem>>, vector<128x5xbf16>
    %cst_174 = arith.constant dense<0.000000e+00> : vector<1x5xf32>
    %315 = tpu.matmul %313, %314, %cst_174 {dimension_numbers = #tpu.dot_dimension_numbers<[1], [0], [0], [1], [0, 0, 1, 1], [], []>} : vector<1x128xbf16>, vector<128x5xbf16>, vector<1x5xf32> -> vector<1x5xf32>
    %c0_175 = arith.constant 0 : index
    %c0_176 = arith.constant 0 : index
    %316 = vector.load %arg45[%c0_175, %c0_176] : memref<1x5xf32, #tpu.memory_space<vmem>>, vector<1x5xf32>
    %317 = arith.addf %315, %316 : vector<1x5xf32>
    %c0_177 = arith.constant 0 : index
    %c0_178 = arith.constant 0 : index
    %c0_179 = arith.constant 0 : index
    %318 = vector.load %arg46[%c0_177, %c0_178, %c0_179] : memref<1x1x5xf32, #tpu.memory_space<vmem>>, vector<1x1x5xf32>
    %319 = vector.shape_cast %318 : vector<1x1x5xf32> to vector<1x5xf32>
    %320 = vector.shape_cast %317 : vector<1x5xf32> to vector<1x1x5xf32>
    tpu.vector_store %arg46[%c0_177, %c0_178, %c0_179], %320 {strides = array<i32>} : memref<1x1x5xf32, #tpu.memory_space<vmem>>, vector<1x1x5xf32>,
    return
  }
  func.func @transform_0(%arg0: i32) -> (i32, i32, i32) {
    %c0_i32 = arith.constant 0 : i32
    %c0_i32_0 = arith.constant 0 : i32
    %c0_i32_1 = arith.constant 0 : i32
    return %arg0, %c0_i32, %c0_i32_0 : i32, i32, i32
  }
  func.func @transform_1(%arg0: i32) -> (i32, i32) {
    %c0_i32 = arith.constant 0 : i32
    %c0_i32_0 = arith.constant 0 : i32
    %c0_i32_1 = arith.constant 0 : i32
    return %c0_i32, %c0_i32_0 : i32, i32
  }
  func.func @transform_2(%arg0: i32) -> (i32, i32) {
    %c0_i32 = arith.constant 0 : i32
    %c0_i32_0 = arith.constant 0 : i32
    %c0_i32_1 = arith.constant 0 : i32
    return %c0_i32, %c0_i32_0 : i32, i32
  }
  func.func @transform_3(%arg0: i32) -> (i32, i32) {
    %c0_i32 = arith.constant 0 : i32
    %c0_i32_0 = arith.constant 0 : i32
    %c0_i32_1 = arith.constant 0 : i32
    return %c0_i32, %c0_i32_0 : i32, i32
  }
  func.func @transform_4(%arg0: i32) -> (i32, i32) {
    %c0_i32 = arith.constant 0 : i32
    %c0_i32_0 = arith.constant 0 : i32
    %c0_i32_1 = arith.constant 0 : i32
    return %c0_i32, %c0_i32_0 : i32, i32
  }
  func.func @transform_5(%arg0: i32) -> (i32, i32) {
    %c0_i32 = arith.constant 0 : i32
    %c0_i32_0 = arith.constant 0 : i32
    %c0_i32_1 = arith.constant 0 : i32
    return %c0_i32, %c0_i32_0 : i32, i32
  }
  func.func @transform_6(%arg0: i32) -> (i32, i32) {
    %c0_i32 = arith.constant 0 : i32
    %c0_i32_0 = arith.constant 0 : i32
    %c0_i32_1 = arith.constant 0 : i32
    return %c0_i32, %c0_i32_0 : i32, i32
  }
  func.func @transform_7(%arg0: i32) -> (i32, i32) {
    %c0_i32 = arith.constant 0 : i32
    %c0_i32_0 = arith.constant 0 : i32
    %c0_i32_1 = arith.constant 0 : i32
    return %c0_i32, %c0_i32_0 : i32, i32
  }
  func.func @transform_8(%arg0: i32) -> (i32, i32) {
    %c0_i32 = arith.constant 0 : i32
    %c0_i32_0 = arith.constant 0 : i32
    %c0_i32_1 = arith.constant 0 : i32
    return %c0_i32, %c0_i32_0 : i32, i32
  }
  func.func @transform_9(%arg0: i32) -> (i32, i32) {
    %c0_i32 = arith.constant 0 : i32
    %c0_i32_0 = arith.constant 0 : i32
    %c0_i32_1 = arith.constant 0 : i32
    return %c0_i32, %c0_i32_0 : i32, i32
  }
  func.func @transform_10(%arg0: i32) -> (i32, i32) {
    %c0_i32 = arith.constant 0 : i32
    %c0_i32_0 = arith.constant 0 : i32
    %c0_i32_1 = arith.constant 0 : i32
    return %c0_i32, %c0_i32_0 : i32, i32
  }
  func.func @transform_11(%arg0: i32) -> (i32, i32) {
    %c0_i32 = arith.constant 0 : i32
    %c0_i32_0 = arith.constant 0 : i32
    %c0_i32_1 = arith.constant 0 : i32
    return %c0_i32, %c0_i32_0 : i32, i32
  }
  func.func @transform_12(%arg0: i32) -> (i32, i32) {
    %c0_i32 = arith.constant 0 : i32
    %c0_i32_0 = arith.constant 0 : i32
    %c0_i32_1 = arith.constant 0 : i32
    return %c0_i32, %c0_i32_0 : i32, i32
  }
  func.func @transform_13(%arg0: i32) -> (i32, i32) {
    %c0_i32 = arith.constant 0 : i32
    %c0_i32_0 = arith.constant 0 : i32
    %c0_i32_1 = arith.constant 0 : i32
    return %c0_i32, %c0_i32_0 : i32, i32
  }
  func.func @transform_14(%arg0: i32) -> (i32, i32) {
    %c0_i32 = arith.constant 0 : i32
    %c0_i32_0 = arith.constant 0 : i32
    %c0_i32_1 = arith.constant 0 : i32
    return %c0_i32, %c0_i32_0 : i32, i32
  }
  func.func @transform_15(%arg0: i32) -> (i32, i32) {
    %c0_i32 = arith.constant 0 : i32
    %c0_i32_0 = arith.constant 0 : i32
    %c0_i32_1 = arith.constant 0 : i32
    return %c0_i32, %c0_i32_0 : i32, i32
  }
  func.func @transform_16(%arg0: i32) -> (i32, i32) {
    %c0_i32 = arith.constant 0 : i32
    %c0_i32_0 = arith.constant 0 : i32
    %c0_i32_1 = arith.constant 0 : i32
    return %c0_i32, %c0_i32_0 : i32, i32
  }
  func.func @transform_17(%arg0: i32) -> (i32, i32) {
    %c0_i32 = arith.constant 0 : i32
    %c0_i32_0 = arith.constant 0 : i32
    %c0_i32_1 = arith.constant 0 : i32
    return %c0_i32, %c0_i32_0 : i32, i32
  }
  func.func @transform_18(%arg0: i32) -> (i32, i32) {
    %c0_i32 = arith.constant 0 : i32
    %c0_i32_0 = arith.constant 0 : i32
    %c0_i32_1 = arith.constant 0 : i32
    return %c0_i32, %c0_i32_0 : i32, i32
  }
  func.func @transform_19(%arg0: i32) -> (i32, i32) {
    %c0_i32 = arith.constant 0 : i32
    %c0_i32_0 = arith.constant 0 : i32
    %c0_i32_1 = arith.constant 0 : i32
    return %c0_i32, %c0_i32_0 : i32, i32
  }
  func.func @transform_20(%arg0: i32) -> (i32, i32) {
    %c0_i32 = arith.constant 0 : i32
    %c0_i32_0 = arith.constant 0 : i32
    %c0_i32_1 = arith.constant 0 : i32
    return %c0_i32, %c0_i32_0 : i32, i32
  }
  func.func @transform_21(%arg0: i32) -> (i32, i32) {
    %c0_i32 = arith.constant 0 : i32
    %c0_i32_0 = arith.constant 0 : i32
    %c0_i32_1 = arith.constant 0 : i32
    return %c0_i32, %c0_i32_0 : i32, i32
  }
  func.func @transform_22(%arg0: i32) -> (i32, i32) {
    %c0_i32 = arith.constant 0 : i32
    %c0_i32_0 = arith.constant 0 : i32
    %c0_i32_1 = arith.constant 0 : i32
    return %c0_i32, %c0_i32_0 : i32, i32
  }
  func.func @transform_23(%arg0: i32) -> (i32, i32) {
    %c0_i32 = arith.constant 0 : i32
    %c0_i32_0 = arith.constant 0 : i32
    %c0_i32_1 = arith.constant 0 : i32
    return %c0_i32, %c0_i32_0 : i32, i32
  }
  func.func @transform_24(%arg0: i32) -> (i32, i32) {
    %c0_i32 = arith.constant 0 : i32
    %c0_i32_0 = arith.constant 0 : i32
    %c0_i32_1 = arith.constant 0 : i32
    return %c0_i32, %c0_i32_0 : i32, i32
  }
  func.func @transform_25(%arg0: i32) -> (i32, i32) {
    %c0_i32 = arith.constant 0 : i32
    %c0_i32_0 = arith.constant 0 : i32
    %c0_i32_1 = arith.constant 0 : i32
    return %c0_i32, %c0_i32_0 : i32, i32
  }
  func.func @transform_26(%arg0: i32) -> (i32, i32) {
    %c0_i32 = arith.constant 0 : i32
    %c0_i32_0 = arith.constant 0 : i32
    %c0_i32_1 = arith.constant 0 : i32
    return %c0_i32, %c0_i32_0 : i32, i32
  }
  func.func @transform_27(%arg0: i32) -> (i32, i32) {
    %c0_i32 = arith.constant 0 : i32
    %c0_i32_0 = arith.constant 0 : i32
    %c0_i32_1 = arith.constant 0 : i32
    return %c0_i32, %c0_i32_0 : i32, i32
  }
  func.func @transform_28(%arg0: i32) -> (i32, i32) {
    %c0_i32 = arith.constant 0 : i32
    %c0_i32_0 = arith.constant 0 : i32
    %c0_i32_1 = arith.constant 0 : i32
    return %c0_i32, %c0_i32_0 : i32, i32
  }
  func.func @transform_29(%arg0: i32) -> (i32, i32) {
    %c0_i32 = arith.constant 0 : i32
    %c0_i32_0 = arith.constant 0 : i32
    %c0_i32_1 = arith.constant 0 : i32
    return %c0_i32, %c0_i32_0 : i32, i32
  }
  func.func @transform_30(%arg0: i32) -> (i32, i32) {
    %c0_i32 = arith.constant 0 : i32
    %c0_i32_0 = arith.constant 0 : i32
    %c0_i32_1 = arith.constant 0 : i32
    return %c0_i32, %c0_i32_0 : i32, i32
  }
  func.func @transform_31(%arg0: i32) -> (i32, i32) {
    %c0_i32 = arith.constant 0 : i32
    %c0_i32_0 = arith.constant 0 : i32
    %c0_i32_1 = arith.constant 0 : i32
    return %c0_i32, %c0_i32_0 : i32, i32
  }
  func.func @transform_32(%arg0: i32) -> (i32, i32) {
    %c0_i32 = arith.constant 0 : i32
    %c0_i32_0 = arith.constant 0 : i32
    %c0_i32_1 = arith.constant 0 : i32
    return %c0_i32, %c0_i32_0 : i32, i32
  }
  func.func @transform_33(%arg0: i32) -> (i32, i32) {
    %c0_i32 = arith.constant 0 : i32
    %c0_i32_0 = arith.constant 0 : i32
    %c0_i32_1 = arith.constant 0 : i32
    return %c0_i32, %c0_i32_0 : i32, i32
  }
  func.func @transform_34(%arg0: i32) -> (i32, i32) {
    %c0_i32 = arith.constant 0 : i32
    %c0_i32_0 = arith.constant 0 : i32
    %c0_i32_1 = arith.constant 0 : i32
    return %c0_i32, %c0_i32_0 : i32, i32
  }
  func.func @transform_35(%arg0: i32) -> (i32, i32) {
    %c0_i32 = arith.constant 0 : i32
    %c0_i32_0 = arith.constant 0 : i32
    %c0_i32_1 = arith.constant 0 : i32
    return %c0_i32, %c0_i32_0 : i32, i32
  }
  func.func @transform_36(%arg0: i32) -> (i32, i32) {
    %c0_i32 = arith.constant 0 : i32
    %c0_i32_0 = arith.constant 0 : i32
    %c0_i32_1 = arith.constant 0 : i32
    return %c0_i32, %c0_i32_0 : i32, i32
  }
  func.func @transform_37(%arg0: i32) -> (i32, i32) {
    %c0_i32 = arith.constant 0 : i32
    %c0_i32_0 = arith.constant 0 : i32
    %c0_i32_1 = arith.constant 0 : i32
    return %c0_i32, %c0_i32_0 : i32, i32
  }
  func.func @transform_38(%arg0: i32) -> (i32, i32) {
    %c0_i32 = arith.constant 0 : i32
    %c0_i32_0 = arith.constant 0 : i32
    %c0_i32_1 = arith.constant 0 : i32
    return %c0_i32, %c0_i32_0 : i32, i32
  }
  func.func @transform_39(%arg0: i32) -> (i32, i32) {
    %c0_i32 = arith.constant 0 : i32
    %c0_i32_0 = arith.constant 0 : i32
    %c0_i32_1 = arith.constant 0 : i32
    return %c0_i32, %c0_i32_0 : i32, i32
  }
  func.func @transform_40(%arg0: i32) -> (i32, i32) {
    %c0_i32 = arith.constant 0 : i32
    %c0_i32_0 = arith.constant 0 : i32
    %c0_i32_1 = arith.constant 0 : i32
    return %c0_i32, %c0_i32_0 : i32, i32
  }
  func.func @transform_41(%arg0: i32) -> (i32, i32) {
    %c0_i32 = arith.constant 0 : i32
    %c0_i32_0 = arith.constant 0 : i32
    %c0_i32_1 = arith.constant 0 : i32
    return %c0_i32, %c0_i32_0 : i32, i32
  }
  func.func @transform_42(%arg0: i32) -> (i32, i32) {
    %c0_i32 = arith.constant 0 : i32
    %c0_i32_0 = arith.constant 0 : i32
    %c0_i32_1 = arith.constant 0 : i32
    return %c0_i32, %c0_i32_0 : i32, i32
  }
  func.func @transform_43(%arg0: i32) -> (i32, i32) {
    %c0_i32 = arith.constant 0 : i32
    %c0_i32_0 = arith.constant 0 : i32
    %c0_i32_1 = arith.constant 0 : i32
    return %c0_i32, %c0_i32_0 : i32, i32
  }
  func.func @transform_44(%arg0: i32) -> (i32, i32) {
    %c0_i32 = arith.constant 0 : i32
    %c0_i32_0 = arith.constant 0 : i32
    %c0_i32_1 = arith.constant 0 : i32
    return %c0_i32, %c0_i32_0 : i32, i32
  }
  func.func @transform_45(%arg0: i32) -> (i32, i32, i32) {
    %c0_i32 = arith.constant 0 : i32
    %c0_i32_0 = arith.constant 0 : i32
    %c0_i32_1 = arith.constant 0 : i32
    return %arg0, %c0_i32, %c0_i32_0 : i32, i32, i32
  }
}

</mosaic_0001>

<bundles_post_ra>
// kernel: forward.1
= control target key start
LH: loop header
LB: loop body
LE: loop exit
PB: predicated region body
PF: predicated region fallthrough
CT: control target
= control target key end

     0   :  { %s6730_s6 = smov 1   ;;  %s6731_s10 = smov 2   ;;  %s7868_s0 = inlined_call_operand.smem [shape: u32[46], index: -1, kind: input, shape index: {}] }
   0x1   :  { %s6815_s5 = sld [smem:[%s7868_s0]]   ;;  %s6732_s14 = smov 3  }
   0x2   :  { %s6820_s9 = sld [smem:[%s7868_s0 + %s6730_s6]]   ;;  %s6733_s18 = smov 4  }
   0x3   :  { %s6825_s13 = sld [smem:[%s7868_s0 + %s6731_s10]]   ;;  %s6734_s22 = smov 5  }
   0x4   :  { %s6830_s17 = sld [smem:[%s7868_s0 + %s6732_s14]]   ;;  %s6735_s26 = smov 6  }
   0x5   :  { %s6835_s21 = sld [smem:[%s7868_s0 + %s6733_s18]]   ;;  %s6736_s30 = smov 7  }
   0x6   :  { %s6840_s25 = sld [smem:[%s7868_s0 + %s6734_s22]]   ;;  %s6737_s4 = smov 8  }
   0x7   :  { %7916 = sst [smem:[#allocation61_spill]] %s6815_s5  ;;  %s6738_s10 = smov 9  }
   0x8   :  { %7917 = sst [smem:[#allocation62_spill]] %s6820_s9  ;;  %s6739_s15 = smov 10  }
   0x9   :  { %7918 = sst [smem:[#allocation63_spill]] %s6825_s13  ;;  %s6740_s20 = smov 11  }
   0xa   :  { %7919 = sst [smem:[#allocation64_spill]] %s6830_s17  ;;  %s6742_s1 = smov 13  }
   0xb   :  { %7920 = sst [smem:[#allocation65_spill]] %s6835_s21  ;;  %s6743_s7 = smov 14  }
   0xc   :  { %s6845_s29 = sld [smem:[%s7868_s0 + %s6735_s26]]   ;;  %s6741_s26 = smov 12  }
   0xd   :  { %s6850_s3 = sld [smem:[%s7868_s0 + %s6736_s30]]   ;;  %s6745_s22 = smov 16  }
   0xe   :  { %s6855_s8 = sld [smem:[%s7868_s0 + %s6737_s4]]   ;;  %s6746_s28 = smov 17  }
   0xf   :  { %s6860_s14 = sld [smem:[%s7868_s0 + %s6738_s10]]   ;;  %s6771_s10 = smov 42  }
  0x10   :  { %s6865_s19 = sld [smem:[%s7868_s0 + %s6739_s15]]   ;;  %s6744_s15 = smov 15  }
  0x11   :  { %s6870_s24 = sld [smem:[%s7868_s0 + %s6740_s20]]   ;;  %s6772_s16 = smov 43  }
  0x12   :  { %7921 = sst [smem:[#allocation66_spill]] %s6845_s29  ;;  %s6773_s23 = smov 44  }
  0x13   :  { %7922 = sst [smem:[#allocation67_spill]] %s6850_s3 }
  0x14   :  { %7923 = sst [smem:[#allocation68_spill]] %s6855_s8 }
  0x15   :  { %s6875_s30 = sld [smem:[%s7868_s0 + %s6741_s26]]  }
  0x16   :  { %7924 = sst [smem:[#allocation69_spill]] %s6865_s19 }
  0x17   :  { %s6880_s6 = sld [smem:[%s7868_s0 + %s6742_s1]]   ;;  %s6770_s1 = smov 41  }
  0x18   :  { %s6885_s12 = sld [smem:[%s7868_s0 + %s6743_s7]]   ;;  %s6747_s7 = smov 18  }
  0x19   :  { %s6890_s20 = sld [smem:[%s7868_s0 + %s6744_s15]]   ;;  %s6748_s15 = smov 19  }
  0x1a   :  { %s6895_s27 = sld [smem:[%s7868_s0 + %s6745_s22]]   ;;  %s6749_s22 = smov 20  }
  0x1b   :  { %7925 = sst [smem:[#allocation70_spill]] %s6875_s30 }
  0x1c   :  { %s6900_s4 = sld [smem:[%s7868_s0 + %s6746_s28]]   ;;  %s6750_s28 = smov 21  }
  0x1d   :  { %7926 = sst [smem:[#allocation71_spill]] %s6880_s6 }
  0x1e   :  { %7927 = sst [smem:[#allocation72_spill]] %s6885_s12 }
  0x1f   :  { %s6905_s21 = sld [smem:[%s7868_s0 + %s6747_s7]]   ;;  %s6751_s7 = smov 22  }
  0x20   :  { %7928 = sst [smem:[#allocation73_spill]] %s6895_s27 }
  0x21   :  { %s6910_s5 = sld [smem:[%s7868_s0 + %s6748_s15]]   ;;  %s6752_s15 = smov 23  }
  0x22   :  { %7929 = sst [smem:[#allocation74_spill]] %s6900_s4 }
  0x23   :  { %s6915_s27 = sld [smem:[%s7868_s0 + %s6749_s22]]   ;;  %s6753_s22 = smov 24  }
  0x24   :  { %s6920_s12 = sld [smem:[%s7868_s0 + %s6750_s28]]   ;;  %s6754_s28 = smov 25  }
  0x25   :  { %7930 = sst [smem:[#allocation75_spill]] %s6905_s21 }
  0x26   :  { %s6925_s21 = sld [smem:[%s7868_s0 + %s6751_s7]]   ;;  %s6755_s7 = smov 26  }
  0x27   :  { %7931 = sst [smem:[#allocation76_spill]] %s6910_s5 }
  0x28   :  { %s6930_s30 = sld [smem:[%s7868_s0 + %s6752_s15]]   ;;  %s6756_s15 = smov 27  }
  0x29   :  { %7932 = sst [smem:[#allocation77_spill]] %s6915_s27 }
  0x2a   :  { %7933 = sst [smem:[#allocation78_spill]] %s6920_s12 }
  0x2b   :  { %s6935_s27 = sld [smem:[%s7868_s0 + %s6753_s22]]   ;;  %s6757_s22 = smov 28  }
  0x2c   :  { %7934 = sst [smem:[#allocation79_spill]] %s6925_s21 }
  0x2d   :  { %s6940_s19 = sld [smem:[%s7868_s0 + %s6754_s28]]   ;;  %s6758_s28 = smov 29  }
  0x2e   :  { %s6945_s21 = sld [smem:[%s7868_s0 + %s6755_s7]]   ;;  %s6759_s7 = smov 30  }
  0x2f   :  { %s6950_s8 = sld [smem:[%s7868_s0 + %s6756_s15]]   ;;  %s6760_s15 = smov 31  }
  0x30   :  { %s6970_s29 = sld [smem:[%s7868_s0 + %s6760_s15]]   ;;  %s6764_s15 = smov 35  }
  0x31   :  { %7935 = sst [smem:[#allocation80_spill]] %s6935_s27 }
  0x32   :  { %s6955_s27 = sld [smem:[%s7868_s0 + %s6757_s22]]   ;;  %s6761_s22 = smov 32  }
  0x33   :  { %7936 = sst [smem:[#allocation81_spill]] %s6940_s19 }
  0x34   :  { %7937 = sst [smem:[#allocation82_spill]] %s6945_s21 }
  0x35   :  { %7938 = sst [smem:[#allocation83_spill]] %s6950_s8 }
  0x36   :  { %s6960_s19 = sld [smem:[%s7868_s0 + %s6758_s28]]   ;;  %s6762_s28 = smov 33  }
  0x37   :  { %s6965_s21 = sld [smem:[%s7868_s0 + %s6759_s7]]   ;;  %s6763_s7 = smov 34  }
  0x38   :  { %7939 = sst [smem:[#allocation84_spill]] %s6955_s27 }
  0x39   :  { %7942 = sst [smem:[#allocation87_spill]] %s6970_s29 }
  0x3a   :  { %s6975_s27 = sld [smem:[%s7868_s0 + %s6761_s22]]   ;;  %s6765_s22 = smov 36  }
  0x3b   :  { %s6990_s29 = sld [smem:[%s7868_s0 + %s6764_s15]]   ;;  %s6768_s15 = smov 39  }
  0x3c   :  { %7940 = sst [smem:[#allocation85_spill]] %s6960_s19 }
  0x3d   :  { %7941 = sst [smem:[#allocation86_spill]] %s6965_s21 }
  0x3e   :  { %s6980_s19 = sld [smem:[%s7868_s0 + %s6762_s28]]   ;;  %s6766_s28 = smov 37  }
  0x3f   :  { %s6985_s21 = sld [smem:[%s7868_s0 + %s6763_s7]]   ;;  %s6767_s7 = smov 38  }
  0x40   :  { %7943 = sst [smem:[#allocation88_spill]] %s6975_s27 }
  0x41   :  { %7946 = sst [smem:[#allocation91_spill]] %s6990_s29 }
  0x42   :  { %s6995_s27 = sld [smem:[%s7868_s0 + %s6765_s22]]   ;;  %s6769_s22 = smov 40  }
  0x43   :  { %s7010_s29 = sld [smem:[%s7868_s0 + %s6768_s15]]  }
  0x44   :  { %7944 = sst [smem:[#allocation89_spill]] %s6980_s19 }
  0x45   :  { %7945 = sst [smem:[#allocation90_spill]] %s6985_s21 }
  0x46   :  { %s7000_s19 = sld [smem:[%s7868_s0 + %s6766_s28]]  }
  0x47   :  { %s7005_s21 = sld [smem:[%s7868_s0 + %s6767_s7]]  }
  0x48   :  { %7947 = sst [smem:[#allocation92_spill]] %s6995_s27 }
  0x49   :  { %7950 = sst [smem:[#allocation95_spill]] %s7010_s29 }
  0x4a   :  { %s4496_s27 = sld [smem:[%s7868_s0 + %s6769_s22]]  }
  0x4b   :  { %s7028_s29 = sld [smem:[%s7868_s0 + %s6772_s16]]  }
  0x4c   :  { %7948 = sst [smem:[#allocation93_spill]] %s7000_s19 }
  0x4d   :  { %7949 = sst [smem:[#allocation94_spill]] %s7005_s21 }
  0x4e   :  { %s7018_s19 = sld [smem:[%s7868_s0 + %s6770_s1]]   ;;  %s6774_s1 = smov 45  }
  0x4f   :  { %s7023_s21 = sld [smem:[%s7868_s0 + %s6771_s10]]  }
  0x50   :  { %s7033_s17 = sld [smem:[%s7868_s0 + %s6773_s23]]   ;;  %v96_v0 = vstv %s4496_s27 }
  0x51   :  { %97 = vst [vmem:[#allocation2] sm:$0x1] %v96_v0 }
  0x54   :  { %7951 = sst [smem:[#allocation96_spill]] %s7018_s19 }
  0x55   :  { %s7038_s19 = sld [smem:[%s7868_s0 + %s6774_s1]]  }
  0x56   :  { %98 = vsyncpa [#allocation4], 0 }
  0x57   :  { %99 = vsyncpa [#allocation7], 0 }
  0x58   :  { %100 = vsyncpa [#allocation10], 0 }
  0x59   :  { %101 = vsyncpa [#allocation13], 0 }
  0x5a   :  { %102 = vsyncpa [#allocation16], 0 }
  0x5b   :  { %103 = vsyncpa [#allocation19], 0 }
  0x5c   :  { %104 = vsyncpa [#allocation22], 0 }
  0x5d   :  { %105 = vsyncpa [#allocation25], 0 }
  0x5e   :  { %106 = vsyncpa [#allocation28], 0 }
  0x5f   :  { %107 = vsyncpa [#allocation31], 0 }
  0x60   :  { %108 = vsyncpa [#allocation34], 0 }
  0x61   :  { %109 = vsyncpa [#allocation37], 0 }
  0x62   :  { %110 = vsyncpa [#allocation40], 0 }
  0x63   :  { %111 = vsyncpa [#allocation43], 0 }
  0x64   :  { %112 = vsyncpa [#allocation5], 0 }
  0x65   :  { %114 = vsyncpa [#allocation5 + $0x1], 0  ;;  %s7040_s0 = smov 0   ;;  %s7042_s27 = smov 0  }
  0x66   :  { %s7044_s10 = smov 0   ;;  %s7046_s7 = smov 0  }
  0x67 LB: > { %s7952_s12 = sld [smem:[#allocation78_spill]]  ;;  %s7061_s11 = sadd.s32 4294967295, %s6728_s7   ;;  %s6728_s7 = sphi %s7046_s7, %s8004_s7   ;;  %s6724_s10 = sphi %s7044_s10, %s8006_s10   ;;  %s6720_s27 = sphi %s7042_s27, %s8008_s27   ;;  %s6716_s0 = sphi %s7040_s0, %s8007_s0  }
  0x68   : > { %s7953_s9 = sld [smem:[#allocation62_spill]]  ;;  %s4503_s16 = sadd.s32 4294967294, %s6728_s7  }
  0x69   : > { %s7954_s8 = sld [smem:[#allocation83_spill]]  ;;  %s7065_s15 = sadd.s32 1, %s6728_s7  }
  0x6a   : > { %s7955_s6 = sld [smem:[#allocation71_spill]]  ;;  %s1077_s18 = sadd.s32 1, %s6724_s10 }
  0x6b   : > { %s7956_s5 = sld [smem:[#allocation76_spill]]  ;;  %s1074_s23 = ssub.s32 %s6728_s7, %s7065_s15 }
  0x6c   : > { %s7957_s4 = sld [smem:[#allocation74_spill]]  ;;  %p1087_p0 = scmp.ne.s32.totalorder %s6724_s10, %s6720_s27 }
  0x6d   : > { %s7958_s3 = sld [smem:[#allocation67_spill]]  ;;  %p1075_p1 = scmp.eq.s32.totalorder %s1074_s23, 0 }
  0x6e   : > { %s7959_s13 = sld [smem:[#allocation63_spill]]  ;;  %p1088_p2 = scmp.eq.s32.totalorder %s7061_s11, 1 }
  0x6f   : > { %7960 = sst [smem:[#allocation97_spill]] %s6716_s0  ;;  %p1093_p3 = scmp.ne.s32.totalorder %s6720_s27, %s6716_s0 }
  0x70   : > { %7961 = sst [smem:[#allocation98_spill]] %s6724_s10  ;;  %p1094_p4 = scmp.eq.s32.totalorder %s4503_s16, 1 }
  0x71   : > { %7962 = sst [smem:[#allocation99_spill]] %s6728_s7  ;;  %p7078_p5 = por %p1088_p2, %p1087_p0 }
  0x72   : > { %7963 = sst [smem:[#allocation100_spill]] %s7065_s15  ;;  %p7082_p6 = por %p1094_p4, %p1093_p3 }
  0x73   : > { %s7076_s22 = scalar_select %p1075_p1, %s6724_s10, %s1077_s18  }
  0x74   : > { %s7966_s1 = scalar_select %p7082_p6, 1, 0 }
  0x75   : > { %7964 = sst [smem:[#allocation101_spill]] %s7076_s22  ;;  %p4504_p7 = scmp.ge.s32.totalorder %s6728_s7, 1 }
  0x76   : > { %7967 = sst [smem:[#allocation102_spill]] %s7966_s1  ;;  %p1101_p8 = scmp.lt.s32.totalorder %s6728_s7, 3 }
  0x78   : > { %p7088_p9 = pnand %p4504_p7, %p1101_p8 }
  0x79   : > { %p5666_p10 = scmp.eq.s32.totalorder (!%p7088_p9), %s7061_s11, 0  ;;  %s1126_s2 = sshll.u32 (!%p7088_p9), %s7959_s13, 4  ;;  %s1127_s2 = int_to_ptr.hbm [resolvable:$true] %s1126_s2 }
  0x7a   : > { %1105 = sbr.rel (%p7088_p9) target bundleno = 474 (0x1da), region = 12  ;;  %s6775_s16 = smov (!%p7088_p9), [#allocation6]  }
  0x7b   : > { %s1128_s18 = sshll.u32 (!%p7088_p9), %s6775_s16, 4  ;;  %s1157_s23 = sshll.u32 (!%p7088_p9), %s6840_s25, 4  ;;  %s1129_s18 = int_to_ptr.vmem [resolvable:$true] %s1128_s18  ;;  %s7097_s23 = int_to_ptr.hbm [resolvable:$true] %s1157_s23 }
  0x7c   : > { %s5854_s22 = sshra.s32 (!%p7088_p9), %s1127_s2, 4  ;;  %s5860_s15 = scalar_lea.hbm (!%p7088_p9), %s7959_s13, 8  ;;  %s5855_s22 = int_to_ptr.hbm [resolvable:$true] %s5854_s22 }
  0x7d   : > { %s5856_s10 = scalar_lea.hbm (!%p7088_p9), %s5855_s22, 8  ;;  %p5861_p0 = scmp.lt.s32.totalorder (!%p7088_p9), %s5855_s22, %s7959_s13 }
  0x7e   : > { %p5857_p11 = scmp.ne.s32.totalorder (!%p7088_p9), %s5855_s22, %s5856_s10  ;;  %p5862_p1 = scmp.lt.s32.totalorder (!%p7088_p9), %s5860_s15, %s5856_s10 }
  0x80   : > { %p5858_p12 = pnand %p5857_p11, %p5666_p10  ;;  %p5863_p2 = por %p5862_p1, %p5861_p0 }
  0x82   : > { %p5859_p13 = pneg %p5858_p12 }
  0x84   : > { %p5864_p3 = pnand %p5863_p2, %p5859_p13 }
  0x86   : > { %5867 = shalt.err (!%p5864_p3)
}
  0x87   : > { %s7895_s1 = smov 64   ;;  %s7901_s16 = smov 4  }
  0x88   : > { %5555 = dma.hbm_to_vmem [thread:$0]  (%p5666_p10), %s1127_s2, 128, %s1129_s18, [#allocation7], %s7895_s1, %s7895_s1, %s7901_s16  }
  0x89   : > { %s1185_s0 = sshll.u32 %s7958_s3, 4  ;;  %s6778_s7 = smov [#allocation9]   ;;  %s7109_s0 = int_to_ptr.hbm [resolvable:$true] %s1185_s0 }
  0x8a   : > { %s1159_s22 = sshll.u32 %s6778_s7, 4  ;;  %s5882_s10 = sshra.s32 %s7097_s23, 4  ;;  %s1160_s22 = int_to_ptr.vmem [resolvable:$true] %s1159_s22  ;;  %s5883_s10 = int_to_ptr.hbm [resolvable:$true] %s5882_s10 }
  0x8b   : > { %s5884_s15 = scalar_lea.hbm %s5883_s10, 32  ;;  %s5888_s13 = scalar_lea.hbm %s6840_s25, 32 }
  0x8c   : > { %p5885_p4 = scmp.ne.s32.totalorder %s5883_s10, %s5884_s15  ;;  %p5889_p11 = scmp.lt.s32.totalorder %s5883_s10, %s6840_s25 }
  0x8d   : > { %p5890_p12 = scmp.lt.s32.totalorder %s5888_s13, %s5884_s15 }
  0x8e   : > { %p5886_p7 = pnand %p5885_p4, %p5666_p10 }
  0x8f   : > { %p5891_p13 = por %p5890_p12, %p5889_p11 }
  0x90   : > { %p5887_p8 = pneg %p5886_p7 }
  0x92   : > { %p5892_p0 = pnand %p5891_p13, %p5887_p8 }
  0x94   : > { %5895 = shalt.err (!%p5892_p0)
}
  0x95   : > { %5559 = dma.hbm_to_vmem [thread:$0]  (%p5666_p10), %s7097_s23, 512, %s1160_s22, [#allocation10], %s7895_s1, %s7895_s1, %s7901_s16  }
  0x96   : > { %s6779_s7 = smov [#allocation12]   ;;  %s1211_s18 = sshll.u32 %s6860_s14, 4  ;;  %s7123_s18 = int_to_ptr.hbm [resolvable:$true] %s1211_s18 }
  0x97   : > { %s1187_s2 = sshll.u32 %s6779_s7, 4  ;;  %s5910_s13 = sshra.s32 %s7109_s0, 4  ;;  %s1188_s2 = int_to_ptr.vmem [resolvable:$true] %s1187_s2  ;;  %s5911_s13 = int_to_ptr.hbm [resolvable:$true] %s5910_s13 }
  0x98   : > { %s5912_s10 = scalar_lea.hbm %s5911_s13, 32  ;;  %s5916_s15 = scalar_lea.hbm %s7958_s3, 32 }
  0x99   : > { %p5913_p1 = scmp.ne.s32.totalorder %s5911_s13, %s5912_s10  ;;  %p5917_p4 = scmp.lt.s32.totalorder %s5911_s13, %s7958_s3 }
  0x9a   : > { %p5918_p7 = scmp.lt.s32.totalorder %s5916_s15, %s5912_s10 }
  0x9b   : > { %p5914_p2 = pnand %p5913_p1, %p5666_p10 }
  0x9c   : > { %p5919_p8 = por %p5918_p7, %p5917_p4 }
  0x9d   : > { %p5915_p3 = pneg %p5914_p2 }
  0x9f   : > { %p5920_p11 = pnand %p5919_p8, %p5915_p3 }
  0xa1   : > { %5923 = shalt.err (!%p5920_p11)
}
  0xa2   : > { %5563 = dma.hbm_to_vmem [thread:$0]  (%p5666_p10), %s7109_s0, 512, %s1188_s2, [#allocation13], %s7895_s1, %s7895_s1, %s7901_s16  }
  0xa3   : > { %s1237_s23 = sshll.u32 %s6870_s24, 4  ;;  %s6780_s22 = smov [#allocation15]   ;;  %s7137_s23 = int_to_ptr.hbm [resolvable:$true] %s1237_s23 }
  0xa4   : > { %s1213_s7 = sshll.u32 %s6780_s22, 4  ;;  %s5938_s13 = sshra.s32 %s7123_s18, 4  ;;  %s1214_s7 = int_to_ptr.vmem [resolvable:$true] %s1213_s7  ;;  %s5939_s13 = int_to_ptr.hbm [resolvable:$true] %s5938_s13 }
  0xa5   : > { %s5940_s10 = scalar_lea.hbm %s5939_s13, 8  ;;  %s5944_s15 = scalar_lea.hbm %s6860_s14, 8 }
  0xa6   : > { %p5941_p12 = scmp.ne.s32.totalorder %s5939_s13, %s5940_s10  ;;  %p5945_p1 = scmp.lt.s32.totalorder %s5939_s13, %s6860_s14 }
  0xa7   : > { %p5946_p2 = scmp.lt.s32.totalorder %s5944_s15, %s5940_s10 }
  0xa8   : > { %p5942_p13 = pnand %p5941_p12, %p5666_p10 }
  0xa9   : > { %p5947_p3 = por %p5946_p2, %p5945_p1 }
  0xaa   : > { %p5943_p0 = pneg %p5942_p13 }
  0xac   : > { %p5948_p4 = pnand %p5947_p3, %p5943_p0 }
  0xae   : > { %5951 = shalt.err (!%p5948_p4)
}
  0xaf   : > { %5567 = dma.hbm_to_vmem [thread:$0]  (%p5666_p10), %s7123_s18, 128, %s1214_s7, [#allocation16], %s7895_s1, %s7895_s1, %s7901_s16  }
  0xb0   : > { %s6781_s0 = smov [#allocation18]   ;;  %s1265_s22 = sshll.u32 %s7955_s6, 4  ;;  %s7151_s22 = int_to_ptr.hbm [resolvable:$true] %s1265_s22 }
  0xb1   : > { %s1239_s2 = sshll.u32 %s6781_s0, 4  ;;  %s5966_s13 = sshra.s32 %s7137_s23, 4  ;;  %s1240_s2 = int_to_ptr.vmem [resolvable:$true] %s1239_s2  ;;  %s5967_s13 = int_to_ptr.hbm [resolvable:$true] %s5966_s13 }
  0xb2   : > { %s5968_s10 = scalar_lea.hbm %s5967_s13, 32  ;;  %s5972_s15 = scalar_lea.hbm %s6870_s24, 32 }
  0xb3   : > { %p5969_p7 = scmp.ne.s32.totalorder %s5967_s13, %s5968_s10  ;;  %p5973_p12 = scmp.lt.s32.totalorder %s5967_s13, %s6870_s24 }
  0xb4   : > { %p5974_p13 = scmp.lt.s32.totalorder %s5972_s15, %s5968_s10 }
  0xb5   : > { %p5970_p8 = pnand %p5969_p7, %p5666_p10 }
  0xb6   : > { %p5975_p0 = por %p5974_p13, %p5973_p12 }
  0xb7   : > { %p5971_p11 = pneg %p5970_p8 }
  0xb9   : > { %p5976_p1 = pnand %p5975_p0, %p5971_p11 }
  0xbb   : > { %5979 = shalt.err (!%p5976_p1)
}
  0xbc   : > { %5571 = dma.hbm_to_vmem [thread:$0]  (%p5666_p10), %s7137_s23, 512, %s1240_s2, [#allocation19], %s7895_s1, %s7895_s1, %s7901_s16  }
  0xbd   : > { %s1291_s18 = sshll.u32 %s6890_s20, 4  ;;  %s6782_s7 = smov [#allocation21]   ;;  %s7165_s18 = int_to_ptr.hbm [resolvable:$true] %s1291_s18 }
  0xbe   : > { %s1267_s0 = sshll.u32 %s6782_s7, 4  ;;  %s5994_s13 = sshra.s32 %s7151_s22, 4  ;;  %s1268_s0 = int_to_ptr.vmem [resolvable:$true] %s1267_s0  ;;  %s5995_s13 = int_to_ptr.hbm [resolvable:$true] %s5994_s13 }
  0xbf   : > { %s5996_s10 = scalar_lea.hbm %s5995_s13, 32  ;;  %s6000_s15 = scalar_lea.hbm %s7955_s6, 32 }
  0xc0   : > { %p5997_p2 = scmp.ne.s32.totalorder %s5995_s13, %s5996_s10  ;;  %p6001_p7 = scmp.lt.s32.totalorder %s5995_s13, %s7955_s6 }
  0xc1   : > { %p6002_p8 = scmp.lt.s32.totalorder %s6000_s15, %s5996_s10 }
  0xc2   : > { %p5998_p3 = pnand %p5997_p2, %p5666_p10 }
  0xc3   : > { %p6003_p11 = por %p6002_p8, %p6001_p7 }
  0xc4   : > { %p5999_p4 = pneg %p5998_p3 }
  0xc6   : > { %p6004_p12 = pnand %p6003_p11, %p5999_p4 }
  0xc8   : > { %6007 = shalt.err (!%p6004_p12)
}
  0xc9   : > { %5575 = dma.hbm_to_vmem [thread:$0]  (%p5666_p10), %s7151_s22, 512, %s1268_s0, [#allocation22], %s7895_s1, %s7895_s1, %s7901_s16  }
  0xca   : > { %s6783_s23 = smov [#allocation24]   ;;  %s1319_s7 = sshll.u32 %s7957_s4, 4  ;;  %s7179_s7 = int_to_ptr.hbm [resolvable:$true] %s1319_s7 }
  0xcb   : > { %s1293_s2 = sshll.u32 %s6783_s23, 4  ;;  %s6022_s13 = sshra.s32 %s7165_s18, 4  ;;  %s1294_s2 = int_to_ptr.vmem [resolvable:$true] %s1293_s2  ;;  %s6023_s13 = int_to_ptr.hbm [resolvable:$true] %s6022_s13 }
  0xcc   : > { %s6024_s10 = scalar_lea.hbm %s6023_s13, 48  ;;  %s6028_s15 = scalar_lea.hbm %s6890_s20, 48 }
  0xcd   : > { %p6025_p13 = scmp.ne.s32.totalorder %s6023_s13, %s6024_s10  ;;  %p6029_p2 = scmp.lt.s32.totalorder %s6023_s13, %s6890_s20 }
  0xce   : > { %p6030_p3 = scmp.lt.s32.totalorder %s6028_s15, %s6024_s10 }
  0xcf   : > { %p6026_p0 = pnand %p6025_p13, %p5666_p10 }
  0xd0   : > { %p6031_p4 = por %p6030_p3, %p6029_p2 }
  0xd1   : > { %p6027_p1 = pneg %p6026_p0 }
  0xd3   : > { %p6032_p7 = pnand %p6031_p4, %p6027_p1 }
  0xd5   : > { %6035 = shalt.err (!%p6032_p7)
}
  0xd6   : > { %5579 = dma.hbm_to_vmem [thread:$0]  (%p5666_p10), %s7165_s18, 768, %s1294_s2, [#allocation25], %s7895_s1, %s7895_s1, %s7901_s16  }
  0xd7   : > { %s1345_s22 = sshll.u32 %s7956_s5, 4  ;;  %s6784_s0 = smov [#allocation27]   ;;  %s7193_s22 = int_to_ptr.hbm [resolvable:$true] %s1345_s22 }
  0xd8   : > { %s1321_s23 = sshll.u32 %s6784_s0, 4  ;;  %s6050_s13 = sshra.s32 %s7179_s7, 4  ;;  %s1322_s23 = int_to_ptr.vmem [resolvable:$true] %s1321_s23  ;;  %s6051_s13 = int_to_ptr.hbm [resolvable:$true] %s6050_s13 }
  0xd9   : > { %s6052_s10 = scalar_lea.hbm %s6051_s13, 48  ;;  %s6056_s15 = scalar_lea.hbm %s7957_s4, 48 }
  0xda   : > { %p6053_p8 = scmp.ne.s32.totalorder %s6051_s13, %s6052_s10  ;;  %p6057_p13 = scmp.lt.s32.totalorder %s6051_s13, %s7957_s4 }
  0xdb   : > { %p6058_p0 = scmp.lt.s32.totalorder %s6056_s15, %s6052_s10 }
  0xdc   : > { %p6054_p11 = pnand %p6053_p8, %p5666_p10 }
  0xdd   : > { %p6059_p1 = por %p6058_p0, %p6057_p13 }
  0xde   : > { %p6055_p12 = pneg %p6054_p11 }
  0xe0   : > { %p6060_p2 = pnand %p6059_p1, %p6055_p12 }
  0xe2   : > { %6063 = shalt.err (!%p6060_p2)
}
  0xe3   : > { %5583 = dma.hbm_to_vmem [thread:$0]  (%p5666_p10), %s7179_s7, 768, %s1322_s23, [#allocation28], %s7895_s1, %s7895_s1, %s7901_s16  }
  0xe4   : > { %s6785_s18 = smov [#allocation30]   ;;  %s1371_s0 = sshll.u32 %s7952_s12, 4  ;;  %s7207_s0 = int_to_ptr.hbm [resolvable:$true] %s1371_s0 }
  0xe5   : > { %s1347_s2 = sshll.u32 %s6785_s18, 4  ;;  %s6078_s13 = sshra.s32 %s7193_s22, 4  ;;  %s1348_s2 = int_to_ptr.vmem [resolvable:$true] %s1347_s2  ;;  %s6079_s13 = int_to_ptr.hbm [resolvable:$true] %s6078_s13 }
  0xe6   : > { %s6080_s10 = scalar_lea.hbm %s6079_s13, 32  ;;  %s6084_s15 = scalar_lea.hbm %s7956_s5, 32 }
  0xe7   : > { %p6081_p3 = scmp.ne.s32.totalorder %s6079_s13, %s6080_s10  ;;  %p6085_p8 = scmp.lt.s32.totalorder %s6079_s13, %s7956_s5 }
  0xe8   : > { %p6086_p11 = scmp.lt.s32.totalorder %s6084_s15, %s6080_s10 }
  0xe9   : > { %p6082_p4 = pnand %p6081_p3, %p5666_p10 }
  0xea   : > { %p6087_p12 = por %p6086_p11, %p6085_p8 }
  0xeb   : > { %p6083_p7 = pneg %p6082_p4 }
  0xed   : > { %p6088_p13 = pnand %p6087_p12, %p6083_p7 }
  0xef   : > { %6091 = shalt.err (!%p6088_p13)
}
  0xf0   : > { %5587 = dma.hbm_to_vmem [thread:$0]  (%p5666_p10), %s7193_s22, 512, %s1348_s2, [#allocation31], %s7895_s1, %s7895_s1, %s7901_s16  }
  0xf1   : > { %s1399_s7 = sshll.u32 %s6930_s30, 4  ;;  %s6786_s23 = smov [#allocation33]   ;;  %s7221_s7 = int_to_ptr.hbm [resolvable:$true] %s1399_s7 }
  0xf2   : > { %s1373_s18 = sshll.u32 %s6786_s23, 4  ;;  %s6106_s13 = sshra.s32 %s7207_s0, 4  ;;  %s1374_s18 = int_to_ptr.vmem [resolvable:$true] %s1373_s18  ;;  %s6107_s13 = int_to_ptr.hbm [resolvable:$true] %s6106_s13 }
  0xf3   : > { %s6108_s10 = scalar_lea.hbm %s6107_s13, 48  ;;  %s6112_s15 = scalar_lea.hbm %s7952_s12, 48 }
  0xf4   : > { %p6109_p0 = scmp.ne.s32.totalorder %s6107_s13, %s6108_s10  ;;  %p6113_p3 = scmp.lt.s32.totalorder %s6107_s13, %s7952_s12 }
  0xf5   : > { %p6114_p4 = scmp.lt.s32.totalorder %s6112_s15, %s6108_s10 }
  0xf6   : > { %p6110_p1 = pnand %p6109_p0, %p5666_p10 }
  0xf7   : > { %p6115_p7 = por %p6114_p4, %p6113_p3 }
  0xf8   : > { %p6111_p2 = pneg %p6110_p1 }
  0xfa   : > { %p6116_p8 = pnand %p6115_p7, %p6111_p2 }
  0xfc   : > { %6119 = shalt.err (!%p6116_p8)
}
  0xfd   : > { %5591 = dma.hbm_to_vmem [thread:$0]  (%p5666_p10), %s7207_s0, 768, %s1374_s18, [#allocation34], %s7895_s1, %s7895_s1, %s7901_s16  }
  0xfe   : > { %s6787_s22 = smov [#allocation36]   ;;  %s1433_s23 = sshll.u32 %s7954_s8, 4  ;;  %s7235_s23 = int_to_ptr.hbm [resolvable:$true] %s1433_s23 }
  0xff   : > { %s1401_s2 = sshll.u32 %s6787_s22, 4  ;;  %s6134_s13 = sshra.s32 %s7221_s7, 4  ;;  %s1402_s2 = int_to_ptr.vmem [resolvable:$true] %s1401_s2  ;;  %s6135_s13 = int_to_ptr.hbm [resolvable:$true] %s6134_s13 }
 0x100   : > { %s6136_s10 = scalar_lea.hbm %s6135_s13, 48  ;;  %s6140_s15 = scalar_lea.hbm %s6930_s30, 48 }
 0x101   : > { %p6137_p11 = scmp.ne.s32.totalorder %s6135_s13, %s6136_s10  ;;  %p6141_p0 = scmp.lt.s32.totalorder %s6135_s13, %s6930_s30 }
 0x102   : > { %p6142_p1 = scmp.lt.s32.totalorder %s6140_s15, %s6136_s10 }
 0x103   : > { %p6138_p12 = pnand %p6137_p11, %p5666_p10 }
 0x104   : > { %p6143_p2 = por %p6142_p1, %p6141_p0 }
 0x105   : > { %p6139_p13 = pneg %p6138_p12 }
 0x107   : > { %p6144_p3 = pnand %p6143_p2, %p6139_p13 }
 0x109   : > { %6147 = shalt.err (!%p6144_p3)
}
 0x10a   : > { %5595 = dma.hbm_to_vmem [thread:$0]  (%p5666_p10), %s7221_s7, 768, %s1402_s2, [#allocation37], %s7895_s1, %s7895_s1, %s7901_s16  }
 0x10b   : > { %s1499_s0 = sshll.u32 %s7023_s21, 4  ;;  %s6788_s18 = smov [#allocation39]   ;;  %s7249_s0 = int_to_ptr.hbm [resolvable:$true] %s1499_s0 }
 0x10c   : > { %s1435_s22 = sshll.u32 %s6788_s18, 4  ;;  %s6162_s13 = sshra.s32 %s7235_s23, 4  ;;  %s1436_s22 = int_to_ptr.vmem [resolvable:$true] %s1435_s22  ;;  %s6163_s13 = int_to_ptr.hbm [resolvable:$true] %s6162_s13 }
 0x10d   : > { %s6164_s10 = scalar_lea.hbm %s6163_s13, 64  ;;  %s6168_s15 = scalar_lea.hbm %s7954_s8, 64 }
 0x10e   : > { %p6165_p4 = scmp.ne.s32.totalorder %s6163_s13, %s6164_s10  ;;  %p6169_p11 = scmp.lt.s32.totalorder %s6163_s13, %s7954_s8 }
 0x10f   : > { %p6170_p12 = scmp.lt.s32.totalorder %s6168_s15, %s6164_s10 }
 0x110   : > { %p6166_p7 = pnand %p6165_p4, %p5666_p10 }
 0x111   : > { %p6171_p13 = por %p6170_p12, %p6169_p11 }
 0x112   : > { %p6167_p8 = pneg %p6166_p7 }
 0x114   : > { %p6172_p0 = pnand %p6171_p13, %p6167_p8 }
 0x116   : > { %6175 = shalt.err (!%p6172_p0)
}
 0x117   : > { %5599 = dma.hbm_to_vmem [thread:$0]  (%p5666_p10), %s7235_s23, 1024, %s1436_s22, [#allocation40], %s7895_s1, %s7895_s1, %s7901_s16  }
 0x118   : > { %s6789_s7 = smov [#allocation42]   ;;  %s1112_s18 = sshll.u32 %s7953_s9, 4  ;;  %s1113_s18 = int_to_ptr.hbm [resolvable:$true] %s1112_s18 }
 0x119   : > { %s1501_s2 = sshll.u32 %s6789_s7, 4  ;;  %s6190_s13 = sshra.s32 %s7249_s0, 4  ;;  %s1502_s2 = int_to_ptr.vmem [resolvable:$true] %s1501_s2  ;;  %s6191_s13 = int_to_ptr.hbm [resolvable:$true] %s6190_s13 }
 0x11a   : > { %s6192_s10 = scalar_lea.hbm %s6191_s13, 1  ;;  %s6196_s15 = scalar_lea.hbm %s7023_s21, 1 }
 0x11b   : > { %p6193_p1 = scmp.ne.s32.totalorder %s6191_s13, %s6192_s10  ;;  %p6197_p4 = scmp.lt.s32.totalorder %s6191_s13, %s7023_s21 }
 0x11c   : > { %p6198_p7 = scmp.lt.s32.totalorder %s6196_s15, %s6192_s10 }
 0x11d   : > { %p6194_p2 = pnand %p6193_p1, %p5666_p10 }
 0x11e   : > { %p6199_p8 = por %p6198_p7, %p6197_p4 }
 0x11f   : > { %p6195_p3 = pneg %p6194_p2 }
 0x121   : > { %p6200_p11 = pnand %p6199_p8, %p6195_p3 }
 0x123   : > { %6203 = shalt.err (!%p6200_p11)
}
 0x124   : > { %s7969_s23 = sld [smem:[#allocation64_spill]]  ;;  %s6790_s22 = smov [#allocation3]  }
 0x125   : > { %5603 = dma.hbm_to_vmem [thread:$0]  (%p5666_p10), %s7249_s0, 16, %s1502_s2, [#allocation43]  }
 0x126   : > { %s1114_s7 = sshll.u32 %s6790_s22, 4  ;;  %s6218_s13 = sshra.s32 %s1113_s18, 4  ;;  %s1115_s7 = int_to_ptr.vmem [resolvable:$true] %s1114_s7  ;;  %s6219_s13 = int_to_ptr.hbm [resolvable:$true] %s6218_s13 }
 0x127   : > { %s6220_s10 = scalar_lea.hbm %s6219_s13, 8  ;;  %s6224_s15 = scalar_lea.hbm %s7953_s9, 8 }
 0x128   : > { %p6221_p12 = scmp.ne.s32.totalorder %s6219_s13, %s6220_s10  ;;  %p6225_p1 = scmp.lt.s32.totalorder %s6219_s13, %s7953_s9 }
 0x129   : > { %p6226_p2 = scmp.lt.s32.totalorder %s6224_s15, %s6220_s10 }
 0x12a   : > { %s1140_s1 = sshll.u32 %s7969_s23, 4  ;;  %p6222_p13 = pnand %p6221_p12, %p5666_p10  ;;  %s7272_s1 = int_to_ptr.hbm [resolvable:$true] %s1140_s1 }
 0x12b   : > { %p6227_p3 = por %p6226_p2, %p6225_p1 }
 0x12c   : > { %p6223_p0 = pneg %p6222_p13 }
 0x12e   : > { %p6228_p4 = pnand %p6227_p3, %p6223_p0 }
 0x130   : > { %6231 = shalt.err (!%p6228_p4)
}
 0x131   : > { %s7970_s0 = smov 64   ;;  %s7971_s2 = sld [smem:[#allocation66_spill]] }
 0x132   : > { %5553 = dma.hbm_to_vmem [thread:$0]  (%p5666_p10), %s1113_s18, 128, %s1115_s7, [#allocation4], %s7970_s0, %s7970_s0, %s7901_s16  }
 0x133   : > { %s6791_s3 = smov [#allocation8]   ;;  %s6246_s13 = sshra.s32 %s7272_s1, 4  ;;  %s6247_s13 = int_to_ptr.hbm [resolvable:$true] %s6246_s13 }
 0x134   : > { %s1142_s4 = sshll.u32 %s6791_s3, 4  ;;  %s6248_s10 = scalar_lea.hbm %s6247_s13, 8  ;;  %s1143_s4 = int_to_ptr.vmem [resolvable:$true] %s1142_s4 }
 0x135   : > { %p6249_p7 = scmp.ne.s32.totalorder %s6247_s13, %s6248_s10  ;;  %s6252_s15 = scalar_lea.hbm %s7969_s23, 8 }
 0x136   : > { %p6253_p12 = scmp.lt.s32.totalorder %s6247_s13, %s7969_s23  ;;  %p6254_p13 = scmp.lt.s32.totalorder %s6252_s15, %s6248_s10 }
 0x137   : > { %s1171_s22 = sshll.u32 %s7971_s2, 4  ;;  %p6250_p8 = pnand %p6249_p7, %p5666_p10  ;;  %s7284_s22 = int_to_ptr.hbm [resolvable:$true] %s1171_s22 }
 0x138   : > { %p6255_p0 = por %p6254_p13, %p6253_p12 }
 0x139   : > { %p6251_p11 = pneg %p6250_p8 }
 0x13b   : > { %p6256_p1 = pnand %p6255_p0, %p6251_p11 }
 0x13d   : > { %6259 = shalt.err (!%p6256_p1)
}
 0x13e   : > { %s7972_s3 = sld [smem:[#allocation68_spill]]  ;;  %s6792_s18 = smov [#allocation11]  }
 0x13f   : > { %5557 = dma.hbm_to_vmem [thread:$0]  (%p5666_p10), %s7272_s1, 128, %s1143_s4, [#allocation7], %s7970_s0, %s7970_s0, %s7901_s16  }
 0x140   : > { %s1173_s7 = sshll.u32 %s6792_s18, 4  ;;  %s6274_s13 = sshra.s32 %s7284_s22, 4  ;;  %s1174_s7 = int_to_ptr.vmem [resolvable:$true] %s1173_s7  ;;  %s6275_s13 = int_to_ptr.hbm [resolvable:$true] %s6274_s13 }
 0x141   : > { %s6276_s10 = scalar_lea.hbm %s6275_s13, 32  ;;  %s6280_s15 = scalar_lea.hbm %s7971_s2, 32 }
 0x142   : > { %p6277_p2 = scmp.ne.s32.totalorder %s6275_s13, %s6276_s10  ;;  %p6281_p7 = scmp.lt.s32.totalorder %s6275_s13, %s7971_s2 }
 0x143   : > { %p6282_p8 = scmp.lt.s32.totalorder %s6280_s15, %s6276_s10 }
 0x144   : > { %s1200_s5 = sshll.u32 %s7972_s3, 4  ;;  %p6278_p3 = pnand %p6277_p2, %p5666_p10  ;;  %s7298_s5 = int_to_ptr.hbm [resolvable:$true] %s1200_s5 }
 0x145   : > { %p6283_p11 = por %p6282_p8, %p6281_p7 }
 0x146   : > { %p6279_p4 = pneg %p6278_p3 }
 0x148   : > { %p6284_p12 = pnand %p6283_p11, %p6279_p4 }
 0x14a   : > { %6287 = shalt.err (!%p6284_p12)
}
 0x14b   : > { %s7973_s4 = sld [smem:[#allocation69_spill]]  ;;  %s6793_s18 = smov [#allocation14]  }
 0x14c   : > { %5561 = dma.hbm_to_vmem [thread:$0]  (%p5666_p10), %s7284_s22, 512, %s1174_s7, [#allocation10], %s7970_s0, %s7970_s0, %s7901_s16  }
 0x14d   : > { %s1202_s6 = sshll.u32 %s6793_s18, 4  ;;  %s6302_s13 = sshra.s32 %s7298_s5, 4  ;;  %s1203_s6 = int_to_ptr.vmem [resolvable:$true] %s1202_s6  ;;  %s6303_s13 = int_to_ptr.hbm [resolvable:$true] %s6302_s13 }
 0x14e   : > { %s6304_s10 = scalar_lea.hbm %s6303_s13, 1  ;;  %s6308_s15 = scalar_lea.hbm %s7972_s3, 1 }
 0x14f   : > { %p6305_p13 = scmp.ne.s32.totalorder %s6303_s13, %s6304_s10  ;;  %p6309_p2 = scmp.lt.s32.totalorder %s6303_s13, %s7972_s3 }
 0x150   : > { %p6310_p3 = scmp.lt.s32.totalorder %s6308_s15, %s6304_s10 }
 0x151   : > { %s1226_s1 = sshll.u32 %s7973_s4, 4  ;;  %p6306_p0 = pnand %p6305_p13, %p5666_p10  ;;  %s7312_s1 = int_to_ptr.hbm [resolvable:$true] %s1226_s1 }
 0x152   : > { %p6311_p4 = por %p6310_p3, %p6309_p2 }
 0x153   : > { %p6307_p1 = pneg %p6306_p0 }
 0x155   : > { %p6312_p7 = pnand %p6311_p4, %p6307_p1 }
 0x157   : > { %6315 = shalt.err (!%p6312_p7)
}
 0x158   : > { %s7974_s22 = sld [smem:[#allocation70_spill]]  ;;  %s6794_s7 = smov [#allocation17]  }
 0x159   : > { %5565 = dma.hbm_to_vmem [thread:$0]  (%p5666_p10), %s7298_s5, 16, %s1203_s6, [#allocation13]  }
 0x15a   : > { %s1228_s18 = sshll.u32 %s6794_s7, 4  ;;  %s6330_s13 = sshra.s32 %s7312_s1, 4  ;;  %s1229_s18 = int_to_ptr.vmem [resolvable:$true] %s1228_s18  ;;  %s6331_s13 = int_to_ptr.hbm [resolvable:$true] %s6330_s13 }
 0x15b   : > { %s6332_s10 = scalar_lea.hbm %s6331_s13, 1  ;;  %s6336_s15 = scalar_lea.hbm %s7973_s4, 1 }
 0x15c   : > { %p6333_p8 = scmp.ne.s32.totalorder %s6331_s13, %s6332_s10  ;;  %p6337_p13 = scmp.lt.s32.totalorder %s6331_s13, %s7973_s4 }
 0x15d   : > { %p6338_p0 = scmp.lt.s32.totalorder %s6336_s15, %s6332_s10 }
 0x15e   : > { %s1251_s16 = sshll.u32 %s7974_s22, 4  ;;  %p6334_p11 = pnand %p6333_p8, %p5666_p10  ;;  %s7323_s16 = int_to_ptr.hbm [resolvable:$true] %s1251_s16 }
 0x15f   : > { %p6339_p1 = por %p6338_p0, %p6337_p13 }
 0x160   : > { %p6335_p12 = pneg %p6334_p11 }
 0x162   : > { %p6340_p2 = pnand %p6339_p1, %p6335_p12 }
 0x164   : > { %6343 = shalt.err (!%p6340_p2)
}
 0x165   : > { %s7975_s5 = sld [smem:[#allocation72_spill]]  ;;  %s6795_s7 = smov [#allocation20]  }
 0x166   : > { %5569 = dma.hbm_to_vmem [thread:$0]  (%p5666_p10), %s7312_s1, 16, %s1229_s18, [#allocation16]  }
 0x167   : > { %s1253_s2 = sshll.u32 %s6795_s7, 4  ;;  %s6358_s13 = sshra.s32 %s7323_s16, 4  ;;  %s1254_s2 = int_to_ptr.vmem [resolvable:$true] %s1253_s2  ;;  %s6359_s13 = int_to_ptr.hbm [resolvable:$true] %s6358_s13 }
 0x168   : > { %s6360_s10 = scalar_lea.hbm %s6359_s13, 32  ;;  %s6364_s15 = scalar_lea.hbm %s7974_s22, 32 }
 0x169   : > { %p6361_p3 = scmp.ne.s32.totalorder %s6359_s13, %s6360_s10  ;;  %p6365_p8 = scmp.lt.s32.totalorder %s6359_s13, %s7974_s22 }
 0x16a   : > { %p6366_p11 = scmp.lt.s32.totalorder %s6364_s15, %s6360_s10 }
 0x16b   : > { %s1280_s6 = sshll.u32 %s7975_s5, 4  ;;  %p6362_p4 = pnand %p6361_p3, %p5666_p10  ;;  %s7334_s6 = int_to_ptr.hbm [resolvable:$true] %s1280_s6 }
 0x16c   : > { %p6367_p12 = por %p6366_p11, %p6365_p8 }
 0x16d   : > { %p6363_p7 = pneg %p6362_p4 }
 0x16f   : > { %p6368_p13 = pnand %p6367_p12, %p6363_p7 }
 0x171   : > { %6371 = shalt.err (!%p6368_p13)
}
 0x172   : > { %s7976_s1 = smov 4   ;;  %s7977_s18 = sld [smem:[#allocation73_spill]] }
 0x173   : > { %5573 = dma.hbm_to_vmem [thread:$0]  (%p5666_p10), %s7323_s16, 512, %s1254_s2, [#allocation19], %s7970_s0, %s7970_s0, %s7976_s1  }
 0x174   : > { %s6796_s7 = smov [#allocation23]   ;;  %s6386_s13 = sshra.s32 %s7334_s6, 4  ;;  %s6387_s13 = int_to_ptr.hbm [resolvable:$true] %s6386_s13 }
 0x175   : > { %s1282_s3 = sshll.u32 %s6796_s7, 4  ;;  %s6388_s10 = scalar_lea.hbm %s6387_s13, 1  ;;  %s1283_s3 = int_to_ptr.vmem [resolvable:$true] %s1282_s3 }
 0x176   : > { %p6389_p0 = scmp.ne.s32.totalorder %s6387_s13, %s6388_s10  ;;  %s6392_s15 = scalar_lea.hbm %s7975_s5, 1 }
 0x177   : > { %p6393_p3 = scmp.lt.s32.totalorder %s6387_s13, %s7975_s5  ;;  %p6394_p4 = scmp.lt.s32.totalorder %s6392_s15, %s6388_s10 }
 0x178   : > { %s1305_s4 = sshll.u32 %s7977_s18, 4  ;;  %p6390_p1 = pnand %p6389_p0, %p5666_p10  ;;  %s7348_s4 = int_to_ptr.hbm [resolvable:$true] %s1305_s4 }
 0x179   : > { %p6395_p7 = por %p6394_p4, %p6393_p3 }
 0x17a   : > { %p6391_p2 = pneg %p6390_p1 }
 0x17c   : > { %p6396_p8 = pnand %p6395_p7, %p6391_p2 }
 0x17e   : > { %6399 = shalt.err (!%p6396_p8)
}
 0x17f   : > { %s7978_s16 = sld [smem:[#allocation75_spill]]  ;;  %s6797_s7 = smov [#allocation26]  }
 0x180   : > { %5577 = dma.hbm_to_vmem [thread:$0]  (%p5666_p10), %s7334_s6, 16, %s1283_s3, [#allocation22]  }
 0x181   : > { %s1307_s8 = sshll.u32 %s6797_s7, 4  ;;  %s6414_s13 = sshra.s32 %s7348_s4, 4  ;;  %s1308_s8 = int_to_ptr.vmem [resolvable:$true] %s1307_s8  ;;  %s6415_s13 = int_to_ptr.hbm [resolvable:$true] %s6414_s13 }
 0x182   : > { %s6416_s10 = scalar_lea.hbm %s6415_s13, 48  ;;  %s6420_s15 = scalar_lea.hbm %s7977_s18, 48 }
 0x183   : > { %p6417_p11 = scmp.ne.s32.totalorder %s6415_s13, %s6416_s10  ;;  %p6421_p0 = scmp.lt.s32.totalorder %s6415_s13, %s7977_s18 }
 0x184   : > { %p6422_p1 = scmp.lt.s32.totalorder %s6420_s15, %s6416_s10 }
 0x185   : > { %s1334_s2 = sshll.u32 %s7978_s16, 4  ;;  %p6418_p12 = pnand %p6417_p11, %p5666_p10  ;;  %s7359_s2 = int_to_ptr.hbm [resolvable:$true] %s1334_s2 }
 0x186   : > { %p6423_p2 = por %p6422_p1, %p6421_p0 }
 0x187   : > { %p6419_p13 = pneg %p6418_p12 }
 0x189   : > { %p6424_p3 = pnand %p6423_p2, %p6419_p13 }
 0x18b   : > { %6427 = shalt.err (!%p6424_p3)
}
 0x18c   : > { %s7979_s3 = sld [smem:[#allocation77_spill]]  ;;  %s6798_s6 = smov [#allocation29]  }
 0x18d   : > { %5581 = dma.hbm_to_vmem [thread:$0]  (%p5666_p10), %s7348_s4, 768, %s1308_s8, [#allocation25], %s7970_s0, %s7970_s0, %s7976_s1  }
 0x18e   : > { %s1336_s7 = sshll.u32 %s6798_s6, 4  ;;  %s6442_s13 = sshra.s32 %s7359_s2, 4  ;;  %s1337_s7 = int_to_ptr.vmem [resolvable:$true] %s1336_s7  ;;  %s6443_s13 = int_to_ptr.hbm [resolvable:$true] %s6442_s13 }
 0x18f   : > { %s6444_s10 = scalar_lea.hbm %s6443_s13, 1  ;;  %s6448_s15 = scalar_lea.hbm %s7978_s16, 1 }
 0x190   : > { %p6445_p4 = scmp.ne.s32.totalorder %s6443_s13, %s6444_s10  ;;  %p6449_p11 = scmp.lt.s32.totalorder %s6443_s13, %s7978_s16 }
 0x191   : > { %p6450_p12 = scmp.lt.s32.totalorder %s6448_s15, %s6444_s10 }
 0x192   : > { %s1360_s5 = sshll.u32 %s7979_s3, 4  ;;  %p6446_p7 = pnand %p6445_p4, %p5666_p10  ;;  %s7373_s5 = int_to_ptr.hbm [resolvable:$true] %s1360_s5 }
 0x193   : > { %p6451_p13 = por %p6450_p12, %p6449_p11 }
 0x194   : > { %p6447_p8 = pneg %p6446_p7 }
 0x196   : > { %p6452_p0 = pnand %p6451_p13, %p6447_p8 }
 0x198   : > { %6455 = shalt.err (!%p6452_p0)
}
 0x199   : > { %s7980_s8 = sld [smem:[#allocation79_spill]]  ;;  %s6799_s6 = smov [#allocation32]  }
 0x19a   : > { %5585 = dma.hbm_to_vmem [thread:$0]  (%p5666_p10), %s7359_s2, 16, %s1337_s7, [#allocation28]  }
 0x19b   : > { %s1362_s9 = sshll.u32 %s6799_s6, 4  ;;  %s6470_s13 = sshra.s32 %s7373_s5, 4  ;;  %s1363_s9 = int_to_ptr.vmem [resolvable:$true] %s1362_s9  ;;  %s6471_s13 = int_to_ptr.hbm [resolvable:$true] %s6470_s13 }
 0x19c   : > { %s6472_s10 = scalar_lea.hbm %s6471_s13, 1  ;;  %s6476_s15 = scalar_lea.hbm %s7979_s3, 1 }
 0x19d   : > { %p6473_p1 = scmp.ne.s32.totalorder %s6471_s13, %s6472_s10  ;;  %p6477_p4 = scmp.lt.s32.totalorder %s6471_s13, %s7979_s3 }
 0x19e   : > { %p6478_p7 = scmp.lt.s32.totalorder %s6476_s15, %s6472_s10 }
 0x19f   : > { %s1385_s4 = sshll.u32 %s7980_s8, 4  ;;  %p6474_p2 = pnand %p6473_p1, %p5666_p10  ;;  %s7384_s4 = int_to_ptr.hbm [resolvable:$true] %s1385_s4 }
 0x1a0   : > { %p6479_p8 = por %p6478_p7, %p6477_p4 }
 0x1a1   : > { %p6475_p3 = pneg %p6474_p2 }
 0x1a3   : > { %p6480_p11 = pnand %p6479_p8, %p6475_p3 }
 0x1a5   : > { %6483 = shalt.err (!%p6480_p11)
}
 0x1a6   : > { %s7981_s2 = sld [smem:[#allocation82_spill]]  ;;  %s6800_s7 = smov [#allocation35]  }
 0x1a7   : > { %5589 = dma.hbm_to_vmem [thread:$0]  (%p5666_p10), %s7373_s5, 16, %s1363_s9, [#allocation31]  }
 0x1a8   : > { %s1387_s6 = sshll.u32 %s6800_s7, 4  ;;  %s6498_s13 = sshra.s32 %s7384_s4, 4  ;;  %s1388_s6 = int_to_ptr.vmem [resolvable:$true] %s1387_s6  ;;  %s6499_s13 = int_to_ptr.hbm [resolvable:$true] %s6498_s13 }
 0x1a9   : > { %s6500_s10 = scalar_lea.hbm %s6499_s13, 48  ;;  %s6504_s15 = scalar_lea.hbm %s7980_s8, 48 }
 0x1aa   : > { %p6501_p12 = scmp.ne.s32.totalorder %s6499_s13, %s6500_s10  ;;  %p6505_p1 = scmp.lt.s32.totalorder %s6499_s13, %s7980_s8 }
 0x1ab   : > { %p6506_p2 = scmp.lt.s32.totalorder %s6504_s15, %s6500_s10 }
 0x1ac   : > { %s1419_s12 = sshll.u32 %s7981_s2, 4  ;;  %p6502_p13 = pnand %p6501_p12, %p5666_p10  ;;  %s7395_s12 = int_to_ptr.hbm [resolvable:$true] %s1419_s12 }
 0x1ad   : > { %p6507_p3 = por %p6506_p2, %p6505_p1 }
 0x1ae   : > { %p6503_p0 = pneg %p6502_p13 }
 0x1b0   : > { %p6508_p4 = pnand %p6507_p3, %p6503_p0 }
 0x1b2   : > { %6511 = shalt.err (!%p6508_p4)
}
 0x1b3   : > { %s7982_s9 = sld [smem:[#allocation94_spill]]  ;;  %s6801_s7 = smov [#allocation38]  }
 0x1b4   : > { %5593 = dma.hbm_to_vmem [thread:$0]  (%p5666_p10), %s7384_s4, 768, %s1388_s6, [#allocation34], %s7970_s0, %s7970_s0, %s7976_s1  }
 0x1b5   : > { %s1421_s3 = sshll.u32 %s6801_s7, 4  ;;  %s6526_s13 = sshra.s32 %s7395_s12, 4  ;;  %s1422_s3 = int_to_ptr.vmem [resolvable:$true] %s1421_s3  ;;  %s6527_s13 = int_to_ptr.hbm [resolvable:$true] %s6526_s13 }
 0x1b6   : > { %s6528_s10 = scalar_lea.hbm %s6527_s13, 64  ;;  %s6532_s15 = scalar_lea.hbm %s7981_s2, 64 }
 0x1b7   : > { %p6529_p7 = scmp.ne.s32.totalorder %s6527_s13, %s6528_s10  ;;  %p6533_p12 = scmp.lt.s32.totalorder %s6527_s13, %s7981_s2 }
 0x1b8   : > { %p6534_p13 = scmp.lt.s32.totalorder %s6532_s15, %s6528_s10 }
 0x1b9   : > { %s1478_s5 = sshll.u32 %s7982_s9, 4  ;;  %p6530_p8 = pnand %p6529_p7, %p5666_p10  ;;  %s7409_s5 = int_to_ptr.hbm [resolvable:$true] %s1478_s5 }
 0x1ba   : > { %p6535_p0 = por %p6534_p13, %p6533_p12 }
 0x1bb   : > { %p6531_p11 = pneg %p6530_p8 }
 0x1bd   : > { %p6536_p1 = pnand %p6535_p0, %p6531_p11 }
 0x1bf   : > { %6539 = shalt.err (!%p6536_p1)
}
 0x1c0   : > { %5597 = dma.hbm_to_vmem [thread:$0]  (%p5666_p10), %s7395_s12, 1024, %s1422_s3, [#allocation37], %s7970_s0, %s7970_s0, %s7976_s1  }
 0x1c1   : > { %s6802_s4 = smov [#allocation41]   ;;  %s1514_s7 = sshll.u32 %s7033_s17, 4  ;;  %s1515_s7 = int_to_ptr.hbm [resolvable:$true] %s1514_s7 }
 0x1c2   : > { %s1480_s6 = sshll.u32 %s6802_s4, 4  ;;  %s6554_s13 = sshra.s32 %s7409_s5, 4  ;;  %s1481_s6 = int_to_ptr.vmem [resolvable:$true] %s1480_s6  ;;  %s6555_s13 = int_to_ptr.hbm [resolvable:$true] %s6554_s13 }
 0x1c3   : > { %s6556_s10 = scalar_lea.hbm %s6555_s13, 1  ;;  %s6560_s15 = scalar_lea.hbm %s7982_s9, 1 }
 0x1c4   : > { %p6557_p2 = scmp.ne.s32.totalorder %s6555_s13, %s6556_s10  ;;  %p6561_p7 = scmp.lt.s32.totalorder %s6555_s13, %s7982_s9 }
 0x1c5   : > { %p6562_p8 = scmp.lt.s32.totalorder %s6560_s15, %s6556_s10 }
 0x1c6   : > { %p6558_p3 = pnand %p6557_p2, %p5666_p10 }
 0x1c7   : > { %p6563_p11 = por %p6562_p8, %p6561_p7 }
 0x1c8   : > { %p6559_p4 = pneg %p6558_p3 }
 0x1ca   : > { %p6564_p12 = pnand %p6563_p11, %p6559_p4 }
 0x1cc   : > { %6567 = shalt.err (!%p6564_p12)
}
 0x1cd   : > { %5601 = dma.hbm_to_vmem [thread:$0]  (%p5666_p10), %s7409_s5, 16, %s1481_s6, [#allocation40]  }
 0x1ce   : > { %s6803_s12 = smov [#allocation44]   ;;  %s6582_s1 = sshra.s32 %s1515_s7, 4  ;;  %s6583_s1 = int_to_ptr.hbm [resolvable:$true] %s6582_s1 }
 0x1cf   : > { %s1516_s0 = sshll.u32 %s6803_s12, 4  ;;  %s6584_s3 = scalar_lea.hbm %s6583_s1, 1  ;;  %s1517_s0 = int_to_ptr.vmem [resolvable:$true] %s1516_s0 }
 0x1d0   : > { %p6585_p13 = scmp.ne.s32.totalorder %s6583_s1, %s6584_s3  ;;  %s6588_s4 = scalar_lea.hbm %s7033_s17, 1 }
 0x1d1   : > { %p6589_p2 = scmp.lt.s32.totalorder %s6583_s1, %s7033_s17  ;;  %p6590_p3 = scmp.lt.s32.totalorder %s6588_s4, %s6584_s3 }
 0x1d2   : > { %p6586_p0 = pnand %p6585_p13, %p5666_p10 }
 0x1d3   : > { %p6591_p4 = por %p6590_p3, %p6589_p2 }
 0x1d4   : > { %p6587_p1 = pneg %p6586_p0 }
 0x1d6   : > { %p6592_p7 = pnand %p6591_p4, %p6587_p1 }
 0x1d8   : > { %6595 = shalt.err (!%p6592_p7)
}
 0x1d9   : > { %5605 = dma.hbm_to_vmem [thread:$0]  (%p5666_p10), %s1515_s7, 16, %s1517_s0, [#allocation43]  }
 0x1da PF: > { %1537 = sbr.rel (%p7088_p9) target bundleno = 2518 (0x9d6), region = 200  ;;  %p5693_p8 = scmp.eq.s32.totalorder (!%p7088_p9), %s7061_s11, 0 }
 0x1df   : > { %6655 = dma.done.wait (%p5693_p8), [#allocation4], 128  }
 0x1e0   : > { %6657 = vsyncadd (%p5693_p8), [#allocation4], 4294967168 }
 0x1e1   : > { %6659 = dma.done.wait (%p5693_p8), [#allocation7], 256  }
 0x1e2   : > { %6661 = vsyncadd (%p5693_p8), [#allocation7], 4294967040 }
 0x1e3   : > { %6663 = dma.done.wait (%p5693_p8), [#allocation10], 1024  }
 0x1e4   : > { %6665 = vsyncadd (%p5693_p8), [#allocation10], 4294966272 }
 0x1e5   : > { %6667 = dma.done.wait (%p5693_p8), [#allocation13], 528  }
 0x1e6   : > { %6669 = vsyncadd (%p5693_p8), [#allocation13], 4294966768 }
 0x1e7   : > { %6671 = dma.done.wait (%p5693_p8), [#allocation16], 144  }
 0x1e8   : > { %6673 = vsyncadd (%p5693_p8), [#allocation16], 4294967152 }
 0x1e9   : > { %6675 = dma.done.wait (%p5693_p8), [#allocation19], 1024  }
 0x1ea   : > { %6677 = vsyncadd (%p5693_p8), [#allocation19], 4294966272 }
 0x1eb   : > { %6679 = dma.done.wait (%p5693_p8), [#allocation22], 528  }
 0x1ec   : > { %6681 = vsyncadd (%p5693_p8), [#allocation22], 4294966768 }
 0x1ed   : > { %6683 = dma.done.wait (%p5693_p8), [#allocation25], 1536  }
 0x1ee   : > { %6685 = vsyncadd (%p5693_p8), [#allocation25], 4294965760 }
 0x1ef   : > { %6687 = dma.done.wait (%p5693_p8), [#allocation28], 784  }
 0x1f0   : > { %6689 = vsyncadd (%p5693_p8), [#allocation28], 4294966512 }
 0x1f1   : > { %6691 = dma.done.wait (%p5693_p8), [#allocation31], 528  }
 0x1f2   : > { %6693 = vsyncadd (%p5693_p8), [#allocation31], 4294966768 }
 0x1f3   : > { %6695 = dma.done.wait (%p5693_p8), [#allocation34], 1536  }
 0x1f4   : > { %6697 = vsyncadd (%p5693_p8), [#allocation34], 4294965760 }
 0x1f5   : > { %6699 = dma.done.wait (%p5693_p8), [#allocation37], 1792  }
 0x1f6   : > { %6701 = vsyncadd (%p5693_p8), [#allocation37], 4294965504 }
 0x1f7   : > { %6703 = dma.done.wait (%p5693_p8), [#allocation40], 1040  }
 0x1f8   : > { %6705 = vsyncadd (%p5693_p8), [#allocation40], 4294966256 }
 0x1f9   : > { %6707 = dma.done.wait (%p5693_p8), [#allocation43], 32  }
 0x1fa   : > { %6709 = vsyncadd (%p5693_p8), [#allocation43], 4294967264  ;;  %s7983_s28 = sld [smem:[#allocation61_spill]]  ;;  %p1775_p9 = scmp.lt.s32.totalorder %s7061_s11, 1  ;;  %v1785_v1 = vlaneseq  ;;  %vm1827_vm0 = vcmask 1045504   ;;  %vm1823_vm3 = vcmask 97280  }
 0x1fb   : > { %v4565_v3 = vld [vmem:[#allocation6] sm:$0xf]  ;;  %v5361_v4 = vld [vmem:[#allocation6] sm:$0x30]  ;;  %v4570_v5 = vld [vmem:[#allocation3] sm:$0xf] }
 0x1fc   : > { %s1776_s5 = scalar_select %p1775_p9, %s7061_s11, 1  ;;  %v7498_v2 = vshrl.u32 %v1785_v1, 7  ;;  %v4566_v6 = vor.u32 %v5361_v4, %v4565_v3  ;;  %v5360_v7 = vld [vmem:[#allocation3] sm:$0x30]  ;;  %v4575_v8 = vld [vmem:[#allocation8] sm:$0xf] }
 0x1fd   : > { %v5362_v9 = vld [vmem:[#allocation8] sm:$0x30]  ;;  %v4571_v10 = vor.u32 %v5360_v7, %v4570_v5  ;;  %v5373_v31 = vld [vmem:[#allocation12 + $0x10] sm:$0xff]  ;;  %v5372_v34 = vld [vmem:[#allocation12 + $0x8] sm:$0xff]  ;;  %s7984_s13 = sld [smem:[#allocation65_spill]]  ;;  %vm1962_vm6 = vcmask 523264  }
 0x1fe   : > { %s5359_s6 = sshll.u32 %s1776_s5, 4  ;;  %vm1804_vm1 = vcmp.lt.s32.totalorder %v7498_v2, 1  ;;  %vm1807_vm2 = vcmp.ge.s32.totalorder %v7498_v2, 1  ;;  %v4576_v11 = vor.u32 %v5362_v9, %v4575_v8  ;;  %vm1787_vm4 = vcmp.lt.s32.totalorder %v7498_v2, 2  ;;  %v5374_v30 = vld [vmem:[#allocation12 + $0x18] sm:$0xff]  ;;  %v5369_v35 = vld [vmem:[#allocation11 + $0x10] sm:$0xff] }
 0x1ff   : > { %vm1791_vm5 = vcmp.ge.s32.totalorder %v7498_v2, 2  ;;  %v1829_v14 = vsel %vm1827_vm0, %v4566_v6, 0  ;;  %v1854_v18 = vsel %vm1827_vm0, %v4571_v10, 0  ;;  %v5370_v32 = vld [vmem:[#allocation11 + $0x18] sm:$0xff]  ;;  %v5365_v36 = vld [vmem:[#allocation9 + $0x10] sm:$0xff]  ;;  %v5371_v37 = vld [vmem:[#allocation12] sm:$0xff] }
 0x200   : > { %s1779_s7 = scalar_lea.vmem %s7983_s28, %s5359_s6  ;;  %1838 = vmatpush.bf16.msra.mxu0 %v1829_v14  ;;  %v1882_v19 = vsel %vm1827_vm0, %v4576_v11, 0  ;;  %1863 = vmatpush.bf16.msra.mxu1 %v1854_v18  ;;  %v5366_v33 = vld [vmem:[#allocation9 + $0x18] sm:$0xff]  ;;  %v5368_v38 = vld [vmem:[#allocation11 + $0x8] sm:$0xff]  ;;  %v4631_v40 = vld [vmem:[#allocation15] sm:$0xf]  ;;  %vm2083_vm7 = vcmp.lt.s32.totalorder %v7498_v2, 4 }
 0x201   : > { %v7503_v12 = vld [vmem:[%s1779_s7] sm:$0xff]  ;;  %v7505_v13 = vld [vmem:[%s1779_s7 + $0x8] sm:$0xff]  ;;  %1891 = vmatpush.bf16.msra.mxu2 %v1882_v19  ;;  %1970 = vmatpush.bf16.msra.mxu3 %v5370_v32  ;;  %vm2086_vm8 = vcmp.ge.s32.totalorder %v7498_v2, 4  ;;  %vm2376_vm9 = vcmask 785408   ;;  %s7985_s10 = sld [smem:[#allocation81_spill]]  ;;  %vm6805_vm10 = vmmov 1  }
 0x202   : > { %v1802_v15 = vrot.slane %v7503_v12, 7  ;;  %v1803_v16 = vrot.slane %v7505_v13, 7  ;;  %v1783_v17 = vrot.slane %v7503_v12, 6  ;;  %v1784_v20 = vrot.slane %v7505_v13, 6  ;;  %v5364_v39 = vld [vmem:[#allocation9 + $0x8] sm:$0xff]  ;;  %v5367_v42 = vld [vmem:[#allocation11] sm:$0xff]  ;;  %vm4884_vm11 = vmpackc.low %vm6805_vm10, %vm2086_vm8 }
 0x203   : > { %v1870_v21 = vpack.c.bf16 %v7505_v13, %v7503_v12  ;;  %v5375_v41 = vld [vmem:[#allocation15] sm:$0x30]  ;;  %v2081_v11 = vrot.slane %v7503_v12, 4  ;;  %v2082_v14 = vrot.slane %v7505_v13, 4  ;;  %s7987_s12 = sld [smem:[#allocation86_spill]]  ;;  %vm3482_vm12 = vcmask 261120  }
 0x204   : > { %v1805_v22 = vsel %vm1804_vm1, %v1802_v15, %v1803_v16  ;;  %v1806_v23 = vsel %vm1804_vm1, %v1803_v16, %v1802_v15  ;;  %v1788_v25 = vsel %vm1787_vm4, %v1783_v17, %v1784_v20  ;;  %v1789_v26 = vsel %vm1787_vm4, %v1784_v20, %v1783_v17  ;;  %2011 = vmatpush.bf16.msrb.mxu0 %v5366_v33  ;;  %v5363_v44 = vld [vmem:[#allocation9] sm:$0xff]  ;;  %v5408_v33 = vld [vmem:[#allocation30 + $0x10] sm:$0xff]  ;;  %s7988_s0 = sld [smem:[#allocation87_spill]] }
 0x205   : > { %v1813_v24 = vsel %vm1807_vm2, %v1806_v23, 0.0  ;;  %v1797_v28 = vsel %vm1791_vm5, %v1789_v26, 0.0  ;;  %4577 = vmatmul.msk.bf16.vlgmr.msra.gmra.mxu2 %vm1823_vm3, %v1870_v21  ;;  %1971 = vmatpush.bf16.msra.mxu3 %v5369_v35  ;;  %v4632_v43 = vor.u32 %v5375_v41, %v4631_v40  ;;  %v5832_v51 = vld [vmem:[%s7984_s13] ss:$0 sm:$0xff]  ;;  %v2085_v15 = vsel %vm2083_vm7, %v2082_v14, %v2081_v11  ;;  %v5386_v20 = vld [vmem:[#allocation21 + $0x10] sm:$0xff]  ;;  %v5385_v23 = vld [vmem:[#allocation21 + $0x8] sm:$0xff] }
 0x206   : > { %v1815_v27 = vpack.c.bf16 %v1805_v22, %v1813_v24  ;;  %v1799_v29 = vpack.c.bf16 %v1788_v25, %v1797_v28  ;;  %2061 = vmatpush.bf16.msrb.mxu2 %v5374_v30  ;;  %v2084_v16 = vsel %vm2083_vm7, %v2081_v11, %v2082_v14  ;;  %v2092_v17 = vsel %vm2086_vm8, %v2085_v15, 0.0  ;;  %v5387_v13 = vld [vmem:[#allocation21 + $0x18] sm:$0xff]  ;;  %v5382_v21 = vld [vmem:[#allocation20 + $0x10] sm:$0xff]  ;;  %v5381_v24 = vld [vmem:[#allocation20 + $0x8] sm:$0xff]  ;;  %s7990_s3 = sld [smem:[#allocation80_spill]] }
 0x207   : > { %v2110_v45 = vsel %vm1827_vm0, %v4632_v43, 0  ;;  %v2094_v12 = vpack.c.bf16 %v2084_v16, %v2092_v17  ;;  %2282 = vmatpush.bf16.msrb.mxu1 %v5387_v13  ;;  %v5383_v18 = vld [vmem:[#allocation20 + $0x18] sm:$0xff]  ;;  %v5378_v22 = vld [vmem:[#allocation18 + $0x10] sm:$0xff]  ;;  %v5377_v25 = vld [vmem:[#allocation18 + $0x8] sm:$0xff]  ;;  %s7986_s15 = smov %s7985_s10  ;;  %s7991_s4 = sld [smem:[#allocation89_spill]]  ;;  %vm3866_vm13 = vcmask 7168  }
 0x208   : > { %4567 = vmatmul.msk.bf16.vlgmr.msra.gmra.mxu0 %vm1823_vm3, %v1815_v27  ;;  %4572 = vmatmul.msk.bf16.vlgmr.msra.gmra.mxu1 %vm1823_vm3, %v1799_v29  ;;  %v5379_v19 = vld [vmem:[#allocation18 + $0x18] sm:$0xff]  ;;  %v5384_v26 = vld [vmem:[#allocation21] sm:$0xff]  ;;  %v5409_v30 = vld [vmem:[#allocation30 + $0x18] sm:$0xff]  ;;  %s7992_s28 = sld [smem:[#allocation84_spill]] }
 0x209   : > { %2012 = vmatpush.bf16.msrb.mxu0 %v5365_v36  ;;  %1972 = vmatpush.bf16.msra.mxu3 %v5368_v38  ;;  %v5380_v28 = vld [vmem:[#allocation20] sm:$0xff]  ;;  %v5834_v43 = vld [vmem:[#allocation17] ss:$0 sm:$0xff]  ;;  %v5393_v11 = vld [vmem:[#allocation24 + $0x28] sm:$0xff]  ;;  %s7993_s5 = sld [smem:[#allocation85_spill]] }
 0x20a   : > { %2062 = vmatpush.bf16.msrb.mxu2 %v5373_v31  ;;  %v5376_v29 = vld [vmem:[#allocation18] sm:$0xff]  ;;  %v5398_v15 = vld [vmem:[#allocation26 + $0x20] sm:$0xff]  ;;  %s7989_s1 = smov %s7988_s0  ;;  %s7994_s6 = sld [smem:[#allocation90_spill]] }
 0x20b   : > { %2283 = vmatpush.bf16.msrb.mxu1 %v5386_v20  ;;  %v5404_v14 = vld [vmem:[#allocation27 + $0x20] sm:$0xff]  ;;  %v5403_v17 = vld [vmem:[#allocation27 + $0x18] sm:$0xff]  ;;  %v5390_v20 = vld [vmem:[#allocation24 + $0x10] sm:$0xff]  ;;  %s7995_s7 = sld [smem:[#allocation88_spill]] }
 0x20c   : > { %v5392_v16 = vld [vmem:[#allocation24 + $0x20] sm:$0xff]  ;;  %v5391_v13 = vld [vmem:[#allocation24 + $0x18] sm:$0xff]  ;;  %s7996_s13 = sld [smem:[#allocation93_spill]] }
 0x20d   : > { %2013 = vmatpush.bf16.msrb.mxu0 %v5364_v39  ;;  %1973 = vmatpush.bf16.msra.mxu3 %v5367_v42  ;;  %v5833_v39 = vld [vmem:[#allocation14] ss:$0 sm:$0xff]  ;;  %v5051_v2 = vld [vmem:[%s7987_s12 + $0x48] sm:$0xf0] }
 0x20e   : > { %2063 = vmatpush.bf16.msrb.mxu2 %v5372_v34  ;;  %v5407_v34 = vld [vmem:[#allocation30 + $0x8] sm:$0xff] }
 0x20f   : > { %2284 = vmatpush.bf16.msrb.mxu1 %v5385_v23  ;;  %v5389_v23 = vld [vmem:[#allocation24 + $0x8] sm:$0xff] }
 0x211   : > { %2014 = vmatpush.bf16.msrb.mxu0 %v5363_v44  ;;  %2191 = vmatpush.bf16.msrb.mxu3 %v5383_v18  ;;  %v5402_v18 = vld [vmem:[#allocation27 + $0x10] sm:$0xff] }
 0x212   : > { %2064 = vmatpush.bf16.msrb.mxu2 %v5371_v37  ;;  %v5406_v37 = vld [vmem:[#allocation30] sm:$0xff] }
 0x213   : > { %2285 = vmatpush.bf16.msrb.mxu1 %v5384_v26  ;;  %v5388_v26 = vld [vmem:[#allocation24] sm:$0xff] }
 0x215   : > { %2232 = vmatpush.bf16.msra.mxu0 %v5379_v19  ;;  %2192 = vmatpush.bf16.msrb.mxu3 %v5382_v21  ;;  %v5396_v19 = vld [vmem:[#allocation26 + $0x10] sm:$0xff]  ;;  %v5401_v21 = vld [vmem:[#allocation27 + $0x8] sm:$0xff] }
 0x216   : > { %2119 = vmatpush.bf16.msra.mxu2 %v2110_v45 }
 0x217   : > { %2575 = vmatpush.bf16.msra.mxu1 %v5409_v30 }
 0x219   : > { %2233 = vmatpush.bf16.msra.mxu0 %v5378_v22  ;;  %2193 = vmatpush.bf16.msrb.mxu3 %v5381_v24  ;;  %v5395_v22 = vld [vmem:[#allocation26 + $0x8] sm:$0xff]  ;;  %v5400_v24 = vld [vmem:[#allocation27] sm:$0xff] }
 0x21b   : > { %2576 = vmatpush.bf16.msra.mxu1 %v5408_v33 }
 0x21d   : > { %2234 = vmatpush.bf16.msra.mxu0 %v5377_v25  ;;  %2194 = vmatpush.bf16.msrb.mxu3 %v5380_v28  ;;  %v5394_v25 = vld [vmem:[#allocation26] sm:$0xff] }
 0x21f   : > { %2577 = vmatpush.bf16.msra.mxu1 %v5407_v34 }
 0x221   : > { %2235 = vmatpush.bf16.msra.mxu0 %v5376_v29 }
 0x223   : > { %2578 = vmatpush.bf16.msra.mxu1 %v5406_v37 }
 0x285   : > { %v1840_v46 = vpop.f32.mrf.mxu0  ;;  %v1865_v47 = vpop.f32.mrf.mxu1 }
 0x286   : > { %v1866_v48 = vadd.f32 %v1865_v47, %v1840_v46 }
 0x288   : > { %v1893_v49 = vpop.f32.mrf.mxu2 }
 0x289   : > { %v1898_v50 = vadd.f32 %v1893_v49, %v1866_v48 }
 0x28b   : > { %v1904_v54 = vadd.f32 %v5832_v51, %v1898_v50 }
 0x28d   : > { %v1842_v52 = vpop.f32.mrf.mxu0  ;;  %v1867_v53 = vpop.f32.mrf.mxu1  ;;  %v1906_v58 = vmax.f32 %v1904_v54, 0.0 }
 0x28e   : > { %v1868_v55 = vadd.f32 %v1867_v53, %v1842_v52 }
 0x28f   : > { %v1908_v61 = vrot.slane %v1906_v58, 6  ;;  %v1923_v62 = vrot.slane %v1906_v58, 7 }
 0x290   : > { %v1895_v56 = vpop.f32.mrf.mxu2 }
 0x291   : > { %v1899_v57 = vadd.f32 %v1895_v56, %v1868_v55 }
 0x293   : > { %v1905_v59 = vadd.f32 %v5832_v51, %v1899_v57 }
 0x295   : > { %v1907_v60 = vmax.f32 %v1905_v59, 0.0 }
 0x297   : > { %v1909_v63 = vrot.slane %v1907_v60, 6  ;;  %v1924_v0 = vrot.slane %v1907_v60, 7  ;;  %v2021_v1 = vpack.c.bf16 %v1907_v60, %v1906_v58 }
 0x299   : > { %4628 = vmatmul.msk.bf16.vlgmr.msrb.gmra.mxu2 %vm1962_vm6, %v2021_v1  ;;  %v1925_v3 = vsel %vm1804_vm1, %v1923_v62, %v1924_v0  ;;  %v1926_v4 = vsel %vm1804_vm1, %v1924_v0, %v1923_v62  ;;  %v1910_v5 = vsel %vm1787_vm4, %v1908_v61, %v1909_v63  ;;  %v1911_v6 = vsel %vm1787_vm4, %v1909_v63, %v1908_v61 }
 0x29a   : > { %v1927_v7 = vsel %vm1807_vm2, %v1926_v4, 0.0  ;;  %v1912_v8 = vsel %vm1791_vm5, %v1911_v6, 0.0  ;;  %vm4129_vm2 = vcmask 32768  }
 0x29b   : > { %v1929_v9 = vpack.c.bf16 %v1925_v3, %v1927_v7  ;;  %v1914_v10 = vpack.c.bf16 %v1910_v5, %v1912_v8  ;;  %v6804_v7 = vmov 0.0  }
 0x29d   : > { %4594 = vmatmul.msk.bf16.vlgmr.msra.gmra.mxu3 %vm1962_vm6, %v1929_v9  ;;  %4611 = vmatmul.msk.bf16.vlgmr.msrb.gmra.mxu0 %vm1962_vm6, %v1914_v10  ;;  %v5405_v9 = vld [vmem:[#allocation27 + $0x28] sm:$0xff]  ;;  %v5399_v10 = vld [vmem:[#allocation26 + $0x28] sm:$0xff] }
 0x29e   : > { %2501 = vmatpush.bf16.msrb.mxu0 %v5405_v9  ;;  %2382 = vmatpush.bf16.msrb.mxu2 %v5399_v10  ;;  %v5422_v9 = vld [vmem:[#allocation36] sm:$0xff]  ;;  %v5416_v10 = vld [vmem:[#allocation35] sm:$0xff] }
 0x29f   : > { %2435 = vmatpush.bf16.msra.mxu3 %v5393_v11  ;;  %v5435_v11 = vld [vmem:[%s7985_s10 + $0x38] sm:$0xff]  ;;  %s7997_s10 = sld [smem:[#allocation91_spill]] }
 0x2a2   : > { %2502 = vmatpush.bf16.msrb.mxu0 %v5404_v14  ;;  %2383 = vmatpush.bf16.msrb.mxu2 %v5398_v15 }
 0x2a3   : > { %2436 = vmatpush.bf16.msra.mxu3 %v5392_v16 }
 0x2a6   : > { %2503 = vmatpush.bf16.msrb.mxu0 %v5403_v17 }
 0x2a7   : > { %2437 = vmatpush.bf16.msra.mxu3 %v5391_v13 }
 0x2a9   : > { %4633 = vmatmul.msk.bf16.vlgmr.msra.gmra.mxu2 %vm1823_vm3, %v2094_v12  ;;  %v5397_v12 = vld [vmem:[#allocation26 + $0x18] sm:$0xff] }
 0x2aa   : > { %2384 = vmatpush.bf16.msrb.mxu2 %v5397_v12  ;;  %2504 = vmatpush.bf16.msrb.mxu0 %v5402_v18  ;;  %v5837_v12 = vld [vmem:[#allocation29] ss:$0 sm:$0xff]  ;;  %v5836_v18 = vld [vmem:[#allocation32] ss:$0 sm:$0xff] }
 0x2ab   : > { %2438 = vmatpush.bf16.msra.mxu3 %v5390_v20 }
 0x2ae   : > { %2385 = vmatpush.bf16.msrb.mxu2 %v5396_v19  ;;  %2505 = vmatpush.bf16.msrb.mxu0 %v5401_v21 }
 0x2af   : > { %2439 = vmatpush.bf16.msra.mxu3 %v5389_v23 }
 0x2b2   : > { %2386 = vmatpush.bf16.msrb.mxu2 %v5395_v22  ;;  %2506 = vmatpush.bf16.msrb.mxu0 %v5400_v24 }
 0x2b3   : > { %2440 = vmatpush.bf16.msra.mxu3 %v5388_v26 }
 0x2b6   : > { %2387 = vmatpush.bf16.msrb.mxu2 %v5394_v25 }
 0x31a   : > { %v2016_v31 = vpop.f32.mrf.mxu0 }
 0x31c   : > { %v2066_v27 = vpop.f32.mrf.mxu2 }
 0x320   : > { %v1975_v32 = vpop.f32.mrf.mxu3 }
 0x321   : > { %v2017_v35 = vadd.f32 %v2016_v31, %v1975_v32  ;;  %v5835_v32 = vld [vmem:[#allocation23] ss:$0 sm:$0xff] }
 0x322   : > { %v2018_v40 = vpop.f32.mrf.mxu0 }
 0x323   : > { %v2071_v38 = vadd.f32 %v2066_v27, %v2017_v35 }
 0x324   : > { %v2068_v36 = vpop.f32.mrf.mxu2 }
 0x325   : > { %v2077_v44 = vadd.f32 %v5833_v39, %v2071_v38 }
 0x327   : > { %v2079_v48 = vmax.f32 %v2077_v44, 0.0 }
 0x328   : > { %v1977_v41 = vpop.f32.mrf.mxu3 }
 0x329   : > { %v2019_v42 = vadd.f32 %v2018_v40, %v1977_v41 }
 0x32b   : > { %v2072_v46 = vadd.f32 %v2068_v36, %v2019_v42 }
 0x32c   : > { %v2121_v45 = vpop.f32.mrf.mxu2 }
 0x32d   : > { %v2122_v47 = vadd.f32 %v5834_v43, %v2121_v45  ;;  %v2078_v49 = vadd.f32 %v5833_v39, %v2072_v46 }
 0x32f   : > { %v2126_v50 = vadd.f32 %v2122_v47, %v2079_v48  ;;  %v2080_v52 = vmax.f32 %v2078_v49, 0.0 }
 0x331   : > { %v2128_v54 = vmax.f32 %v2126_v50, 0.0 }
 0x333   : > { %v2130_v57 = vrot.slane %v2128_v54, 4  ;;  %v2145_v58 = vrot.slane %v2128_v54, 6  ;;  %v2531_v8 = vpack.c.bf16 %v2128_v54, %v6804_v7 }
 0x334   : > { %v2123_v51 = vpop.f32.mrf.mxu2 }
 0x335   : > { %v2124_v53 = vadd.f32 %v5834_v43, %v2123_v51 }
 0x337   : > { %v2127_v55 = vadd.f32 %v2124_v53, %v2080_v52 }
 0x339   : > { %v2129_v56 = vmax.f32 %v2127_v55, 0.0  ;;  %v5415_v55 = vld [vmem:[#allocation33 + $0x28] sm:$0xff] }
 0x33b   : > { %v2131_v59 = vrot.slane %v2129_v56, 4  ;;  %v2146_v60 = vrot.slane %v2129_v56, 6  ;;  %v2242_v61 = vpack.c.bf16 %v2129_v56, %v2128_v54  ;;  %v5414_v56 = vld [vmem:[#allocation33 + $0x20] sm:$0xff] }
 0x33d   : > { %v2132_v62 = vsel %vm2083_vm7, %v2130_v57, %v2131_v59  ;;  %v2133_v63 = vsel %vm2083_vm7, %v2131_v59, %v2130_v57  ;;  %4684 = vmatmul.msk.bf16.vlgmr.msrb.gmra.mxu1 %vm1962_vm6, %v2242_v61  ;;  %v2147_v0 = vsel %vm1787_vm4, %v2145_v58, %v2146_v60  ;;  %v2148_v1 = vsel %vm1787_vm4, %v2146_v60, %v2145_v58  ;;  %v5413_v57 = vld [vmem:[#allocation33 + $0x18] sm:$0xff]  ;;  %v5427_v58 = vld [vmem:[#allocation36 + $0x28] sm:$0xff]  ;;  %v5412_v60 = vld [vmem:[#allocation33 + $0x10] sm:$0xff] }
 0x33e   : > { %v2149_v3 = vsel %vm1791_vm5, %v2148_v1, 0.0  ;;  %v2134_v4 = vsel %vm2086_vm8, %v2133_v63, 0.0  ;;  %2717 = vmatpush.bf16.msrb.mxu1 %v5415_v55  ;;  %v5421_v59 = vld [vmem:[#allocation35 + $0x28] sm:$0xff]  ;;  %v5426_v61 = vld [vmem:[#allocation36 + $0x20] sm:$0xff]  ;;  %v5411_v63 = vld [vmem:[#allocation33 + $0x8] sm:$0xff] }
 0x33f   : > { %v2151_v5 = vpack.c.bf16 %v2147_v0, %v2149_v3  ;;  %v2136_v6 = vpack.c.bf16 %v2132_v62, %v2134_v4  ;;  %2664 = vmatpush.bf16.msra.mxu2 %v5421_v59  ;;  %v5420_v62 = vld [vmem:[#allocation35 + $0x20] sm:$0xff]  ;;  %v5425_v0 = vld [vmem:[#allocation36 + $0x18] sm:$0xff]  ;;  %v5419_v1 = vld [vmem:[#allocation35 + $0x18] sm:$0xff] }
 0x340   : > { %v5410_v3 = vld [vmem:[#allocation33] sm:$0xff]  ;;  %v5424_v4 = vld [vmem:[#allocation36 + $0x10] sm:$0xff]  ;;  %v5439_v59 = vld [vmem:[#allocation38 + $0x18] sm:$0xff] }
 0x341   : > { %4650 = vmatmul.msk.bf16.vlgmr.msrb.gmra.mxu3 %vm1962_vm6, %v2151_v5  ;;  %4667 = vmatmul.msk.bf16.vlgmr.msra.gmra.mxu0 %vm1962_vm6, %v2136_v6  ;;  %v5418_v5 = vld [vmem:[#allocation35 + $0x10] sm:$0xff]  ;;  %v5423_v6 = vld [vmem:[#allocation36 + $0x8] sm:$0xff]  ;;  %v5448_v55 = vld [vmem:[#allocation39 + $0x20] sm:$0xff] }
 0x342   : > { %2718 = vmatpush.bf16.msrb.mxu1 %v5414_v56  ;;  %2783 = vmatpush.bf16.msrb.mxu3 %v5427_v58  ;;  %v5440_v56 = vld [vmem:[#allocation38 + $0x20] sm:$0xff]  ;;  %v5447_v58 = vld [vmem:[#allocation39 + $0x18] sm:$0xff] }
 0x343   : > { %2665 = vmatpush.bf16.msra.mxu2 %v5420_v62  ;;  %v5438_v62 = vld [vmem:[#allocation38 + $0x10] sm:$0xff] }
 0x346   : > { %2719 = vmatpush.bf16.msrb.mxu1 %v5413_v57  ;;  %2784 = vmatpush.bf16.msrb.mxu3 %v5426_v61  ;;  %v5429_v57 = vld [vmem:[%s7986_s15 + $0x8] sm:$0xff]  ;;  %v5446_v61 = vld [vmem:[#allocation39 + $0x10] sm:$0xff] }
 0x347   : > { %2666 = vmatpush.bf16.msra.mxu2 %v5419_v1  ;;  %v5444_v1 = vld [vmem:[#allocation39] sm:$0xff] }
 0x34a   : > { %2720 = vmatpush.bf16.msrb.mxu1 %v5412_v60  ;;  %2785 = vmatpush.bf16.msrb.mxu3 %v5425_v0  ;;  %v5428_v60 = vld [vmem:[%s7986_s15] sm:$0xff]  ;;  %v5437_v0 = vld [vmem:[#allocation38 + $0x8] sm:$0xff] }
 0x34b   : > { %2667 = vmatpush.bf16.msra.mxu2 %v5418_v5  ;;  %v5467_v5 = vld [vmem:[%s7987_s12 + $0x74] sm:$0xf0] }
 0x34d   : > { %4776 = vmatmul.msk.bf16.vlgmr.msra.gmra.mxu1 %vm1962_vm6, %v2531_v8  ;;  %v5417_v8 = vld [vmem:[#allocation35 + $0x8] sm:$0xff] }
 0x34e   : > { %2721 = vmatpush.bf16.msrb.mxu1 %v5411_v63  ;;  %2786 = vmatpush.bf16.msrb.mxu3 %v5424_v4  ;;  %v5445_v63 = vld [vmem:[#allocation39 + $0x8] sm:$0xff] }
 0x34f   : > { %2668 = vmatpush.bf16.msra.mxu2 %v5417_v8  ;;  %v5073_v4 = vld [vmem:[%s7987_s12 + $0x70] sm:$0xf] }
 0x350   : > { %v5074_v8 = vor.u32 %v5467_v5, %v5073_v4  ;;  %v5041_v4 = vld [vmem:[%s7987_s12 + $0x30] sm:$0xf]  ;;  %v5459_v5 = vld [vmem:[%s7987_s12 + $0x34] sm:$0xf0] }
 0x352   : > { %2722 = vmatpush.bf16.msrb.mxu1 %v5410_v3  ;;  %2787 = vmatpush.bf16.msrb.mxu3 %v5423_v6  ;;  %v5436_v3 = vld [vmem:[#allocation38] sm:$0xff]  ;;  %v5466_v6 = vld [vmem:[%s7987_s12 + $0x74] sm:$0xf] }
 0x353   : > { %2669 = vmatpush.bf16.msra.mxu2 %v5416_v10  ;;  %v5065_v10 = vld [vmem:[%s7987_s12 + $0x60] sm:$0xf] }
 0x356   : > { %2788 = vmatpush.bf16.msrb.mxu3 %v5422_v9  ;;  %v5075_v9 = vld [vmem:[%s7987_s12 + $0x78] sm:$0xf0] }
 0x3ba   : > { %v2287_v28 = vpop.f32.mrf.mxu1 }
 0x3be   : > { %v2237_v27 = vpop.f32.mrf.mxu0 }
 0x3c2   : > { %v2289_v37 = vpop.f32.mrf.mxu1 }
 0x3c4   : > { %v2196_v29 = vpop.f32.mrf.mxu3 }
 0x3c5   : > { %v2238_v30 = vadd.f32 %v2237_v27, %v2196_v29 }
 0x3c6   : > { %v2239_v34 = vpop.f32.mrf.mxu0 }
 0x3c7   : > { %v2292_v31 = vadd.f32 %v2287_v28, %v2238_v30 }
 0x3c9   : > { %v2298_v33 = vadd.f32 %v5835_v32, %v2292_v31 }
 0x3ca   : > { %v2580_v13 = vpop.f32.mrf.mxu1 }
 0x3cb   : > { %v2300_v39 = vmax.f32 %v2298_v33, 0.0  ;;  %v2581_v21 = vadd.f32 %v5836_v18, %v2580_v13  ;;  %v5483_v13 = vld [vmem:[%s7989_s1 + $0x74] sm:$0xf0] }
 0x3cc   : > { %v2198_v35 = vpop.f32.mrf.mxu3 }
 0x3cd   : > { %v2240_v36 = vadd.f32 %v2239_v34, %v2198_v35  ;;  %v2302_v42 = vrot.slane %v2300_v39, 4  ;;  %v2321_v43 = vrot.slane %v2300_v39, 6 }
 0x3cf   : > { %v2293_v38 = vadd.f32 %v2289_v37, %v2240_v36 }
 0x3d1   : > { %v2299_v40 = vadd.f32 %v5835_v32, %v2293_v38 }
 0x3d2   : > { %v2582_v30 = vpop.f32.mrf.mxu1 }
 0x3d3   : > { %v2301_v41 = vmax.f32 %v2299_v40, 0.0  ;;  %v2583_v33 = vadd.f32 %v5836_v18, %v2582_v30  ;;  %v5482_v18 = vld [vmem:[%s7989_s1 + $0x74] sm:$0xf] }
 0x3d5   : > { %v2303_v44 = vrot.slane %v2301_v41, 4  ;;  %v2322_v45 = vrot.slane %v2301_v41, 6  ;;  %v2447_v46 = vpack.c.bf16 %v2301_v41, %v2300_v39 }
 0x3d7   : > { %4759 = vmatmul.msk.bf16.vlgmr.msrb.gmra.mxu0 %vm2376_vm9, %v2447_v46  ;;  %v2323_v47 = vsel %vm1787_vm4, %v2321_v43, %v2322_v45  ;;  %v2324_v48 = vsel %vm1787_vm4, %v2322_v45, %v2321_v43  ;;  %v2304_v49 = vsel %vm2083_vm7, %v2302_v42, %v2303_v44  ;;  %v2305_v50 = vsel %vm2083_vm7, %v2303_v44, %v2302_v42  ;;  %v5434_v44 = vld [vmem:[%s7986_s15 + $0x30] sm:$0xff]  ;;  %v5451_v45 = vld [vmem:[#allocation39 + $0x38] sm:$0xff] }
 0x3d8   : > { %v2325_v51 = vsel %vm1791_vm5, %v2324_v48, 0.0  ;;  %v2306_v52 = vsel %vm2086_vm8, %v2305_v50, 0.0  ;;  %v5433_v46 = vld [vmem:[%s7986_s15 + $0x28] sm:$0xff]  ;;  %3036 = vmatpush.bf16.msra.mxu1 %v5451_v45  ;;  %v5432_v48 = vld [vmem:[%s7986_s15 + $0x20] sm:$0xff] }
 0x3d9   : > { %v2327_v53 = vpack.c.bf16 %v2323_v47, %v2325_v51  ;;  %v2308_v54 = vpack.c.bf16 %v2304_v49, %v2306_v52  ;;  %v5443_v47 = vld [vmem:[#allocation38 + $0x38] sm:$0xff]  ;;  %v5450_v49 = vld [vmem:[#allocation39 + $0x30] sm:$0xff]  ;;  %v5449_v52 = vld [vmem:[#allocation39 + $0x28] sm:$0xff] }
 0x3da   : > { %2895 = vmatpush.bf16.msra.mxu0 %v5443_v47  ;;  %v5442_v50 = vld [vmem:[#allocation38 + $0x30] sm:$0xff] }
 0x3db   : > { %4709 = vmatmul.msk.bf16.vlgmr.msrb.gmra.mxu2 %vm2376_vm9, %v2327_v53  ;;  %4734 = vmatmul.msk.bf16.vlgmr.msra.gmra.mxu3 %vm2376_vm9, %v2308_v54  ;;  %v5431_v51 = vld [vmem:[%s7986_s15 + $0x18] sm:$0xff]  ;;  %v5430_v54 = vld [vmem:[%s7986_s15 + $0x10] sm:$0xff] }
 0x3dc   : > { %2957 = vmatpush.bf16.msrb.mxu2 %v5435_v11  ;;  %3037 = vmatpush.bf16.msra.mxu1 %v5450_v49  ;;  %v5441_v53 = vld [vmem:[#allocation38 + $0x28] sm:$0xff]  ;;  %v5465_v11 = vld [vmem:[%s7987_s12 + $0x64] sm:$0xf0] }
 0x3de   : > { %2896 = vmatpush.bf16.msra.mxu0 %v5442_v50 }
 0x3e0   : > { %2958 = vmatpush.bf16.msrb.mxu2 %v5434_v44  ;;  %3038 = vmatpush.bf16.msra.mxu1 %v5449_v52  ;;  %v5481_v52 = vld [vmem:[%s7989_s1 + $0x64] sm:$0xf0] }
 0x3e2   : > { %2897 = vmatpush.bf16.msra.mxu0 %v5441_v53  ;;  %v5480_v53 = vld [vmem:[%s7989_s1 + $0x64] sm:$0xf] }
 0x3e4   : > { %2959 = vmatpush.bf16.msrb.mxu2 %v5433_v46  ;;  %3039 = vmatpush.bf16.msra.mxu1 %v5448_v55  ;;  %v5003_v55 = vld [vmem:[%s7989_s1 + $0x68] sm:$0xf0] }
 0x3e6   : > { %2898 = vmatpush.bf16.msra.mxu0 %v5440_v56  ;;  %v5049_v56 = vld [vmem:[%s7987_s12 + $0x40] sm:$0xf] }
 0x3e8   : > { %2960 = vmatpush.bf16.msrb.mxu2 %v5432_v48  ;;  %3040 = vmatpush.bf16.msra.mxu1 %v5447_v58  ;;  %v5006_v58 = vor.u32 %v5480_v53, %v5003_v55  ;;  %v5469_v55 = vld [vmem:[%s7989_s1 + $0x4] sm:$0xf0] }
 0x3ea   : > { %2899 = vmatpush.bf16.msra.mxu0 %v5439_v59 }
 0x3ec   : > { %2961 = vmatpush.bf16.msrb.mxu2 %v5431_v51  ;;  %3041 = vmatpush.bf16.msra.mxu1 %v5446_v61  ;;  %v5001_v51 = vld [vmem:[%s7989_s1 + $0x60] sm:$0xf] }
 0x3ee   : > { %2900 = vmatpush.bf16.msra.mxu0 %v5438_v62  ;;  %v4993_v62 = vld [vmem:[%s7989_s1 + $0x50] sm:$0xf] }
 0x3f0   : > { %2962 = vmatpush.bf16.msrb.mxu2 %v5430_v54  ;;  %3042 = vmatpush.bf16.msra.mxu1 %v5445_v63  ;;  %v5002_v54 = vor.u32 %v5481_v52, %v5001_v51  ;;  %v5479_v63 = vld [vmem:[%s7989_s1 + $0x54] sm:$0xf0]  ;;  %v4963_v52 = vld [vmem:[%s7989_s1 + $0x18] sm:$0xf0] }
 0x3f2   : > { %2901 = vmatpush.bf16.msra.mxu0 %v5437_v0  ;;  %v5478_v0 = vld [vmem:[%s7989_s1 + $0x54] sm:$0xf] }
 0x3f4   : > { %2963 = vmatpush.bf16.msrb.mxu2 %v5429_v57  ;;  %3043 = vmatpush.bf16.msra.mxu1 %v5444_v1  ;;  %v5461_v57 = vld [vmem:[%s7987_s12 + $0x44] sm:$0xf0]  ;;  %v4994_v1 = vor.u32 %v5479_v63, %v4993_v62 }
 0x3f5   : > { %v5050_v59 = vor.u32 %v5461_v57, %v5049_v56  ;;  %v5468_v56 = vld [vmem:[%s7989_s1 + $0x4] sm:$0xf]  ;;  %v5497_v63 = vld [vmem:[%s7991_s4 + $0x64] sm:$0xf0] }
 0x3f6   : > { %2902 = vmatpush.bf16.msra.mxu0 %v5436_v3  ;;  %v4995_v3 = vld [vmem:[%s7989_s1 + $0x58] sm:$0xf0] }
 0x3f8   : > { %2964 = vmatpush.bf16.msrb.mxu2 %v5428_v60  ;;  %v5460_v60 = vld [vmem:[%s7987_s12 + $0x44] sm:$0xf] }
 0x3f9   : > { %v5054_v61 = vor.u32 %v5460_v60, %v5051_v2  ;;  %v5219_v60 = vld [vmem:[%s7991_s4 + $0x70] sm:$0xf]  ;;  %v5499_v2 = vld [vmem:[%s7991_s4 + $0x74] sm:$0xf0] }
 0x3fa   : > { %v5220_v62 = vor.u32 %v5499_v2, %v5219_v60  ;;  %v5105_v2 = vld [vmem:[%s7994_s6 + $0x30] sm:$0xf] }
 0x454   : > { %v2508_v14 = vpop.f32.mrf.mxu0 }
 0x45c   : > { %v2510_v27 = vpop.f32.mrf.mxu0 }
 0x45e   : > { %v2389_v15 = vpop.f32.mrf.mxu2  ;;  %v2442_v16 = vpop.f32.mrf.mxu3 }
 0x45f   : > { %v2443_v17 = vadd.f32 %v2442_v16, %v2389_v15  ;;  %v5464_v15 = vld [vmem:[%s7987_s12 + $0x64] sm:$0xf]  ;;  %v5067_v16 = vld [vmem:[%s7987_s12 + $0x68] sm:$0xf0] }
 0x461   : > { %v2513_v19 = vadd.f32 %v2508_v14, %v2443_v17  ;;  %v5078_v14 = vor.u32 %v5466_v6, %v5075_v9  ;;  %v5009_v17 = vld [vmem:[%s7988_s0 + $0x70] sm:$0xf]  ;;  %v4998_v6 = vor.u32 %v5478_v0, %v4995_v3  ;;  %v5458_v9 = vld [vmem:[%s7987_s12 + $0x34] sm:$0xf]  ;;  %s7998_s0 = sld [smem:[#allocation92_spill]] }
 0x463   : > { %v2519_v20 = vadd.f32 %v5837_v12, %v2513_v19  ;;  %v5011_v19 = vld [vmem:[%s7989_s1 + $0x78] sm:$0xf0] }
 0x465   : > { %v2521_v22 = vmax.f32 %v2519_v20, 0.0  ;;  %v5070_v20 = vor.u32 %v5464_v15, %v5067_v16  ;;  %v5477_v15 = vld [vmem:[%s7989_s1 + $0x44] sm:$0xf0] }
 0x466   : > { %v2391_v23 = vpop.f32.mrf.mxu2  ;;  %v2444_v24 = vpop.f32.mrf.mxu3 }
 0x467   : > { %v2585_v25 = vadd.f32 %v2581_v21, %v2521_v22  ;;  %v2445_v26 = vadd.f32 %v2444_v24, %v2391_v23  ;;  %v5010_v21 = vor.u32 %v5483_v13, %v5009_v17  ;;  %v5014_v22 = vor.u32 %v5482_v18, %v5011_v19  ;;  %v5057_v23 = vld [vmem:[%s7987_s12 + $0x50] sm:$0xf]  ;;  %v5463_v24 = vld [vmem:[%s7987_s12 + $0x54] sm:$0xf0]  ;;  %v5476_v17 = vld [vmem:[%s7989_s1 + $0x44] sm:$0xf] }
 0x468   : > { %v5033_v13 = vld [vmem:[%s7987_s12 + $0x20] sm:$0xf]  ;;  %v5457_v19 = vld [vmem:[%s7987_s12 + $0x24] sm:$0xf0] }
 0x469   : > { %v2587_v28 = vmax.f32 %v2585_v25, 0.0  ;;  %v2514_v29 = vadd.f32 %v2510_v27, %v2445_v26  ;;  %v5462_v25 = vld [vmem:[%s7987_s12 + $0x54] sm:$0xf]  ;;  %v5059_v26 = vld [vmem:[%s7987_s12 + $0x58] sm:$0xf0]  ;;  %3184 = vmatpush.bf16.msra.mxu3 %v5010_v21  ;;  %3198 = vmatpush.bf16.msrb.mxu0 %v5014_v22  ;;  %v5058_v27 = vor.u32 %v5463_v24, %v5057_v23  ;;  %v5034_v22 = vor.u32 %v5457_v19, %v5033_v13 }
 0x46a   : > { %v5035_v21 = vld [vmem:[%s7987_s12 + $0x28] sm:$0xf0]  ;;  %v4977_v24 = vld [vmem:[%s7989_s1 + $0x30] sm:$0xf] }
 0x46b   : > { %v2520_v31 = vadd.f32 %v5837_v12, %v2514_v29  ;;  %v2591_v32 = vpack.c.bf16 %v2587_v28, %v6804_v7  ;;  %v2604_v37 = vrot.slane %v2587_v28, 4  ;;  %v5066_v12 = vor.u32 %v5465_v11, %v5065_v10  ;;  %v5043_v10 = vld [vmem:[%s7987_s12 + $0x38] sm:$0xf0] }
 0x46c   : > { %v5062_v29 = vor.u32 %v5462_v25, %v5059_v26  ;;  %v5046_v11 = vor.u32 %v5458_v9, %v5043_v10  ;;  %v5475_v25 = vld [vmem:[%s7989_s1 + $0x34] sm:$0xf0]  ;;  %v5840_v10 = vld [vmem:[%s7993_s5] ss:$0 sm:$0xff]  ;;  %s1773_s5 = sand.u32 1, %s6720_s27  }
 0x46d   : > { %v2522_v34 = vmax.f32 %v2520_v31, 0.0  ;;  %4826 = vmatmul.msk.bf16.vlgmr.msrb.gmra.mxu1 %vm2376_vm9, %v2591_v32  ;;  %3185 = vmatpush.bf16.msra.mxu3 %v5002_v54  ;;  %v4978_v26 = vor.u32 %v5475_v25, %v4977_v24  ;;  %v4953_v54 = vld [vmem:[%s7989_s1] sm:$0xf]  ;;  %v5137_v25 = vld [vmem:[%s7994_s6 + $0x70] sm:$0xf] }
 0x46e   : > { %3306 = vmatpush.bf16.msrb.mxu1 %v5078_v14  ;;  %3199 = vmatpush.bf16.msrb.mxu0 %v5006_v58  ;;  %v4985_v14 = vld [vmem:[%s7989_s1 + $0x40] sm:$0xf]  ;;  %v4954_v57 = vor.u32 %v5469_v55, %v4953_v54  ;;  %v4955_v58 = vld [vmem:[%s7989_s1 + $0x8] sm:$0xf0]  ;;  %v5512_v54 = vld [vmem:[%s7994_s6 + $0x44] sm:$0xf] }
 0x46f   : > { %v2586_v35 = vadd.f32 %v2583_v33, %v2522_v34  ;;  %v5838_v33 = vld [vmem:[%s7990_s3] ss:$0 sm:$0xff]  ;;  %v4986_v16 = vor.u32 %v5477_v15, %v4985_v14  ;;  %s7999_s3 = sld [smem:[#allocation95_spill]] }
 0x471   : > { %v2588_v36 = vmax.f32 %v2586_v35, 0.0  ;;  %3186 = vmatpush.bf16.msra.mxu3 %v4994_v1 }
 0x472   : > { %3307 = vmatpush.bf16.msrb.mxu1 %v5070_v20  ;;  %3200 = vmatpush.bf16.msrb.mxu0 %v4998_v6  ;;  %v5456_v20 = vld [vmem:[%s7987_s12 + $0x24] sm:$0xf]  ;;  %v5839_v6 = vld [vmem:[%s7992_s28] ss:$0 sm:$0xff]  ;;  %s8000_s28 = sld [smem:[#allocation96_spill]] }
 0x473   : > { %v2605_v38 = vrot.slane %v2588_v36, 4  ;;  %v2729_v39 = vpack.c.bf16 %v2588_v36, %v2587_v28  ;;  %v5038_v23 = vor.u32 %v5456_v20, %v5035_v21 }
 0x475   : > { %4851 = vmatmul.msk.bf16.vlgmr.msrb.gmra.mxu3 %vm2376_vm9, %v2729_v39  ;;  %v2606_v40 = vsel %vm2083_vm7, %v2604_v37, %v2605_v38  ;;  %v2607_v41 = vsel %vm2083_vm7, %v2605_v38, %v2604_v37 }
 0x476   : > { %v2608_v42 = vsel %vm2086_vm8, %v2607_v41, 0.0  ;;  %3308 = vmatpush.bf16.msrb.mxu1 %v5062_v29  ;;  %3187 = vmatpush.bf16.msra.mxu3 %v4986_v16  ;;  %v5025_v29 = vld [vmem:[%s7987_s12 + $0x10] sm:$0xf] }
 0x477   : > { %v2610_v43 = vpack.c.bf16 %v2606_v40, %v2608_v42 }
 0x479   : > { %4801 = vmatmul.msk.bf16.vlgmr.msra.gmra.mxu2 %vm2376_vm9, %v2610_v43 }
 0x47a   : > { %3292 = vmatpush.bf16.msra.mxu2 %v5074_v8  ;;  %3309 = vmatpush.bf16.msrb.mxu1 %v5054_v61  ;;  %v5042_v8 = vor.u32 %v5459_v5, %v5041_v4  ;;  %v5211_v61 = vld [vmem:[%s7991_s4 + $0x60] sm:$0xf] }
 0x47b   : > { %3188 = vmatpush.bf16.msra.mxu3 %v4978_v26  ;;  %v5212_v0 = vor.u32 %v5497_v63, %v5211_v61  ;;  %v5519_v26 = vld [vmem:[%s7994_s6 + $0x74] sm:$0xf0]  ;;  %v5153_v63 = vld [vmem:[%s7994_s6 + $0x90] sm:$0xf] }
 0x47c   : > { %v5511_v61 = vld [vmem:[%s7994_s6 + $0x34] sm:$0xf0] }
 0x47e   : > { %3293 = vmatpush.bf16.msra.mxu2 %v5066_v12  ;;  %3310 = vmatpush.bf16.msrb.mxu1 %v5046_v11  ;;  %v4987_v12 = vld [vmem:[%s7989_s1 + $0x48] sm:$0xf0] }
 0x47f   : > { %v4990_v18 = vor.u32 %v5476_v17, %v4987_v12 }
 0x481   : > { %3201 = vmatpush.bf16.msrb.mxu0 %v4990_v18 }
 0x482   : > { %3294 = vmatpush.bf16.msra.mxu2 %v5058_v27  ;;  %3311 = vmatpush.bf16.msrb.mxu1 %v5038_v23  ;;  %v5474_v27 = vld [vmem:[%s7989_s1 + $0x34] sm:$0xf] }
 0x486   : > { %3295 = vmatpush.bf16.msra.mxu2 %v5050_v59  ;;  %v4958_v59 = vor.u32 %v5468_v56, %v4955_v58  ;;  %v5115_v56 = vld [vmem:[%s7994_s6 + $0x48] sm:$0xf0]  ;;  %v5489_v58 = vld [vmem:[%s7991_s4 + $0x24] sm:$0xf0] }
 0x48a   : > { %3296 = vmatpush.bf16.msra.mxu2 %v5042_v8 }
 0x48e   : > { %3297 = vmatpush.bf16.msra.mxu2 %v5034_v22 }
 0x4ea   : > { %v2724_v28 = vpop.f32.mrf.mxu1 }
 0x4f2   : > { %v2726_v37 = vpop.f32.mrf.mxu1 }
 0x4f8   : > { %v2790_v30 = vpop.f32.mrf.mxu3 }
 0x4fc   : > { %v2671_v31 = vpop.f32.mrf.mxu2 }
 0x4fd   : > { %v2725_v32 = vadd.f32 %v2724_v28, %v2671_v31  ;;  %v4979_v28 = vld [vmem:[%s7989_s1 + $0x38] sm:$0xf0]  ;;  %v5455_v31 = vld [vmem:[%s7987_s12 + $0x14] sm:$0xf0] }
 0x4ff   : > { %v2795_v34 = vadd.f32 %v2790_v30, %v2725_v32  ;;  %v4982_v30 = vor.u32 %v5474_v27, %v4979_v28  ;;  %v5454_v32 = vld [vmem:[%s7987_s12 + $0x14] sm:$0xf]  ;;  %v5138_v28 = vor.u32 %v5519_v26, %v5137_v25  ;;  %v5089_v25 = vld [vmem:[%s7994_s6 + $0x10] sm:$0xf]  ;;  %v5507_v26 = vld [vmem:[%s7994_s6 + $0x14] sm:$0xf0] }
 0x500   : > { %v2792_v41 = vpop.f32.mrf.mxu3  ;;  %v5518_v27 = vld [vmem:[%s7994_s6 + $0x74] sm:$0xf] }
 0x501   : > { %v2801_v35 = vadd.f32 %v5838_v33, %v2795_v34  ;;  %v5026_v34 = vor.u32 %v5455_v31, %v5025_v29  ;;  %3202 = vmatpush.bf16.msrb.mxu0 %v4982_v30  ;;  %v5139_v29 = vld [vmem:[%s7994_s6 + $0x78] sm:$0xf0]  ;;  %v5203_v30 = vld [vmem:[%s7991_s4 + $0x50] sm:$0xf]  ;;  %v5495_v31 = vld [vmem:[%s7991_s4 + $0x54] sm:$0xf0] }
 0x503   : > { %v2803_v36 = vmax.f32 %v2801_v35, 0.0  ;;  %3298 = vmatpush.bf16.msra.mxu2 %v5026_v34  ;;  %v5129_v34 = vld [vmem:[%s7994_s6 + $0x60] sm:$0xf] }
 0x504   : > { %v2673_v38 = vpop.f32.mrf.mxu2 }
 0x505   : > { %v2727_v39 = vadd.f32 %v2726_v37, %v2673_v38  ;;  %v2807_v40 = vpack.c.bf16 %v2803_v36, %v6804_v7  ;;  %v2824_v45 = vrot.slane %v2803_v36, 4  ;;  %v5473_v37 = vld [vmem:[%s7989_s1 + $0x24] sm:$0xf0]  ;;  %v5472_v38 = vld [vmem:[%s7989_s1 + $0x24] sm:$0xf] }
 0x507   : > { %v2796_v42 = vadd.f32 %v2792_v41, %v2727_v39  ;;  %2965 = vmatmul.bf16.vlgmr.msrb.gmra.mxu2 %v2807_v40  ;;  %v4971_v40 = vld [vmem:[%s7989_s1 + $0x28] sm:$0xf0]  ;;  %v5017_v41 = vld [vmem:[%s7987_s12] sm:$0xf] }
 0x509   : > { %v2802_v43 = vadd.f32 %v5838_v33, %v2796_v42  ;;  %v5027_v33 = vld [vmem:[%s7987_s12 + $0x18] sm:$0xf0]  ;;  %v5453_v42 = vld [vmem:[%s7987_s12 + $0x4] sm:$0xf0] }
 0x50a   : > { %v5030_v35 = vor.u32 %v5454_v32, %v5027_v33  ;;  %v5142_v32 = vor.u32 %v5518_v27, %v5139_v29  ;;  %v5204_v33 = vor.u32 %v5495_v31, %v5203_v30  ;;  %v5506_v27 = vld [vmem:[%s7994_s6 + $0x14] sm:$0xf]  ;;  %v5091_v29 = vld [vmem:[%s7994_s6 + $0x18] sm:$0xf0]  ;;  %v5520_v30 = vld [vmem:[%s7994_s6 + $0x84] sm:$0xf] }
 0x50b   : > { %v2804_v44 = vmax.f32 %v2802_v43, 0.0  ;;  %v4974_v43 = vor.u32 %v5472_v38, %v4971_v40  ;;  %v5131_v38 = vld [vmem:[%s7994_s6 + $0x68] sm:$0xf0]  ;;  %v5493_v40 = vld [vmem:[%s7991_s4 + $0x44] sm:$0xf0] }
 0x50c   : > { %3312 = vmatpush.bf16.msrb.mxu1 %v5030_v35  ;;  %v5517_v35 = vld [vmem:[%s7994_s6 + $0x64] sm:$0xf0]  ;;  %v5147_v31 = vld [vmem:[%s7994_s6 + $0x88] sm:$0xf0] }
 0x50d   : > { %v2825_v46 = vrot.slane %v2804_v44, 4  ;;  %v2971_v47 = vpack.c.bf16 %v2804_v44, %v2803_v36  ;;  %v4969_v36 = vld [vmem:[%s7989_s1 + $0x20] sm:$0xf]  ;;  %v5018_v44 = vor.u32 %v5453_v42, %v5017_v41  ;;  %3203 = vmatpush.bf16.msrb.mxu0 %v4974_v43  ;;  %v5121_v43 = vld [vmem:[%s7994_s6 + $0x50] sm:$0xf] }
 0x50e   : > { %v4970_v39 = vor.u32 %v5473_v37, %v4969_v36  ;;  %v5516_v36 = vld [vmem:[%s7994_s6 + $0x64] sm:$0xf]  ;;  %v5130_v37 = vor.u32 %v5517_v35, %v5129_v34  ;;  %v5081_v34 = vld [vmem:[%s7994_s6] sm:$0xf]  ;;  %v5505_v35 = vld [vmem:[%s7994_s6 + $0x4] sm:$0xf0] }
 0x50f   : > { %v2826_v48 = vsel %vm2083_vm7, %v2824_v45, %v2825_v46  ;;  %v2827_v49 = vsel %vm2083_vm7, %v2825_v46, %v2824_v45  ;;  %3044 = vmatmul.bf16.vlgmr.msra.gmra.mxu1 %v2971_v47  ;;  %v5452_v45 = vld [vmem:[%s7987_s12 + $0x4] sm:$0xf]  ;;  %v5019_v46 = vld [vmem:[%s7987_s12 + $0x8] sm:$0xf0]  ;;  %3299 = vmatpush.bf16.msra.mxu2 %v5018_v44  ;;  %v5134_v41 = vor.u32 %v5516_v36, %v5131_v38  ;;  %v5515_v44 = vld [vmem:[%s7994_s6 + $0x54] sm:$0xf0] }
 0x510   : > { %v4885_v50 = vpack.c.bf16 %v2826_v48, %v2827_v49  ;;  %3189 = vmatpush.bf16.msra.mxu3 %v4970_v39  ;;  %v5022_v47 = vor.u32 %v5452_v45, %v5019_v46  ;;  %v4961_v48 = vld [vmem:[%s7989_s1 + $0x10] sm:$0xf]  ;;  %v5471_v49 = vld [vmem:[%s7989_s1 + $0x14] sm:$0xf0]  ;;  %v5195_v39 = vld [vmem:[%s7991_s4 + $0x40] sm:$0xf]  ;;  %v5122_v46 = vor.u32 %v5515_v44, %v5121_v43 }
 0x511   : > { %v4962_v51 = vor.u32 %v5471_v49, %v4961_v48  ;;  %v5196_v42 = vor.u32 %v5493_v40, %v5195_v39  ;;  %v5514_v45 = vld [vmem:[%s7994_s6 + $0x54] sm:$0xf]  ;;  %v5187_v48 = vld [vmem:[%s7991_s4 + $0x30] sm:$0xf]  ;;  %v5491_v49 = vld [vmem:[%s7991_s4 + $0x34] sm:$0xf0] }
 0x512   : > { %4886 = vmatmul.msk.bf16.vlgmr.msra.gmra.mxu0 %vm4884_vm11, %v4885_v50  ;;  %v5470_v50 = vld [vmem:[%s7989_s1 + $0x14] sm:$0xf]  ;;  %3313 = vmatpush.bf16.msrb.mxu1 %v5022_v47  ;;  %v5123_v47 = vld [vmem:[%s7994_s6 + $0x58] sm:$0xf0]  ;;  %v5504_v36 = vld [vmem:[%s7994_s6 + $0x4] sm:$0xf] }
 0x513   : > { %v4966_v53 = vor.u32 %v5470_v50, %v4963_v52  ;;  %3514 = vmatpush.bf16.msrb.mxu2 %v5142_v32  ;;  %v5126_v50 = vor.u32 %v5514_v45, %v5123_v47  ;;  %v5113_v52 = vld [vmem:[%s7994_s6 + $0x40] sm:$0xf]  ;;  %v5094_v32 = vor.u32 %v5506_v27, %v5091_v29  ;;  %v5083_v38 = vld [vmem:[%s7994_s6 + $0x8] sm:$0xf0]  ;;  %v5235_v40 = vld [vmem:[%s7991_s4 + $0x90] sm:$0xf] }
 0x514   : > { %3190 = vmatpush.bf16.msra.mxu3 %v4962_v51  ;;  %v5188_v51 = vor.u32 %v5491_v49, %v5187_v48  ;;  %v5086_v39 = vor.u32 %v5504_v36, %v5083_v38  ;;  %v5227_v44 = vld [vmem:[%s7991_s4 + $0x80] sm:$0xf]  ;;  %v5501_v45 = vld [vmem:[%s7991_s4 + $0x84] sm:$0xf0]  ;;  %v5490_v27 = vld [vmem:[%s7991_s4 + $0x34] sm:$0xf] }
 0x515   : > { %3204 = vmatpush.bf16.msrb.mxu0 %v4966_v53  ;;  %v5513_v53 = vld [vmem:[%s7994_s6 + $0x44] sm:$0xf0]  ;;  %v3320_v48 = vld [vmem:[%s7995_s7] sm:$0x3]  ;;  %v5165_v38 = vld [vmem:[%s7991_s4 + $0x8] sm:$0xf0]  ;;  %s4140_s7 = scalar_lea.hbm %s7038_s19, %s7061_s11 }
 0x516   : > { %3645 = vmatpush.bf16.msra.mxu1 %v5220_v62  ;;  %v5114_v55 = vor.u32 %v5513_v53, %v5113_v52  ;;  %v5106_v62 = vor.u32 %v5511_v61, %v5105_v2  ;;  %v3322_v52 = vperm.slane %v3320_v48, 0  ;;  %v5498_v61 = vld [vmem:[%s7991_s4 + $0x74] sm:$0xf]  ;;  %s4132_s1 = scalar_lea.sflag [#allocation5], %s1773_s5  ;;  %s6630_s11 = scalar_lea.hbm %s7038_s19, 2 }
 0x517   : > { %3515 = vmatpush.bf16.msrb.mxu2 %v5134_v41  ;;  %v5503_v41 = vld [vmem:[%s7991_s4 + $0x94] sm:$0xf0] }
 0x518   : > { %3191 = vmatpush.bf16.msra.mxu3 %v4954_v57  ;;  %v5179_v57 = vld [vmem:[%s7991_s4 + $0x20] sm:$0xf] }
 0x519   : > { %3205 = vmatpush.bf16.msrb.mxu0 %v4958_v59  ;;  %v5118_v59 = vor.u32 %v5512_v54, %v5115_v56  ;;  %v5180_v60 = vor.u32 %v5489_v58, %v5179_v57 }
 0x51a   : > { %3646 = vmatpush.bf16.msra.mxu1 %v5212_v0  ;;  %v5523_v0 = vld [vmem:[%s7994_s6 + $0x94] sm:$0xf0] }
 0x51b   : > { %3516 = vmatpush.bf16.msrb.mxu2 %v5126_v50 }
 0x51c   : > { %3486 = vmatpush.bf16.msrb.mxu3 %v5138_v28  ;;  %v5090_v28 = vor.u32 %v5507_v26, %v5089_v25 }
 0x51e   : > { %3647 = vmatpush.bf16.msra.mxu1 %v5204_v33  ;;  %v5150_v33 = vor.u32 %v5520_v30, %v5147_v31  ;;  %v5488_v30 = vld [vmem:[%s7991_s4 + $0x24] sm:$0xf]  ;;  %v5181_v31 = vld [vmem:[%s7991_s4 + $0x28] sm:$0xf0] }
 0x51f   : > { %3517 = vmatpush.bf16.msrb.mxu2 %v5118_v59 }
 0x520   : > { %3487 = vmatpush.bf16.msrb.mxu3 %v5130_v37  ;;  %v5082_v37 = vor.u32 %v5505_v35, %v5081_v34  ;;  %v5173_v34 = vld [vmem:[%s7991_s4 + $0x18] sm:$0xf0] }
 0x522   : > { %3648 = vmatpush.bf16.msra.mxu1 %v5196_v42  ;;  %v5236_v42 = vor.u32 %v5503_v41, %v5235_v40  ;;  %v5531_v40 = vld [vmem:[%s7996_s13 + $0x38] sm:$0xff]  ;;  %v5529_v41 = vld [vmem:[%s7996_s13 + $0x28] sm:$0xff] }
 0x524   : > { %3488 = vmatpush.bf16.msrb.mxu3 %v5122_v46  ;;  %v5228_v46 = vor.u32 %v5501_v45, %v5227_v44  ;;  %v5527_v44 = vld [vmem:[%s7996_s13 + $0x18] sm:$0xff]  ;;  %v5526_v45 = vld [vmem:[%s7996_s13 + $0x10] sm:$0xff] }
 0x526   : > { %3649 = vmatpush.bf16.msra.mxu1 %v5188_v51  ;;  %v3323_v51 = vperm.slane %v3320_v48, 1 }
 0x528   : > { %3489 = vmatpush.bf16.msrb.mxu3 %v5114_v55 }
 0x52a   : > { %3650 = vmatpush.bf16.msra.mxu1 %v5180_v60 }
 0x52c   : > { %3490 = vmatpush.bf16.msrb.mxu3 %v5106_v62  ;;  %v5221_v62 = vld [vmem:[%s7991_s4 + $0x78] sm:$0xf0] }
 0x58a   : > { %v2966_v1 = vpop.f32.mrf.mxu2 }
 0x58c   : > { %v3045_v3 = vpop.f32.mrf.mxu1 }
 0x58f   : > { %v2904_v4 = vpop.f32.mrf.mxu0 }
 0x590   : > { %v2967_v5 = vadd.f32 %v2966_v1, %v2904_v4  ;;  %v5510_v1 = vld [vmem:[%s7994_s6 + $0x34] sm:$0xf]  ;;  %v5107_v4 = vld [vmem:[%s7994_s6 + $0x38] sm:$0xf0] }
 0x592   : > { %v3050_v8 = vadd.f32 %v3045_v3, %v2967_v5  ;;  %v2968_v14 = vpop.f32.mrf.mxu2  ;;  %v5154_v3 = vor.u32 %v5523_v0, %v5153_v63  ;;  %v5171_v5 = vld [vmem:[%s7991_s4 + $0x10] sm:$0xf] }
 0x594   : > { %v3056_v9 = vadd.f32 %v5839_v6, %v3050_v8  ;;  %v3047_v12 = vpop.f32.mrf.mxu1  ;;  %v5110_v8 = vor.u32 %v5510_v1, %v5107_v4  ;;  %3506 = vmatpush.bf16.msra.mxu0 %v5154_v3 }
 0x596   : > { %v3058_v11 = vmax.f32 %v3056_v9, 0.0  ;;  %3518 = vmatpush.bf16.msrb.mxu2 %v5110_v8 }
 0x597   : > { %v2906_v15 = vpop.f32.mrf.mxu0 }
 0x598   : > { %v3064_v16 = vadd.f32 %v5840_v10, %v3058_v11  ;;  %v2969_v17 = vadd.f32 %v2968_v14, %v2906_v15  ;;  %v5509_v11 = vld [vmem:[%s7994_s6 + $0x24] sm:$0xf0]  ;;  %v5145_v14 = vld [vmem:[%s7994_s6 + $0x80] sm:$0xf] }
 0x59a   : > { %v3066_v13 = vmax.f32 %v3064_v16, 0.0  ;;  %v3051_v18 = vadd.f32 %v3047_v12, %v2969_v17  ;;  %v5521_v16 = vld [vmem:[%s7994_s6 + $0x84] sm:$0xf0]  ;;  %v5508_v17 = vld [vmem:[%s7994_s6 + $0x24] sm:$0xf] }
 0x59b   : > { %v5099_v12 = vld [vmem:[%s7994_s6 + $0x28] sm:$0xf0] }
 0x59c   : > { %v3057_v19 = vadd.f32 %v5839_v6, %v3051_v18  ;;  %v3070_v20 = vpack.c.bf16 %v3066_v13, %v6804_v7  ;;  %v5487_v6 = vld [vmem:[%s7991_s4 + $0x14] sm:$0xf0]  ;;  %v5102_v18 = vor.u32 %v5508_v17, %v5099_v12  ;;  %v5494_v12 = vld [vmem:[%s7991_s4 + $0x54] sm:$0xf] }
 0x59d   : > { %v5172_v9 = vor.u32 %v5487_v6, %v5171_v5  ;;  %v5224_v5 = vor.u32 %v5498_v61, %v5221_v62 }
 0x59e   : > { %v3059_v21 = vmax.f32 %v3057_v19, 0.0  ;;  %3300 = vmatmul.bf16.vlgmr.msra.gmra.mxu2 %v3070_v20  ;;  %3314 = vmatmul.bf16.vlgmr.msrb.gmra.mxu1 %v3070_v20  ;;  %v5163_v19 = vld [vmem:[%s7991_s4] sm:$0xf]  ;;  %v5485_v20 = vld [vmem:[%s7991_s4 + $0x4] sm:$0xf0] }
 0x59f   : > { %3651 = vmatpush.bf16.msra.mxu1 %v5172_v9  ;;  %3519 = vmatpush.bf16.msrb.mxu2 %v5102_v18  ;;  %v5496_v9 = vld [vmem:[%s7991_s4 + $0x64] sm:$0xf] }
 0x5a0   : > { %v3065_v22 = vadd.f32 %v5840_v10, %v3059_v21  ;;  %v5097_v10 = vld [vmem:[%s7994_s6 + $0x20] sm:$0xf]  ;;  %v5522_v21 = vld [vmem:[%s7994_s6 + $0x94] sm:$0xf] }
 0x5a1   : > { %v5098_v15 = vor.u32 %v5509_v11, %v5097_v10  ;;  %v5213_v10 = vld [vmem:[%s7991_s4 + $0x68] sm:$0xf0] }
 0x5a2   : > { %v3067_v23 = vmax.f32 %v3065_v22, 0.0  ;;  %v5164_v22 = vor.u32 %v5485_v20, %v5163_v19  ;;  %v5500_v20 = vld [vmem:[%s7991_s4 + $0x84] sm:$0xf] }
 0x5a3   : > { %3491 = vmatpush.bf16.msrb.mxu3 %v5098_v15  ;;  %3520 = vmatpush.bf16.msrb.mxu2 %v5094_v32  ;;  %v5237_v15 = vld [vmem:[%s7991_s4 + $0x98] sm:$0xf0]  ;;  %v5184_v32 = vor.u32 %v5488_v30, %v5181_v31 }
 0x5a4   : > { %v3087_v24 = vpack.c.bf16 %v3067_v23, %v3066_v13  ;;  %v5146_v13 = vor.u32 %v5521_v16, %v5145_v14  ;;  %v5155_v23 = vld [vmem:[%s7994_s6 + $0x98] sm:$0xf0]  ;;  %3652 = vmatpush.bf16.msra.mxu1 %v5164_v22  ;;  %v5502_v14 = vld [vmem:[%s7991_s4 + $0x94] sm:$0xf]  ;;  %v5216_v16 = vor.u32 %v5496_v9, %v5213_v10 }
 0x5a5   : > { %v5240_v18 = vor.u32 %v5502_v14, %v5237_v15 }
 0x5a6   : > { %3192 = vmatmul.bf16.vlgmr.msra.gmra.mxu3 %v3087_v24  ;;  %3206 = vmatmul.bf16.vlgmr.msrb.gmra.mxu0 %v3087_v24  ;;  %v5158_v24 = vor.u32 %v5522_v21, %v5155_v23  ;;  %v5229_v21 = vld [vmem:[%s7991_s4 + $0x88] sm:$0xf0]  ;;  %v5492_v23 = vld [vmem:[%s7991_s4 + $0x44] sm:$0xf] }
 0x5a7   : > { %3507 = vmatpush.bf16.msra.mxu0 %v5146_v13  ;;  %3492 = vmatpush.bf16.msrb.mxu3 %v5090_v28  ;;  %v5205_v13 = vld [vmem:[%s7991_s4 + $0x58] sm:$0xf0]  ;;  %v5232_v25 = vor.u32 %v5500_v20, %v5229_v21 }
 0x5a8   : > { %3521 = vmatpush.bf16.msrb.mxu2 %v5086_v39  ;;  %v5208_v22 = vor.u32 %v5494_v12, %v5205_v13  ;;  %v5189_v28 = vld [vmem:[%s7991_s4 + $0x38] sm:$0xf0] }
 0x5a9   : > { %v5192_v29 = vor.u32 %v5490_v27, %v5189_v28 }
 0x5ab   : > { %3534 = vmatpush.bf16.msrb.mxu0 %v5158_v24  ;;  %3493 = vmatpush.bf16.msrb.mxu3 %v5082_v37  ;;  %v5197_v24 = vld [vmem:[%s7991_s4 + $0x48] sm:$0xf0]  ;;  %v5484_v37 = vld [vmem:[%s7991_s4 + $0x4] sm:$0xf] }
 0x5ac   : > { %v5200_v26 = vor.u32 %v5492_v23, %v5197_v24  ;;  %v5168_v39 = vor.u32 %v5484_v37, %v5165_v38  ;;  %3818 = vmatpush.bf16.msra.mxu2 %v5531_v40 }
 0x5af   : > { %3535 = vmatpush.bf16.msrb.mxu0 %v5150_v33  ;;  %3665 = vmatpush.bf16.msra.mxu3 %v5236_v42  ;;  %v5486_v33 = vld [vmem:[%s7991_s4 + $0x14] sm:$0xf]  ;;  %v5528_v42 = vld [vmem:[%s7996_s13 + $0x20] sm:$0xff] }
 0x5b0   : > { %v5176_v36 = vor.u32 %v5486_v33, %v5173_v34 }
 0x5b3   : > { %3666 = vmatpush.bf16.msra.mxu3 %v5228_v46 }
 0x61b   : > { %v3315_v43 = vpop.f32.mrf.mxu1 }
 0x621   : > { %v3301_v49 = vpop.f32.mrf.mxu2 }
 0x623   : > { %v3207_v47 = vpop.f32.mrf.mxu0  ;;  %v3317_v55 = vpop.f32.mrf.mxu1 }
 0x624   : > { %v3316_v50 = vadd.f32 %v3315_v43, %v3207_v47  ;;  %v5525_v47 = vld [vmem:[%s7996_s13 + $0x8] sm:$0xff] }
 0x626   : > { %v3327_v57 = vadd.f32 %v3323_v51, %v3316_v50 }
 0x628   : > { %v3331_v63 = vmax.f32 %v3327_v57, 0.0 }
 0x629   : > { %v3193_v53 = vpop.f32.mrf.mxu3  ;;  %v3303_v3 = vpop.f32.mrf.mxu2 }
 0x62a   : > { %v3302_v54 = vadd.f32 %v3301_v49, %v3193_v53  ;;  %v3339_v35 = vpack.c.bf16 %v3331_v63, %v6804_v7  ;;  %v5524_v49 = vld [vmem:[%s7996_s13] sm:$0xff] }
 0x62b   : > { %v3209_v56 = vpop.f32.mrf.mxu0 }
 0x62c   : > { %v3326_v58 = vadd.f32 %v3322_v52, %v3302_v54  ;;  %v3318_v59 = vadd.f32 %v3317_v55, %v3209_v56  ;;  %v3701_v55 = vld [vmem:[%s7997_s10] sm:$0x3]  ;;  %s1774_s10 = scalar_lea.vmem [#allocation45], %s1773_s5 }
 0x62d   : > { %v3704_v20 = vperm.slane %v3701_v55, 1 }
 0x62e   : > { %v3330_v60 = vmax.f32 %v3326_v58, 0.0  ;;  %v3329_v2 = vadd.f32 %v3323_v51, %v3318_v59 }
 0x630   : > { %v3338_v0 = vpack.c.bf16 %v3330_v60, %v6804_v7  ;;  %v3333_v1 = vmax.f32 %v3329_v2, 0.0  ;;  %v5530_v7 = vld [vmem:[%s7996_s13 + $0x30] sm:$0xff]  ;;  %v5532_v2 = vld [vmem:[%s7996_s13 + $0x40] sm:$0xff] }
 0x631   : > { %v3195_v4 = vpop.f32.mrf.mxu3  ;;  %3819 = vmatpush.bf16.msra.mxu2 %v5530_v7 }
 0x632   : > { %v3361_v6 = vpack.c.bf16 %v3333_v1, %v3331_v63  ;;  %v3304_v8 = vadd.f32 %v3303_v3, %v3195_v4  ;;  %3653 = vmatmul.bf16.vlgmr.msra.gmra.mxu1 %v3338_v0 }
 0x634   : > { %v3328_v11 = vadd.f32 %v3322_v52, %v3304_v8  ;;  %5159 = vmatmul.msk.bf16.vlgmr.msra.gmra.mxu0 %vm3482_vm12, %v3361_v6  ;;  %v5533_v52 = vld [vmem:[%s7996_s13 + $0x48] sm:$0xff] }
 0x635   : > { %3673 = vmatpush.bf16.msra.mxu0 %v5224_v5  ;;  %3820 = vmatpush.bf16.msra.mxu2 %v5529_v41 }
 0x636   : > { %v3332_v17 = vmax.f32 %v3328_v11, 0.0  ;;  %3838 = vmatpush.bf16.msrb.mxu1 %v5533_v52 }
 0x638   : > { %v3360_v19 = vpack.c.bf16 %v3332_v17, %v3330_v60  ;;  %v3703_v60 = vperm.slane %v3701_v55, 0 }
 0x639   : > { %3674 = vmatpush.bf16.msra.mxu0 %v5216_v16  ;;  %3821 = vmatpush.bf16.msra.mxu2 %v5528_v42 }
 0x63a   : > { %3494 = vmatmul.bf16.vlgmr.msrb.gmra.mxu3 %v3360_v19  ;;  %3522 = vmatmul.bf16.vlgmr.msrb.gmra.mxu2 %v3360_v19 }
 0x63b   : > { %3693 = vmatpush.bf16.msrb.mxu3 %v5240_v18  ;;  %3839 = vmatpush.bf16.msrb.mxu1 %v5532_v2 }
 0x63d   : > { %3675 = vmatpush.bf16.msra.mxu0 %v5208_v22  ;;  %3822 = vmatpush.bf16.msra.mxu2 %v5527_v44 }
 0x63f   : > { %3694 = vmatpush.bf16.msrb.mxu3 %v5232_v25 }
 0x641   : > { %3676 = vmatpush.bf16.msra.mxu0 %v5200_v26  ;;  %3823 = vmatpush.bf16.msra.mxu2 %v5526_v45 }
 0x644   : > { %5160 = vmatmul.msk.bf16.vlgmr.msrb.gmra.mxu0 %vm3482_vm12, %v3361_v6 }
 0x645   : > { %3677 = vmatpush.bf16.msra.mxu0 %v5192_v29  ;;  %3824 = vmatpush.bf16.msra.mxu2 %v5525_v47 }
 0x649   : > { %3678 = vmatpush.bf16.msra.mxu0 %v5184_v32  ;;  %3825 = vmatpush.bf16.msra.mxu2 %v5524_v49 }
 0x64a   : > { %5241 = vmatmul.msk.bf16.vlgmr.msra.gmra.mxu3 %vm3482_vm12, %v3339_v35 }
 0x64d   : > { %3679 = vmatpush.bf16.msra.mxu0 %v5176_v36 }
 0x651   : > { %3680 = vmatpush.bf16.msra.mxu0 %v5168_v39  ;;  %v5841_v39 = vld [vmem:[#allocation41] ss:$0 sm:$0xff] }
 0x654   : > { %3681 = vmatmul.bf16.vlgmr.msra.gmra.mxu0 %v3338_v0  ;;  %v3715_v0 = vld [vmem:[%s7998_s0] sm:$0x3]  ;;  %s4142_s0 = sshll.u32 %s1774_s10, 4  ;;  %s4143_s0 = int_to_ptr.vmem [resolvable:$true] %s4142_s0 }
 0x655   : > { %v3717_v5 = vperm.slane %v3715_v0, 0  ;;  %v3718_v29 = vperm.slane %v3715_v0, 1 }
 0x65a   : > { %5242 = vmatmul.msk.bf16.vlgmr.msrb.gmra.mxu3 %vm3482_vm12, %v3339_v35 }
 0x6af   : > { %v3654_v54 = vpop.f32.mrf.mxu1 }
 0x6b1   : > { %v3509_v43 = vpop.f32.mrf.mxu0 }
 0x6b7   : > { %v3656_v63 = vpop.f32.mrf.mxu1 }
 0x6b9   : > { %v3511_v46 = vpop.f32.mrf.mxu0 }
 0x6bd   : > { %v3495_v48 = vpop.f32.mrf.mxu3  ;;  %v3523_v8 = vpop.f32.mrf.mxu2 }
 0x6be   : > { %v3510_v53 = vadd.f32 %v3509_v43, %v3495_v48  ;;  %v5842_v43 = vld [vmem:[%s7999_s3] ss:$0 sm:$0xff]  ;;  %s4144_s3 = sshll.u32 %s4140_s7, 4  ;;  %s4145_s3 = int_to_ptr.hbm [resolvable:$true] %s4144_s3 }
 0x6bf   : > { %s6624_s2 = sshra.s32 %s4145_s3, 4  ;;  %s6625_s2 = int_to_ptr.hbm [resolvable:$true] %s6624_s2 }
 0x6c0   : > { %v3655_v56 = vadd.f32 %v3654_v54, %v3510_v53  ;;  %v5843_v54 = vld [vmem:[#allocation2] ss:$0 sm:$0xff]  ;;  %s6626_s4 = scalar_lea.hbm %s6625_s2, 1  ;;  %p6631_p13 = scmp.lt.s32.totalorder %s6625_s2, %s7038_s19 }
 0x6c1   : > { %v3537_v50 = vpop.f32.mrf.mxu0  ;;  %p6627_p10 = scmp.ne.s32.totalorder %s6625_s2, %s6626_s4  ;;  %p6632_p0 = scmp.lt.s32.totalorder %s6630_s11, %s6626_s4 }
 0x6c2   : > { %v3538_v11 = vadd.f32 %v3537_v50, %v3523_v8 }
 0x6c3   : > { %p6628_p11 = pnand %p6627_p10, %p7078_p5  ;;  %p6633_p1 = por %p6632_p0, %p6631_p13 }
 0x6c5   : > { %v3497_v51 = vpop.f32.mrf.mxu3  ;;  %v3525_v22 = vpop.f32.mrf.mxu2  ;;  %p6629_p12 = pneg %p6628_p11 }
 0x6c6   : > { %v3512_v61 = vadd.f32 %v3511_v46, %v3497_v51 }
 0x6c7   : > { %p6634_p2 = pnand %p6633_p1, %p6629_p12 }
 0x6c8   : > { %v3657_v1 = vadd.f32 %v3656_v63, %v3512_v61 }
 0x6c9   : > { %v3539_v57 = vpop.f32.mrf.mxu0 }
 0x6ca   : > { %v3540_v24 = vadd.f32 %v3539_v57, %v3525_v22  ;;  %v5541_v22 = vld [vmem:[%s8000_s28 + $0x38] sm:$0xff] }
 0x6cb   : > { %4023 = vmatpush.bf16.msra.mxu3 %v5541_v22 }
 0x6cd   : > { %v3668_v58 = vpop.f32.mrf.mxu3 }
 0x6ce   : > { %v3669_v59 = vadd.f32 %v3668_v58, %v3655_v56 }
 0x6d0   : > { %v3707_v62 = vadd.f32 %v3703_v60, %v3669_v59 }
 0x6d1   : > { %v3682_v9 = vpop.f32.mrf.mxu0 }
 0x6d2   : > { %v3711_v4 = vmax.f32 %v3707_v62, 0.0  ;;  %v3683_v16 = vadd.f32 %v3682_v9, %v3538_v11 }
 0x6d4   : > { %v7785_v14 = vadd.f32 %v3717_v5, %v3711_v4 }
 0x6d5   : > { %v3670_v3 = vpop.f32.mrf.mxu3 }
 0x6d6   : > { %v3671_v6 = vadd.f32 %v3670_v3, %v3657_v1  ;;  %v3725_v13 = vmax.f32 %v7785_v14, 0.0  ;;  %v6806_v1 = vmov 0  }
 0x6d7   : > { %5830 = vset.pattern.permute.xlu1 %v6806_v1  ;;  %5831 = vset.pattern.permute.xlu0 %v6806_v1 }
 0x6d8   : > { %v3709_v10 = vadd.f32 %v3703_v60, %v3671_v6 }
 0x6d9   : > { %v3684_v23 = vpop.f32.mrf.mxu0 }
 0x6da   : > { %v3713_v15 = vmax.f32 %v3709_v10, 0.0  ;;  %v3685_v26 = vadd.f32 %v3684_v23, %v3540_v24  ;;  %v5540_v24 = vld [vmem:[%s8000_s28 + $0x30] sm:$0xff] }
 0x6db   : > { %4024 = vmatpush.bf16.msra.mxu3 %v5540_v24 }
 0x6dc   : > { %v7787_v17 = vadd.f32 %v3717_v5, %v3713_v15 }
 0x6dd   : > { %v3696_v12 = vpop.f32.mrf.mxu3 }
 0x6de   : > { %v3727_v18 = vmax.f32 %v7787_v17, 0.0  ;;  %v3697_v19 = vadd.f32 %v3696_v12, %v3683_v16 }
 0x6e0   : > { %v3729_v21 = vpack.c.bf16 %v3727_v18, %v3725_v13  ;;  %v3708_v25 = vadd.f32 %v3704_v20, %v3697_v19 }
 0x6e2   : > { %3826 = vmatmul.bf16.vlgmr.msra.gmra.mxu2 %v3729_v21  ;;  %v3712_v28 = vmax.f32 %v3708_v25, 0.0 }
 0x6e4   : > { %v7795_v32 = vadd.f32 %v3718_v29, %v3712_v28 }
 0x6e5   : > { %v3698_v27 = vpop.f32.mrf.mxu3 }
 0x6e6   : > { %v3699_v30 = vadd.f32 %v3698_v27, %v3685_v26  ;;  %v3726_v35 = vmax.f32 %v7795_v32, 0.0 }
 0x6e8   : > { %v3710_v31 = vadd.f32 %v3704_v20, %v3699_v30 }
 0x6ea   : > { %v3714_v33 = vmax.f32 %v3710_v31, 0.0 }
 0x6ec   : > { %v7797_v34 = vadd.f32 %v3718_v29, %v3714_v33 }
 0x6ee   : > { %v3728_v36 = vmax.f32 %v7797_v34, 0.0 }
 0x6f0   : > { %v3730_v37 = vpack.c.bf16 %v3728_v36, %v3726_v35 }
 0x6f2   : > { %5283 = vmatmul.msk.bf16.vlgmr.msrb.gmra.mxu1 %vm3482_vm12, %v3730_v37 }
 0x765   : > { %v3827_v38 = vpop.f32.mrf.mxu2 }
 0x766   : > { %v3828_v40 = vadd.f32 %v5841_v39, %v3827_v38 }
 0x76d   : > { %v3829_v42 = vpop.f32.mrf.mxu2 }
 0x76e   : > { %v3830_v44 = vadd.f32 %v5841_v39, %v3829_v42  ;;  %v5538_v42 = vld [vmem:[%s8000_s28 + $0x20] sm:$0xff] }
 0x76f   : > { %v3841_v7 = vpop.f32.mrf.mxu1 }
 0x770   : > { %v3842_v41 = vadd.f32 %v3841_v7, %v3828_v40 }
 0x772   : > { %5844 = vtanh.f32 %v3842_v41  ;;  %v5539_v41 = vld [vmem:[%s8000_s28 + $0x28] sm:$0xff] }
 0x773   : > { %4025 = vmatpush.bf16.msra.mxu3 %v5539_v41 }
 0x777   : > { %v3843_v45 = vpop.f32.mrf.mxu1  ;;  %4026 = vmatpush.bf16.msra.mxu3 %v5538_v42 }
 0x778   : > { %v5845_v46 = vpop.eup %5844  ;;  %v3844_v47 = vadd.f32 %v3843_v45, %v3830_v44  ;;  %v5536_v44 = vld [vmem:[%s8000_s28 + $0x10] sm:$0xff]  ;;  %v5535_v45 = vld [vmem:[%s8000_s28 + $0x8] sm:$0xff] }
 0x779   : > { %v3852_v48 = vmul.f32 %v5845_v46, %v5842_v43  ;;  %v5543_v46 = vld [vmem:[%s8000_s28 + $0x48] sm:$0xff] }
 0x77a   : > { %5846 = vtanh.f32 %v3844_v47  ;;  %4042 = vmatpush.bf16.msrb.mxu0 %v5543_v46  ;;  %v5534_v47 = vld [vmem:[%s8000_s28] sm:$0xff] }
 0x77b   : > { %v3854_v49 = vsel %vm1962_vm6, %v3852_v48, 0.0  ;;  %v5542_v48 = vld [vmem:[%s8000_s28 + $0x40] sm:$0xff] }
 0x77c   : > { %3855 = vadd.xlane.f32.xlu0 %v3854_v49  ;;  %v5551_v49 = vld [vmem:[%s7028_s29 + $0x38] sm:$0xff] }
 0x77d   : > { %4116 = vmatpush.bf16.msra.mxu1 %v5551_v49 }
 0x77e   : > { %4043 = vmatpush.bf16.msrb.mxu0 %v5542_v48 }
 0x780   : > { %v5847_v50 = vpop.eup %5846 }
 0x781   : > { %v3853_v51 = vmul.f32 %v5847_v50, %v5842_v43  ;;  %v5537_v43 = vld [vmem:[%s8000_s28 + $0x18] sm:$0xff]  ;;  %v5550_v50 = vld [vmem:[%s7028_s29 + $0x30] sm:$0xff] }
 0x782   : > { %4027 = vmatpush.bf16.msra.mxu3 %v5537_v43  ;;  %4117 = vmatpush.bf16.msra.mxu1 %v5550_v50 }
 0x783   : > { %v3857_v52 = vsel %vm1962_vm6, %v3853_v51, 0.0 }
 0x784   : > { %3858 = vadd.xlane.f32.xlu0 %v3857_v52  ;;  %v5549_v52 = vld [vmem:[%s7028_s29 + $0x28] sm:$0xff] }
 0x786   : > { %4028 = vmatpush.bf16.msra.mxu3 %v5536_v44  ;;  %4118 = vmatpush.bf16.msra.mxu1 %v5549_v52 }
 0x78a   : > { %4029 = vmatpush.bf16.msra.mxu3 %v5535_v45 }
 0x78e   : > { %4030 = vmatpush.bf16.msra.mxu3 %v5534_v47 }
 0x7ef   : > { %v3856_v53 = vpop.xlane.xlu0 %3855 }
 0x7f0   : > { %v3864_v55 = vadd.f32 %v5843_v54, %v3856_v53  ;;  %v5548_v53 = vld [vmem:[%s7028_s29 + $0x20] sm:$0xff] }
 0x7f1   : > { %4119 = vmatpush.bf16.msra.mxu1 %v5548_v53 }
 0x7f2   : > { %v3867_v58 = vsel %vm3866_vm13, %v3864_v55, -inf }
 0x7f7   : > { %v3859_v56 = vpop.xlane.xlu0 %3858 }
 0x7f8   : > { %v3865_v57 = vadd.f32 %v5843_v54, %v3859_v56 }
 0x7fa   : > { %v3868_v59 = vsel %vm3866_vm13, %v3865_v57, -inf }
 0x7fb   : > { %v3869_v60 = vmax.f32 %v3867_v58, %v3868_v59  ;;  %v5547_v59 = vld [vmem:[%s7028_s29 + $0x18] sm:$0xff] }
 0x7fc   : > { %4120 = vmatpush.bf16.msra.mxu1 %v5547_v59 }
 0x7fd   : > { %v3870_v2 = vrot.slane %v3869_v60, 4 }
 0x7ff   : > { %v3871_v61 = vmax.f32 %v3869_v60, %v3870_v2 }
 0x801   : > { %v3872_v62 = vrot.slane %v3871_v61, 2 }
 0x803   : > { %v3873_v63 = vmax.f32 %v3871_v61, %v3872_v62 }
 0x805   : > { %v3874_v0 = vrot.slane %v3873_v63, 1 }
 0x807   : > { %v3875_v3 = vmax.f32 %v3873_v63, %v3874_v0 }
 0x809   : > { %v3876_v4 = vsub.f32 %v3864_v55, %v3875_v3  ;;  %v3877_v5 = vsub.f32 %v3865_v57, %v3875_v3 }
 0x80b   : > { %v3878_v6 = vmul.f32 1.442695, %v3876_v4  ;;  %v3880_v8 = vmul.f32 1.442695, %v3877_v5 }
 0x80d   : > { %5848 = vpow2.f32 %v3878_v6  ;;  %v5546_v6 = vld [vmem:[%s7028_s29 + $0x10] sm:$0xff] }
 0x80e   : > { %5850 = vpow2.f32 %v3880_v8  ;;  %4121 = vmatpush.bf16.msra.mxu1 %v5546_v6  ;;  %v5545_v8 = vld [vmem:[%s7028_s29 + $0x8] sm:$0xff] }
 0x812   : > { %4122 = vmatpush.bf16.msra.mxu1 %v5545_v8 }
 0x813   : > { %v5849_v9 = vpop.eup %5848 }
 0x814   : > { %v5851_v10 = vpop.eup %5850  ;;  %v3882_v11 = vsel %vm3866_vm13, %v5849_v9, 0.0 }
 0x815   : > { %v3883_v15 = vsel %vm3866_vm13, %v5851_v10, 0.0 }
 0x816   : > { %v3884_v16 = vadd.f32 %v3883_v15, %v3882_v11  ;;  %v3959_v11 = vld [vmem:[#allocation42] sm:$0x1] }
 0x818   : > { %v3885_v12 = vrot.slane %v3884_v16, 4 }
 0x81a   : > { %v3886_v19 = vadd.f32 %v3885_v12, %v3884_v16 }
 0x81c   : > { %v3887_v20 = vrot.slane %v3886_v19, 2 }
 0x81e   : > { %v3888_v21 = vadd.f32 %v3887_v20, %v3886_v19 }
 0x820   : > { %v3889_v23 = vrot.slane %v3888_v21, 1 }
 0x822   : > { %v3890_v25 = vadd.f32 %v3889_v23, %v3888_v21  ;;  %v4067_v23 = vld [vmem:[#allocation44] sm:$0x1] }
 0x824   : > { %5852 = vrcp.f32 %v3890_v25  ;;  %v3902_v29 = vand.u32 2147483648, %v3890_v25  ;;  %v3900_v31 = vand.u32 2147483647, %v3890_v25  ;;  %vm3896_vm15 = vweird.f32 %v3890_v25 }
 0x826   : > { %v3903_v37 = vor.u32 1.1754944e-38, %v3902_v29  ;;  %vm3901_vm1 = vcmp.eq.f32.partialorder %v3900_v31, 8.507059e+37 }
 0x82a   : > { %v5853_v26 = vpop.eup %5852 }
 0x82b   : > { %v3892_v27 = vmul.f32 %v5853_v26, %v3890_v25  ;;  %vm3897_vm14 = vweird.f32 %v5853_v26 }
 0x82c   : > { %vm3898_vm0 = vmor %vm3896_vm15, %vm3897_vm14 }
 0x82d   : > { %v3893_v28 = vsub.f32 1.0, %v3892_v27 }
 0x82f   : > { %v3894_v30 = vmul.f32 %v5853_v26, %v3893_v28 }
 0x831   : > { %v3895_v33 = vadd.f32 %v5853_v26, %v3894_v30 }
 0x833   : > { %v3899_v38 = vsel %vm3898_vm0, %v5853_v26, %v3895_v33 }
 0x834   : > { %v3904_v39 = vsel %vm3901_vm1, %v3903_v37, %v3899_v38 }
 0x835   : > { %v3905_v40 = vmul.f32 %v5849_v9, %v3904_v39  ;;  %v3906_v7 = vmul.f32 %v5851_v10, %v3904_v39  ;;  %v5544_v9 = vld [vmem:[%s7028_s29] sm:$0xff] }
 0x836   : > { %4123 = vmatpush.bf16.msra.mxu1 %v5544_v9 }
 0x837   : > { %3909 = vperm.xlu1 %5830, %v3905_v40  }
 0x83f   : > { %3914 = vperm.xlu1 %5830, %v3906_v7  }
 0x8a9   : > { %v3910_v51 = vpop.permute.xlu1 %3909 }
 0x8aa   : > { %v3918_v54 = vmul.f32 %v3910_v51, %v3726_v35  ;;  %v3917_v56 = vmul.f32 %v3910_v51, %v3725_v13 }
 0x8ac   : > { %v3928_v60 = vsel %vm3482_vm12, %v3918_v54, 0.0 }
 0x8b1   : > { %v3915_v55 = vpop.permute.xlu1 %3914 }
 0x8b2   : > { %v3919_v57 = vmul.f32 %v3915_v55, %v3727_v18  ;;  %v3920_v58 = vmul.f32 %v3915_v55, %v3728_v36 }
 0x8b4   : > { %v3921_v2 = vadd.f32 %v3919_v57, %v3917_v56  ;;  %v3929_v61 = vsel %vm3482_vm12, %v3920_v58, 0.0 }
 0x8b5   : > { %v3930_v62 = vadd.f32 %v3929_v61, %v3928_v60 }
 0x8b6   : > { %v3922_v32 = vrot.slane %v3921_v2, 4 }
 0x8b7   : > { %v3931_v35 = vrot.slane %v3930_v62, 4 }
 0x8b8   : > { %v3923_v14 = vadd.f32 %v3922_v32, %v3921_v2 }
 0x8b9   : > { %v3932_v13 = vadd.f32 %v3931_v35, %v3930_v62 }
 0x8ba   : > { %v3924_v17 = vrot.slane %v3923_v14, 2 }
 0x8bb   : > { %v3933_v18 = vrot.slane %v3932_v13, 2 }
 0x8bc   : > { %v3925_v34 = vadd.f32 %v3924_v17, %v3923_v14 }
 0x8bd   : > { %v3934_v36 = vadd.f32 %v3933_v18, %v3932_v13 }
 0x8be   : > { %v3926_v63 = vrot.slane %v3925_v34, 1 }
 0x8bf   : > { %v3935_v0 = vrot.slane %v3934_v36, 1 }
 0x8c0   : > { %v3927_v1 = vadd.f32 %v3926_v63, %v3925_v34 }
 0x8c1   : > { %v3936_v3 = vadd.f32 %v3935_v0, %v3934_v36 }
 0x8c2   : > { %v3937_v4 = vpack.c.bf16 %v3927_v1, %v3927_v1 }
 0x8c3   : > { %v3938_v5 = vpack.c.bf16 %v3936_v3, %v3936_v3 }
 0x8c4   : > { %4031 = vmatmul.bf16.vlgmr.msra.gmra.mxu3 %v3937_v4 }
 0x8c5   : > { %5324 = vmatmul.msk.bf16.vlgmr.msrb.gmra.mxu0 %vm3482_vm12, %v3938_v5 }
 0x942   : > { %v4045_v10 = vpop.f32.mrf.mxu0 }
 0x947   : > { %v4032_v15 = vpop.f32.mrf.mxu3 }
 0x948   : > { %v4033_v16 = vadd.f32 %v4032_v15, %v3959_v11 }
 0x94a   : > { %v4046_v12 = vadd.f32 %v4045_v10, %v4033_v16  ;;  %v4047_v19 = vpop.f32.mrf.mxu0 }
 0x94c   : > { %v4049_v20 = vmax.f32 %v4046_v12, 0.0 }
 0x94e   : > { %v4050_v21 = vpack.c.bf16 %v4049_v20, %v4049_v20 }
 0x94f   : > { %v4034_v22 = vpop.f32.mrf.mxu3 }
 0x950   : > { %4124 = vmatmul.bf16.vlgmr.msra.gmra.mxu1 %v4050_v21 }
 0x9cd   : > { %v4125_v24 = vpop.f32.mrf.mxu1 }
 0x9ce   : > { %v4126_v25 = vadd.f32 %v4125_v24, %v4067_v23 }
 0x9d0   : > { %4130 = vst.msk [vmem:[%s1774_s10] sm:$0x1] %vm4129_vm2, %v4126_v25 }
 0x9d1   : > { %6637 = shalt.err (!%p6634_p2)
}
 0x9d2   : > { %5660 = dma.vmem_to_hbm [thread:$0]  (%p7078_p5), %s4143_s0, 16, %s4145_s3, %s4132_s1  }
 0x9d5   : > { %v4127_v26 = vpop.f32.mrf.mxu1 }
 0x9d6 PF: > { %s8001_s7 = sld [smem:[#allocation99_spill]] }
 0x9d7   : > { %s8002_s5 = sld [smem:[#allocation97_spill]] }
 0x9dc   : > { %p5720_p3 = scmp.ge.s32.totalorder %s8001_s7, 2 }
 0x9dd   : > { %s4156_s6 = sand.u32 1, %s8002_s5  }
 0x9de   : > { %p5663_p4 = pnand %p5720_p3, %p7082_p6  ;;  %s4157_s8 = scalar_lea.sflag [#allocation5], %s4156_s6 }
 0x9e0   : > { %p5664_p7 = pneg %p5663_p4 }
 0x9e2   : > { %6711 = dma.done.wait (%p5664_p7), %s4157_s8, 16  }
 0x9e3   : > { %6713 = vsyncadd (%p5664_p7), %s4157_s8, 4294967280  ;;  %s8004_s7 = sld [smem:[#allocation100_spill]]  ;;  %s8007_s0 = smov %s6720_s27 }
 0x9e4   : > { %s8005_s2 = sld [smem:[#allocation98_spill]] }
 0x9e5   : > { %s8006_s10 = sld [smem:[#allocation101_spill]] }
 0x9e9   : > { %p117_p8 = scmp.ge.s32.totalorder %s8004_s7, 4  }
 0x9ea   : > { %s8008_s27 = smov %s8005_s2 }
 0x9eb   :  { %119 = sbr.rel (!%p117_p8) target bundleno = 103 (0x67), region = 389 }
 0x9f0   :  { %4162 = vsyncpa [#allocation4], 1 }
 0x9f1   :  { %4164 = vsyncpa [#allocation4 + $0x1], 1 }
 0x9f2   :  { %4165 = vsyncpa [#allocation7], 1 }
 0x9f3   :  { %4166 = vsyncpa [#allocation10], 1 }
 0x9f4   :  { %4167 = vsyncpa [#allocation13], 1 }
 0x9f5   :  { %4168 = vsyncpa [#allocation16], 1 }
 0x9f6   :  { %4169 = vsyncpa [#allocation19], 1 }
 0x9f7   :  { %4170 = vsyncpa [#allocation22], 1 }
 0x9f8   :  { %4171 = vsyncpa [#allocation25], 1 }
 0x9f9   :  { %4172 = vsyncpa [#allocation28], 1 }
 0x9fa   :  { %4173 = vsyncpa [#allocation31], 1 }
 0x9fb   :  { %4174 = vsyncpa [#allocation34], 1 }
 0x9fc   :  { %4175 = vsyncpa [#allocation37], 1 }
 0x9fd   :  { %4176 = vsyncpa [#allocation40], 1 }
 0x9fe   :  { %4177 = vsyncpa [#allocation43], 1 }
 0x9ff   :  { %4178 = vsyncpa [#allocation5], 1 }
 0xa00   :  { %4180 = vsyncpa [#allocation5 + $0x1], 1 }

</bundles_post_ra>
